<compile_context>
chip_gen: v7x
topology: tpu7x:2x2x1
jax: 0.10.0
libtpu: 0.0.40
codegen_flags: <defaults>
</compile_context>

<pallas_src>
import functools
import math

import jax
import jax.numpy as jnp
from jax import lax
from jax.experimental import pallas as pl
from jax.experimental.pallas import tpu as pltpu

_EPS = 1e-5


# ----------------------------- Pallas kernel -------------------------------- #

def _fused_bottleneck_kernel(xp_ref, w1_ref, b1_ref, mask_ref, taps_ref,
                             b2_ref, w3_ref, b3_ref, o_ref,
                             y1p_ref, acc_ref, *, H, W):
    """Whole bottleneck for one image; weights stay VMEM-resident."""
    Wp = W + 2
    HWp = H * Wp

    # ---- stage 1: 1x1 conv (BN scale pre-folded) + bias + ReLU --------------
    a1 = jnp.dot(xp_ref[0], w1_ref[...], preferred_element_type=jnp.float32)
    y1 = jnp.maximum(a1 + b1_ref[...], 0.0) * mask_ref[...]    # zero the halo
    y1p_ref[...] = y1.astype(y1p_ref.dtype)                    # bf16 scratch

    # ---- stage 2: grouped 3x3 conv as 9 contiguous-slice tap matmuls --------
    for t in range(9):                                          # static unroll
        kh, kw = divmod(t, 3)
        off = kh * Wp + kw                                      # static offset
        contrib = jnp.dot(y1p_ref[off:off + HWp, :], taps_ref[t],
                          preferred_element_type=jnp.float32)
        if t == 0:
            acc_ref[...] = contrib                              # no zero-init pass
        else:
            acc_ref[...] += contrib

    # ---- stage 2 epilogue + stage 3 (1x1 + BN + residual + ReLU), fused -----
    y2 = jnp.maximum(acc_ref[...] + b2_ref[...], 0.0).astype(jnp.bfloat16)
    y3 = jnp.dot(y2, w3_ref[...], preferred_element_type=jnp.float32)
    res = xp_ref[0, Wp + 1:Wp + 1 + HWp, :].astype(jnp.float32)
    o_ref[0] = jnp.maximum(y3 + b3_ref[...] + res, 0.0)


# ------------------------------ forward wrapper ------------------------------ #

def bottleneck_forward(x_nchw, kp):
    """Pallas forward (stride=1, downsample=None).  x: (N, Cin, H, W) f32."""
    w1, b1, taps, b2, w3, b3 = (kp["w1"], kp["b1"], kp["taps"],
                                kp["b2"], kp["w3"], kp["b3"])
    N, Cin, H, W = x_nchw.shape
    DC = w1.shape[1]
    Cout = w3.shape[1]
    assert Cin == Cout, "downsample=None requires inplanes == planes * 4"
    Wp, Hp = W + 2, H + 3          # 1px conv halo + 2 rows of slack
    R, HWp = Hp * Wp, H * Wp

    # NCHW -> NHWC, bf16 once, pad spatially once, flatten each image.
    x_nhwc = jnp.transpose(x_nchw, (0, 2, 3, 1)).astype(jnp.bfloat16)
    xp = jnp.pad(x_nhwc, ((0, 0), (1, 2), (1, 1), (0, 0)))
    xp_flat = xp.reshape(N, R, Cin)

    # Border mask in the flattened padded layout (1 = real pixel, 0 = halo).
    hh = jnp.arange(Hp)
    ww = jnp.arange(Wp)
    valid = (((hh >= 1) & (hh <= H))[:, None]
             & ((ww >= 1) & (ww <= W))[None, :])
    mask = valid.astype(jnp.float32).reshape(R, 1)

    flops = 2 * N * (R * Cin * DC + 9 * HWp * DC * DC + HWp * DC * Cout)
    bytes_accessed = (xp_flat.size * 2 + N * HWp * Cout * 4
                      + w1.size * 2 + taps.size * 2 + w3.size * 2)

    out_flat = pl.pallas_call(
        functools.partial(_fused_bottleneck_kernel, H=H, W=W),
        out_shape=jax.ShapeDtypeStruct((N, HWp, Cout), jnp.float32),
        grid_spec=pltpu.PrefetchScalarGridSpec(
            num_scalar_prefetch=0,
            grid=(N,),
            in_specs=[
                pl.BlockSpec((1, R, Cin), lambda n: (n, 0, 0)),    # per-image tile
                pl.BlockSpec((Cin, DC), lambda n: (0, 0)),         # resident
                pl.BlockSpec((1, DC), lambda n: (0, 0)),
                pl.BlockSpec((R, 1), lambda n: (0, 0)),
                pl.BlockSpec((9, DC, DC), lambda n: (0, 0, 0)),
                pl.BlockSpec((1, DC), lambda n: (0, 0)),
                pl.BlockSpec((DC, Cout), lambda n: (0, 0)),
                pl.BlockSpec((1, Cout), lambda n: (0, 0)),
            ],
            out_specs=pl.BlockSpec((1, HWp, Cout), lambda n: (n, 0, 0)),
            scratch_shapes=[
                pltpu.VMEM((R, DC), jnp.bfloat16),    # y1 (padded, flattened)
                pltpu.VMEM((HWp, DC), jnp.float32),   # 3x3-conv accumulator
            ]),
        compiler_params=pltpu.CompilerParams(
            dimension_semantics=("parallel",),        # megacore: split batch
            vmem_limit_bytes=48 * 1024 * 1024),       # sized below v7x's 64 MiB
        cost_estimate=pl.CostEstimate(flops=flops, transcendentals=0,
                                      bytes_accessed=bytes_accessed),
    )(xp_flat, w1, b1, mask, taps, b2, w3, b3)

    # Drop the padded columns, return to NCHW.
    out = out_flat.reshape(N, H, Wp, Cout)[:, :, :W, :]
    return jnp.transpose(out, (0, 3, 1, 2))


# ------------------------------ parameter setup ------------------------------ #

def _bn_fold(gamma, beta, mean, var):
    scale = gamma / jnp.sqrt(var + _EPS)
    bias = beta - mean * scale
    return scale, bias


def prepare_params(p):
    """Fold BN into conv weights + build block-diagonal taps (done ONCE)."""
    w1, w2, w3 = p["w1"], p["w2"], p["w3"]
    D, C, DC = p["D"], p["C"], p["DC"]

    s1, b1 = _bn_fold(*p["bn1"])
    s2, b2 = _bn_fold(*p["bn2"])
    s3, b3 = _bn_fold(*p["bn3"])

    # 1x1 convs as (Cin, Cout) matmuls with BN scale folded into out-channels.
    w1_mat = jnp.transpose(w1[:, :, 0, 0], (1, 0)) * s1[None, :]
    w3_mat = jnp.transpose(w3[:, :, 0, 0], (1, 0)) * s3[None, :]

    # Grouped 3x3 conv as 9 block-diagonal (DC_in, DC_out) tap matrices.
    taps = jnp.zeros((3, 3, DC, DC), jnp.float32)
    for g in range(C):
        blk = w2[g * D:(g + 1) * D]                       # (D, D, 3, 3)  OIHW
        taps = taps.at[:, :, g * D:(g + 1) * D, g * D:(g + 1) * D].set(
            jnp.transpose(blk, (2, 3, 1, 0)))             # (kh, kw, in, out)
    taps = (taps * s2[None, None, None, :]).reshape(9, DC, DC)

    return dict(
        w1=w1_mat.astype(jnp.bfloat16), b1=b1[None, :].astype(jnp.float32),
        taps=taps.astype(jnp.bfloat16), b2=b2[None, :].astype(jnp.float32),
        w3=w3_mat.astype(jnp.bfloat16), b3=b3[None, :].astype(jnp.float32))


def make_params(key, inplanes, planes, baseWidth, cardinality):
    D = int(math.floor(planes * (baseWidth / 64)))
    C = cardinality
    DC = D * C
    out_ch = planes * 4
    ks = jax.random.split(key, 6)

    def kaiming(k, shape, fan_in):
        return math.sqrt(2.0 / fan_in) * jax.random.normal(k, shape, jnp.float32)

    w1 = kaiming(ks[0], (DC, inplanes, 1, 1), inplanes)
    w2 = kaiming(ks[1], (DC, D, 3, 3), D * 9)             # grouped conv
    w3 = kaiming(ks[2], (out_ch, DC, 1, 1), DC)

    def bn_params(k, n):
        k0, k1, k2, k3 = jax.random.split(k, 4)
        gamma = 1.0 + 0.1 * jax.random.normal(k0, (n,), jnp.float32)
        beta = 0.1 * jax.random.normal(k1, (n,), jnp.float32)
        mean = 0.1 * jax.random.normal(k2, (n,), jnp.float32)
        var = 0.5 + jax.random.uniform(k3, (n,), jnp.float32)
        return gamma, beta, mean, var

    return dict(w1=w1, w2=w2, w3=w3,
                bn1=bn_params(ks[3], DC), bn2=bn_params(ks[4], DC),
                bn3=bn_params(ks[5], out_ch),
                D=D, C=C, DC=DC, out_ch=out_ch)


# --------------------------- pure-JAX reference ------------------------------ #

def reference_forward(x, p):
    """Faithful f32 reference of Bottleneck.forward (stride=1, no downsample)."""
    def conv(v, w, groups=1, padding=0):
        return lax.conv_general_dilated(
            v, w, (1, 1), [(padding, padding)] * 2,
            feature_group_count=groups,
            dimension_numbers=("NCHW", "OIHW", "NCHW"))

    def bn(v, stats):
        gamma, beta, mean, var = stats
        s = gamma / jnp.sqrt(var + _EPS)
        return v * s[None, :, None, None] + (beta - mean * s)[None, :, None, None]

    out = jax.nn.relu(bn(conv(x, p["w1"]), p["bn1"]))
    out = jax.nn.relu(bn(conv(out, p["w2"], groups=p["C"], padding=1), p["bn2"]))
    out = bn(conv(out, p["w3"]), p["bn3"])
    return jax.nn.relu(out + x)


# ----------------------------------- main ------------------------------------ #

if __name__ == "__main__":
    # ResNeXt-50 32x4d bottleneck shape: D=4, C=32 -> DC=128, out=256.
    # Channel counts kept lane-dense (multiples of 128); spatial kept small.
    inplanes, planes, baseWidth, cardinality = 256, 64, 4, 32
    N, H, W = 2, 16, 16

    key = jax.random.PRNGKey(0)
    kx, kp = jax.random.split(key)
    params = make_params(kp, inplanes, planes, baseWidth, cardinality)
    kparams = prepare_params(params)
    x = jax.random.normal(kx, (N, inplanes, H, W), dtype=jnp.float32)

    out = jax.block_until_ready(jax.jit(bottleneck_forward)(x, kparams))
    ref = jax.block_until_ready(reference_forward(x, params))

    assert out.shape == ref.shape == (N, planes * 4, H, W)
    err = jnp.abs(out - ref)
    max_err = float(jnp.max(err))
    mean_err = float(jnp.mean(err))
    # Tolerance sized for three chained bf16-input convs (f32 accumulation);
    # the mean-error check guards against any structural bug.
    assert jnp.allclose(out, ref, atol=1.5e-1, rtol=5e-2), (max_err, mean_err)
    assert mean_err < 3e-2, (max_err, mean_err)

    print("KERNEL_OK")
</pallas_src>

<mosaic_0001>
module attributes {stable_mosaic.version = 11 : i64} {
  func.func @_fused_bottleneck_kernel(%arg0: i32, %arg1: memref<1x342x256xbf16, #tpu.memory_space<vmem>>, %arg2: memref<256x128xbf16, #tpu.memory_space<vmem>>, %arg3: memref<1x128xf32, #tpu.memory_space<vmem>>, %arg4: memref<342x1xf32, #tpu.memory_space<vmem>>, %arg5: memref<9x128x128xbf16, #tpu.memory_space<vmem>>, %arg6: memref<1x128xf32, #tpu.memory_space<vmem>>, %arg7: memref<128x256xbf16, #tpu.memory_space<vmem>>, %arg8: memref<1x256xf32, #tpu.memory_space<vmem>>, %arg9: memref<1x288x256xf32, #tpu.memory_space<vmem>>, %arg10: memref<342x128xbf16, #tpu.memory_space<vmem>>, %arg11: memref<288x128xf32, #tpu.memory_space<vmem>>) attributes {dimension_semantics = [#tpu.dimension_semantics<parallel>], iteration_bounds = array<i64: 2>, scalar_prefetch = 0 : i64, scratch_operands = 2 : i64, tpu.core_type = #tpu.core_type<tc>, window_params = [{transform_indices = @transform_0, window_bounds = array<i64: 1, 342, 256>}, {pipeline_mode = #tpu.pipeline_mode<synchronous>, transform_indices = @transform_1, window_bounds = array<i64: 256, 128>}, {pipeline_mode = #tpu.pipeline_mode<synchronous>, transform_indices = @transform_2, window_bounds = array<i64: 1, 128>}, {pipeline_mode = #tpu.pipeline_mode<synchronous>, transform_indices = @transform_3, window_bounds = array<i64: 342, 1>}, {pipeline_mode = #tpu.pipeline_mode<synchronous>, transform_indices = @transform_4, window_bounds = array<i64: 9, 128, 128>}, {pipeline_mode = #tpu.pipeline_mode<synchronous>, transform_indices = @transform_5, window_bounds = array<i64: 1, 128>}, {pipeline_mode = #tpu.pipeline_mode<synchronous>, transform_indices = @transform_6, window_bounds = array<i64: 128, 256>}, {pipeline_mode = #tpu.pipeline_mode<synchronous>, transform_indices = @transform_7, window_bounds = array<i64: 1, 256>}, {transform_indices = @transform_8, window_bounds = array<i64: 1, 288, 256>}]} {
    %c0 = arith.constant 0 : index
    %c0_0 = arith.constant 0 : index
    %c0_1 = arith.constant 0 : index
    %0 = vector.load %arg1[%c0, %c0_0, %c0_1] : memref<1x342x256xbf16, #tpu.memory_space<vmem>>, vector<1x342x256xbf16>
    %1 = vector.shape_cast %0 : vector<1x342x256xbf16> to vector<342x256xbf16>
    %c0_2 = arith.constant 0 : index
    %c0_3 = arith.constant 0 : index
    %2 = vector.load %arg2[%c0_2, %c0_3] : memref<256x128xbf16, #tpu.memory_space<vmem>>, vector<256x128xbf16>
    %cst = arith.constant dense<0.000000e+00> : vector<342x128xf32>
    %3 = tpu.matmul %1, %2, %cst {dimension_numbers = #tpu.dot_dimension_numbers<[1], [0], [0], [1], [0, 0, 1, 1], [], []>} : vector<342x256xbf16>, vector<256x128xbf16>, vector<342x128xf32> -> vector<342x128xf32>
    %c0_4 = arith.constant 0 : index
    %c0_5 = arith.constant 0 : index
    %4 = vector.load %arg3[%c0_4, %c0_5] : memref<1x128xf32, #tpu.memory_space<vmem>>, vector<1x128xf32>
    %5 = vector.broadcast %4 : vector<1x128xf32> to vector<342x128xf32>
    %6 = arith.addf %3, %5 : vector<342x128xf32>
    %cst_6 = arith.constant 0.000000e+00 : f32
    %7 = vector.broadcast %cst_6 : f32 to vector<342x128xf32>
    %8 = arith.maximumf %6, %7 : vector<342x128xf32>
    %c0_7 = arith.constant 0 : index
    %c0_8 = arith.constant 0 : index
    %9 = vector.load %arg4[%c0_7, %c0_8] : memref<342x1xf32, #tpu.memory_space<vmem>>, vector<342x1xf32>
    %10 = vector.broadcast %9 : vector<342x1xf32> to vector<342x128xf32>
    %11 = arith.mulf %8, %10 : vector<342x128xf32>
    %12 = arith.truncf %11 : vector<342x128xf32> to vector<342x128xbf16>
    %c0_9 = arith.constant 0 : index
    %c0_10 = arith.constant 0 : index
    %13 = vector.load %arg10[%c0_9, %c0_10] : memref<342x128xbf16, #tpu.memory_space<vmem>>, vector<342x128xbf16>
    tpu.vector_store %arg10[%c0_9, %c0_10], %12 {strides = array<i32>} : memref<342x128xbf16, #tpu.memory_space<vmem>>, vector<342x128xbf16>,
    %c0_11 = arith.constant 0 : index
    %c0_12 = arith.constant 0 : index
    %14 = vector.load %arg10[%c0_11, %c0_12] : memref<342x128xbf16, #tpu.memory_space<vmem>>, vector<288x128xbf16>
    %c0_13 = arith.constant 0 : index
    %c0_14 = arith.constant 0 : index
    %c0_15 = arith.constant 0 : index
    %15 = vector.load %arg5[%c0_13, %c0_14, %c0_15] : memref<9x128x128xbf16, #tpu.memory_space<vmem>>, vector<1x128x128xbf16>
    %16 = vector.shape_cast %15 : vector<1x128x128xbf16> to vector<128x128xbf16>
    %cst_16 = arith.constant dense<0.000000e+00> : vector<288x128xf32>
    %17 = tpu.matmul %14, %16, %cst_16 {dimension_numbers = #tpu.dot_dimension_numbers<[1], [0], [0], [1], [0, 0, 1, 1], [], []>} : vector<288x128xbf16>, vector<128x128xbf16>, vector<288x128xf32> -> vector<288x128xf32>
    %c0_17 = arith.constant 0 : index
    %c0_18 = arith.constant 0 : index
    %18 = vector.load %arg11[%c0_17, %c0_18] : memref<288x128xf32, #tpu.memory_space<vmem>>, vector<288x128xf32>
    tpu.vector_store %arg11[%c0_17, %c0_18], %17 {strides = array<i32>} : memref<288x128xf32, #tpu.memory_space<vmem>>, vector<288x128xf32>,
    %c1 = arith.constant 1 : index
    %c0_19 = arith.constant 0 : index
    %19 = vector.load %arg10[%c1, %c0_19] : memref<342x128xbf16, #tpu.memory_space<vmem>>, vector<288x128xbf16>
    %c1_20 = arith.constant 1 : index
    %c0_21 = arith.constant 0 : index
    %c0_22 = arith.constant 0 : index
    %20 = vector.load %arg5[%c1_20, %c0_21, %c0_22] : memref<9x128x128xbf16, #tpu.memory_space<vmem>>, vector<1x128x128xbf16>
    %21 = vector.shape_cast %20 : vector<1x128x128xbf16> to vector<128x128xbf16>
    %cst_23 = arith.constant dense<0.000000e+00> : vector<288x128xf32>
    %22 = tpu.matmul %19, %21, %cst_23 {dimension_numbers = #tpu.dot_dimension_numbers<[1], [0], [0], [1], [0, 0, 1, 1], [], []>} : vector<288x128xbf16>, vector<128x128xbf16>, vector<288x128xf32> -> vector<288x128xf32>
    %c0_24 = arith.constant 0 : index
    %c0_25 = arith.constant 0 : index
    %23 = vector.load %arg11[%c0_24, %c0_25] : memref<288x128xf32, #tpu.memory_space<vmem>>, vector<288x128xf32>
    %24 = arith.addf %23, %22 : vector<288x128xf32>
    %c0_26 = arith.constant 0 : index
    %c0_27 = arith.constant 0 : index
    %25 = vector.load %arg11[%c0_26, %c0_27] : memref<288x128xf32, #tpu.memory_space<vmem>>, vector<288x128xf32>
    tpu.vector_store %arg11[%c0_26, %c0_27], %24 {strides = array<i32>} : memref<288x128xf32, #tpu.memory_space<vmem>>, vector<288x128xf32>,
    %c2 = arith.constant 2 : index
    %c0_28 = arith.constant 0 : index
    %26 = vector.load %arg10[%c2, %c0_28] : memref<342x128xbf16, #tpu.memory_space<vmem>>, vector<288x128xbf16>
    %c2_29 = arith.constant 2 : index
    %c0_30 = arith.constant 0 : index
    %c0_31 = arith.constant 0 : index
    %27 = vector.load %arg5[%c2_29, %c0_30, %c0_31] : memref<9x128x128xbf16, #tpu.memory_space<vmem>>, vector<1x128x128xbf16>
    %28 = vector.shape_cast %27 : vector<1x128x128xbf16> to vector<128x128xbf16>
    %cst_32 = arith.constant dense<0.000000e+00> : vector<288x128xf32>
    %29 = tpu.matmul %26, %28, %cst_32 {dimension_numbers = #tpu.dot_dimension_numbers<[1], [0], [0], [1], [0, 0, 1, 1], [], []>} : vector<288x128xbf16>, vector<128x128xbf16>, vector<288x128xf32> -> vector<288x128xf32>
    %c0_33 = arith.constant 0 : index
    %c0_34 = arith.constant 0 : index
    %30 = vector.load %arg11[%c0_33, %c0_34] : memref<288x128xf32, #tpu.memory_space<vmem>>, vector<288x128xf32>
    %31 = arith.addf %30, %29 : vector<288x128xf32>
    %c0_35 = arith.constant 0 : index
    %c0_36 = arith.constant 0 : index
    %32 = vector.load %arg11[%c0_35, %c0_36] : memref<288x128xf32, #tpu.memory_space<vmem>>, vector<288x128xf32>
    tpu.vector_store %arg11[%c0_35, %c0_36], %31 {strides = array<i32>} : memref<288x128xf32, #tpu.memory_space<vmem>>, vector<288x128xf32>,
    %c18 = arith.constant 18 : index
    %c0_37 = arith.constant 0 : index
    %33 = vector.load %arg10[%c18, %c0_37] : memref<342x128xbf16, #tpu.memory_space<vmem>>, vector<288x128xbf16>
    %c3 = arith.constant 3 : index
    %c0_38 = arith.constant 0 : index
    %c0_39 = arith.constant 0 : index
    %34 = vector.load %arg5[%c3, %c0_38, %c0_39] : memref<9x128x128xbf16, #tpu.memory_space<vmem>>, vector<1x128x128xbf16>
    %35 = vector.shape_cast %34 : vector<1x128x128xbf16> to vector<128x128xbf16>
    %cst_40 = arith.constant dense<0.000000e+00> : vector<288x128xf32>
    %36 = tpu.matmul %33, %35, %cst_40 {dimension_numbers = #tpu.dot_dimension_numbers<[1], [0], [0], [1], [0, 0, 1, 1], [], []>} : vector<288x128xbf16>, vector<128x128xbf16>, vector<288x128xf32> -> vector<288x128xf32>
    %c0_41 = arith.constant 0 : index
    %c0_42 = arith.constant 0 : index
    %37 = vector.load %arg11[%c0_41, %c0_42] : memref<288x128xf32, #tpu.memory_space<vmem>>, vector<288x128xf32>
    %38 = arith.addf %37, %36 : vector<288x128xf32>
    %c0_43 = arith.constant 0 : index
    %c0_44 = arith.constant 0 : index
    %39 = vector.load %arg11[%c0_43, %c0_44] : memref<288x128xf32, #tpu.memory_space<vmem>>, vector<288x128xf32>
    tpu.vector_store %arg11[%c0_43, %c0_44], %38 {strides = array<i32>} : memref<288x128xf32, #tpu.memory_space<vmem>>, vector<288x128xf32>,
    %c19 = arith.constant 19 : index
    %c0_45 = arith.constant 0 : index
    %40 = vector.load %arg10[%c19, %c0_45] : memref<342x128xbf16, #tpu.memory_space<vmem>>, vector<288x128xbf16>
    %c4 = arith.constant 4 : index
    %c0_46 = arith.constant 0 : index
    %c0_47 = arith.constant 0 : index
    %41 = vector.load %arg5[%c4, %c0_46, %c0_47] : memref<9x128x128xbf16, #tpu.memory_space<vmem>>, vector<1x128x128xbf16>
    %42 = vector.shape_cast %41 : vector<1x128x128xbf16> to vector<128x128xbf16>
    %cst_48 = arith.constant dense<0.000000e+00> : vector<288x128xf32>
    %43 = tpu.matmul %40, %42, %cst_48 {dimension_numbers = #tpu.dot_dimension_numbers<[1], [0], [0], [1], [0, 0, 1, 1], [], []>} : vector<288x128xbf16>, vector<128x128xbf16>, vector<288x128xf32> -> vector<288x128xf32>
    %c0_49 = arith.constant 0 : index
    %c0_50 = arith.constant 0 : index
    %44 = vector.load %arg11[%c0_49, %c0_50] : memref<288x128xf32, #tpu.memory_space<vmem>>, vector<288x128xf32>
    %45 = arith.addf %44, %43 : vector<288x128xf32>
    %c0_51 = arith.constant 0 : index
    %c0_52 = arith.constant 0 : index
    %46 = vector.load %arg11[%c0_51, %c0_52] : memref<288x128xf32, #tpu.memory_space<vmem>>, vector<288x128xf32>
    tpu.vector_store %arg11[%c0_51, %c0_52], %45 {strides = array<i32>} : memref<288x128xf32, #tpu.memory_space<vmem>>, vector<288x128xf32>,
    %c20 = arith.constant 20 : index
    %c0_53 = arith.constant 0 : index
    %47 = vector.load %arg10[%c20, %c0_53] : memref<342x128xbf16, #tpu.memory_space<vmem>>, vector<288x128xbf16>
    %c5 = arith.constant 5 : index
    %c0_54 = arith.constant 0 : index
    %c0_55 = arith.constant 0 : index
    %48 = vector.load %arg5[%c5, %c0_54, %c0_55] : memref<9x128x128xbf16, #tpu.memory_space<vmem>>, vector<1x128x128xbf16>
    %49 = vector.shape_cast %48 : vector<1x128x128xbf16> to vector<128x128xbf16>
    %cst_56 = arith.constant dense<0.000000e+00> : vector<288x128xf32>
    %50 = tpu.matmul %47, %49, %cst_56 {dimension_numbers = #tpu.dot_dimension_numbers<[1], [0], [0], [1], [0, 0, 1, 1], [], []>} : vector<288x128xbf16>, vector<128x128xbf16>, vector<288x128xf32> -> vector<288x128xf32>
    %c0_57 = arith.constant 0 : index
    %c0_58 = arith.constant 0 : index
    %51 = vector.load %arg11[%c0_57, %c0_58] : memref<288x128xf32, #tpu.memory_space<vmem>>, vector<288x128xf32>
    %52 = arith.addf %51, %50 : vector<288x128xf32>
    %c0_59 = arith.constant 0 : index
    %c0_60 = arith.constant 0 : index
    %53 = vector.load %arg11[%c0_59, %c0_60] : memref<288x128xf32, #tpu.memory_space<vmem>>, vector<288x128xf32>
    tpu.vector_store %arg11[%c0_59, %c0_60], %52 {strides = array<i32>} : memref<288x128xf32, #tpu.memory_space<vmem>>, vector<288x128xf32>,
    %c36 = arith.constant 36 : index
    %c0_61 = arith.constant 0 : index
    %54 = vector.load %arg10[%c36, %c0_61] : memref<342x128xbf16, #tpu.memory_space<vmem>>, vector<288x128xbf16>
    %c6 = arith.constant 6 : index
    %c0_62 = arith.constant 0 : index
    %c0_63 = arith.constant 0 : index
    %55 = vector.load %arg5[%c6, %c0_62, %c0_63] : memref<9x128x128xbf16, #tpu.memory_space<vmem>>, vector<1x128x128xbf16>
    %56 = vector.shape_cast %55 : vector<1x128x128xbf16> to vector<128x128xbf16>
    %cst_64 = arith.constant dense<0.000000e+00> : vector<288x128xf32>
    %57 = tpu.matmul %54, %56, %cst_64 {dimension_numbers = #tpu.dot_dimension_numbers<[1], [0], [0], [1], [0, 0, 1, 1], [], []>} : vector<288x128xbf16>, vector<128x128xbf16>, vector<288x128xf32> -> vector<288x128xf32>
    %c0_65 = arith.constant 0 : index
    %c0_66 = arith.constant 0 : index
    %58 = vector.load %arg11[%c0_65, %c0_66] : memref<288x128xf32, #tpu.memory_space<vmem>>, vector<288x128xf32>
    %59 = arith.addf %58, %57 : vector<288x128xf32>
    %c0_67 = arith.constant 0 : index
    %c0_68 = arith.constant 0 : index
    %60 = vector.load %arg11[%c0_67, %c0_68] : memref<288x128xf32, #tpu.memory_space<vmem>>, vector<288x128xf32>
    tpu.vector_store %arg11[%c0_67, %c0_68], %59 {strides = array<i32>} : memref<288x128xf32, #tpu.memory_space<vmem>>, vector<288x128xf32>,
    %c37 = arith.constant 37 : index
    %c0_69 = arith.constant 0 : index
    %61 = vector.load %arg10[%c37, %c0_69] : memref<342x128xbf16, #tpu.memory_space<vmem>>, vector<288x128xbf16>
    %c7 = arith.constant 7 : index
    %c0_70 = arith.constant 0 : index
    %c0_71 = arith.constant 0 : index
    %62 = vector.load %arg5[%c7, %c0_70, %c0_71] : memref<9x128x128xbf16, #tpu.memory_space<vmem>>, vector<1x128x128xbf16>
    %63 = vector.shape_cast %62 : vector<1x128x128xbf16> to vector<128x128xbf16>
    %cst_72 = arith.constant dense<0.000000e+00> : vector<288x128xf32>
    %64 = tpu.matmul %61, %63, %cst_72 {dimension_numbers = #tpu.dot_dimension_numbers<[1], [0], [0], [1], [0, 0, 1, 1], [], []>} : vector<288x128xbf16>, vector<128x128xbf16>, vector<288x128xf32> -> vector<288x128xf32>
    %c0_73 = arith.constant 0 : index
    %c0_74 = arith.constant 0 : index
    %65 = vector.load %arg11[%c0_73, %c0_74] : memref<288x128xf32, #tpu.memory_space<vmem>>, vector<288x128xf32>
    %66 = arith.addf %65, %64 : vector<288x128xf32>
    %c0_75 = arith.constant 0 : index
    %c0_76 = arith.constant 0 : index
    %67 = vector.load %arg11[%c0_75, %c0_76] : memref<288x128xf32, #tpu.memory_space<vmem>>, vector<288x128xf32>
    tpu.vector_store %arg11[%c0_75, %c0_76], %66 {strides = array<i32>} : memref<288x128xf32, #tpu.memory_space<vmem>>, vector<288x128xf32>,
    %c38 = arith.constant 38 : index
    %c0_77 = arith.constant 0 : index
    %68 = vector.load %arg10[%c38, %c0_77] : memref<342x128xbf16, #tpu.memory_space<vmem>>, vector<288x128xbf16>
    %c8 = arith.constant 8 : index
    %c0_78 = arith.constant 0 : index
    %c0_79 = arith.constant 0 : index
    %69 = vector.load %arg5[%c8, %c0_78, %c0_79] : memref<9x128x128xbf16, #tpu.memory_space<vmem>>, vector<1x128x128xbf16>
    %70 = vector.shape_cast %69 : vector<1x128x128xbf16> to vector<128x128xbf16>
    %cst_80 = arith.constant dense<0.000000e+00> : vector<288x128xf32>
    %71 = tpu.matmul %68, %70, %cst_80 {dimension_numbers = #tpu.dot_dimension_numbers<[1], [0], [0], [1], [0, 0, 1, 1], [], []>} : vector<288x128xbf16>, vector<128x128xbf16>, vector<288x128xf32> -> vector<288x128xf32>
    %c0_81 = arith.constant 0 : index
    %c0_82 = arith.constant 0 : index
    %72 = vector.load %arg11[%c0_81, %c0_82] : memref<288x128xf32, #tpu.memory_space<vmem>>, vector<288x128xf32>
    %73 = arith.addf %72, %71 : vector<288x128xf32>
    %c0_83 = arith.constant 0 : index
    %c0_84 = arith.constant 0 : index
    %74 = vector.load %arg11[%c0_83, %c0_84] : memref<288x128xf32, #tpu.memory_space<vmem>>, vector<288x128xf32>
    tpu.vector_store %arg11[%c0_83, %c0_84], %73 {strides = array<i32>} : memref<288x128xf32, #tpu.memory_space<vmem>>, vector<288x128xf32>,
    %c0_85 = arith.constant 0 : index
    %c0_86 = arith.constant 0 : index
    %75 = vector.load %arg11[%c0_85, %c0_86] : memref<288x128xf32, #tpu.memory_space<vmem>>, vector<288x128xf32>
    %c0_87 = arith.constant 0 : index
    %c0_88 = arith.constant 0 : index
    %76 = vector.load %arg6[%c0_87, %c0_88] : memref<1x128xf32, #tpu.memory_space<vmem>>, vector<1x128xf32>
    %77 = vector.broadcast %76 : vector<1x128xf32> to vector<288x128xf32>
    %78 = arith.addf %75, %77 : vector<288x128xf32>
    %cst_89 = arith.constant 0.000000e+00 : f32
    %79 = vector.broadcast %cst_89 : f32 to vector<288x128xf32>
    %80 = arith.maximumf %78, %79 : vector<288x128xf32>
    %81 = arith.truncf %80 : vector<288x128xf32> to vector<288x128xbf16>
    %c0_90 = arith.constant 0 : index
    %c0_91 = arith.constant 0 : index
    %82 = vector.load %arg7[%c0_90, %c0_91] : memref<128x256xbf16, #tpu.memory_space<vmem>>, vector<128x256xbf16>
    %cst_92 = arith.constant dense<0.000000e+00> : vector<288x256xf32>
    %83 = tpu.matmul %81, %82, %cst_92 {dimension_numbers = #tpu.dot_dimension_numbers<[1], [0], [0], [1], [0, 0, 1, 1], [], []>} : vector<288x128xbf16>, vector<128x256xbf16>, vector<288x256xf32> -> vector<288x256xf32>
    %c0_93 = arith.constant 0 : index
    %c19_94 = arith.constant 19 : index
    %c0_95 = arith.constant 0 : index
    %84 = vector.load %arg1[%c0_93, %c19_94, %c0_95] : memref<1x342x256xbf16, #tpu.memory_space<vmem>>, vector<1x288x256xbf16>
    %85 = vector.shape_cast %84 : vector<1x288x256xbf16> to vector<288x256xbf16>
    %86 = arith.extf %85 : vector<288x256xbf16> to vector<288x256xf32>
    %c0_96 = arith.constant 0 : index
    %c0_97 = arith.constant 0 : index
    %87 = vector.load %arg8[%c0_96, %c0_97] : memref<1x256xf32, #tpu.memory_space<vmem>>, vector<1x256xf32>
    %88 = vector.broadcast %87 : vector<1x256xf32> to vector<288x256xf32>
    %89 = arith.addf %83, %88 : vector<288x256xf32>
    %90 = arith.addf %89, %86 : vector<288x256xf32>
    %cst_98 = arith.constant 0.000000e+00 : f32
    %91 = vector.broadcast %cst_98 : f32 to vector<288x256xf32>
    %92 = arith.maximumf %90, %91 : vector<288x256xf32>
    %c0_99 = arith.constant 0 : index
    %c0_100 = arith.constant 0 : index
    %c0_101 = arith.constant 0 : index
    %93 = vector.load %arg9[%c0_99, %c0_100, %c0_101] : memref<1x288x256xf32, #tpu.memory_space<vmem>>, vector<1x288x256xf32>
    %94 = vector.shape_cast %93 : vector<1x288x256xf32> to vector<288x256xf32>
    %95 = vector.shape_cast %92 : vector<288x256xf32> to vector<1x288x256xf32>
    tpu.vector_store %arg9[%c0_99, %c0_100, %c0_101], %95 {strides = array<i32>} : memref<1x288x256xf32, #tpu.memory_space<vmem>>, vector<1x288x256xf32>,
    return
  }
  func.func @transform_0(%arg0: i32) -> (i32, i32, i32) {
    %c0_i32 = arith.constant 0 : i32
    %c0_i32_0 = arith.constant 0 : i32
    %c0_i32_1 = arith.constant 0 : i32
    return %arg0, %c0_i32, %c0_i32_0 : i32, i32, i32
  }
  func.func @transform_1(%arg0: i32) -> (i32, i32) {
    %c0_i32 = arith.constant 0 : i32
    %c0_i32_0 = arith.constant 0 : i32
    %c0_i32_1 = arith.constant 0 : i32
    return %c0_i32, %c0_i32_0 : i32, i32
  }
  func.func @transform_2(%arg0: i32) -> (i32, i32) {
    %c0_i32 = arith.constant 0 : i32
    %c0_i32_0 = arith.constant 0 : i32
    %c0_i32_1 = arith.constant 0 : i32
    return %c0_i32, %c0_i32_0 : i32, i32
  }
  func.func @transform_3(%arg0: i32) -> (i32, i32) {
    %c0_i32 = arith.constant 0 : i32
    %c0_i32_0 = arith.constant 0 : i32
    %c0_i32_1 = arith.constant 0 : i32
    return %c0_i32, %c0_i32_0 : i32, i32
  }
  func.func @transform_4(%arg0: i32) -> (i32, i32, i32) {
    %c0_i32 = arith.constant 0 : i32
    %c0_i32_0 = arith.constant 0 : i32
    %c0_i32_1 = arith.constant 0 : i32
    %c0_i32_2 = arith.constant 0 : i32
    return %c0_i32, %c0_i32_0, %c0_i32_1 : i32, i32, i32
  }
  func.func @transform_5(%arg0: i32) -> (i32, i32) {
    %c0_i32 = arith.constant 0 : i32
    %c0_i32_0 = arith.constant 0 : i32
    %c0_i32_1 = arith.constant 0 : i32
    return %c0_i32, %c0_i32_0 : i32, i32
  }
  func.func @transform_6(%arg0: i32) -> (i32, i32) {
    %c0_i32 = arith.constant 0 : i32
    %c0_i32_0 = arith.constant 0 : i32
    %c0_i32_1 = arith.constant 0 : i32
    return %c0_i32, %c0_i32_0 : i32, i32
  }
  func.func @transform_7(%arg0: i32) -> (i32, i32) {
    %c0_i32 = arith.constant 0 : i32
    %c0_i32_0 = arith.constant 0 : i32
    %c0_i32_1 = arith.constant 0 : i32
    return %c0_i32, %c0_i32_0 : i32, i32
  }
  func.func @transform_8(%arg0: i32) -> (i32, i32, i32) {
    %c0_i32 = arith.constant 0 : i32
    %c0_i32_0 = arith.constant 0 : i32
    %c0_i32_1 = arith.constant 0 : i32
    return %arg0, %c0_i32, %c0_i32_0 : i32, i32, i32
  }
}

</mosaic_0001>

<bundles_post_ra>
// kernel: bottleneck_forward.1
= control target key start
LH: loop header
LB: loop body
LE: loop exit
PB: predicated region body
PF: predicated region fallthrough
CT: control target
= control target key end

     0   :  { %s9756_s27 = smov 0   ;;  %s10955_s0 = inlined_call_operand.vmem [shape: bf16[2,342,256], index: 0, kind: input, shape index: {}]   ;;  %s10956_s1 = inlined_call_operand.vmem [shape: bf16[256,128], index: 1, kind: input, shape index: {}]   ;;  %s10957_s2 = inlined_call_operand.vmem [shape: f32[1,128], index: 2, kind: input, shape index: {}]   ;;  %s10958_s3 = inlined_call_operand.vmem [shape: f32[342,1], index: 3, kind: input, shape index: {}]   ;;  %s10959_s4 = inlined_call_operand.vmem [shape: bf16[9,128,128], index: 4, kind: input, shape index: {}]   ;;  %s10960_s5 = inlined_call_operand.vmem [shape: f32[1,128], index: 5, kind: input, shape index: {}]   ;;  %s10961_s6 = inlined_call_operand.vmem [shape: bf16[128,256], index: 6, kind: input, shape index: {}]   ;;  %s10962_s7 = inlined_call_operand.vmem [shape: f32[1,256], index: 7, kind: input, shape index: {}]   ;;  %s10963_s8 = inlined_call_operand.vmem [shape: f32[2,288,256], index: 8, kind: output, shape index: {}]  }
   0x1 LB: > { %s7683_s28 = sadd.s32 4294967295, %s9708_s27   ;;  %p7687_p0 = scmp.ge.s32.totalorder %s9708_s27, 1  ;;  %s9708_s27 = sphi %s9756_s27, %s18_s27  }
   0x2   : > { %p262_p1 = scmp.lt.s32.totalorder %s9708_s27, 3 }
   0x4   : > { %p263_p2 = pnand %p7687_p0, %p262_p1 }
   0x5   : > { %v9354_v0 = vld [vmem:[%s10956_s1] sm:$0xff] (!%p263_p2)   ;;  %v9710_v1 = vmov (!%p263_p2), 0   ;;  %v9355_v2 = vld [vmem:[%s10956_s1 + $0x8] sm:$0xff] (!%p263_p2)   ;;  %p296_p3 = scmp.lt.s32.totalorder (!%p263_p2), %s7683_s28, 1  ;;  %v9356_v3 = vld [vmem:[%s10956_s1 + $0x10] sm:$0xff] (!%p263_p2)   ;;  %vm2685_vm0 = vcmask (!%p263_p2), 1046528  }
   0x6   : > { %266 = sbr.rel (%p263_p2) target bundleno = 1396 (0x574), region = 52  ;;  %702 = vmatprep.subr.bf16.mxu0 (!%p263_p2), %v9710_v1  ;;  %9352 = vset.pattern.permute.xlu0 (!%p263_p2), %v9710_v1  ;;  %v9357_v4 = vld [vmem:[%s10956_s1 + $0x18] sm:$0xff] (!%p263_p2)   ;;  %v9358_v5 = vld [vmem:[%s10956_s1 + $0x20] sm:$0xff] (!%p263_p2)   ;;  %v9359_v7 = vld [vmem:[%s10956_s1 + $0x28] sm:$0xff] (!%p263_p2)   ;;  %vm2038_vm1 = vsmask.f32 (!%p263_p2), 7424 }
   0x7   : > { %703 = vmatpush1.bf16.msra.mxu0 (!%p263_p2), %v9354_v0  ;;  %9353 = vset.pattern.permute.xlu1 (!%p263_p2), %v9710_v1  ;;  %v9360_v8 = vld [vmem:[%s10956_s1 + $0x30] sm:$0xff] (!%p263_p2)   ;;  %v9361_v9 = vld [vmem:[%s10956_s1 + $0x38] sm:$0xff] (!%p263_p2)   ;;  %v953_v10 = vld [vmem:[%s10958_s3] sm:$0xff] (!%p263_p2)  ;;  %vm3756_vm2 = vsmask.f32 (!%p263_p2), 6400  ;;  %vm4425_vm3 = vcmask (!%p263_p2), 1045504  }
   0x8   : > { %704 = vmatprep.subr.bf16.mxu0 (!%p263_p2), %v9710_v1  ;;  %v9362_v11 = vld [vmem:[%s10956_s1 + $0x40] sm:$0xff] (!%p263_p2)   ;;  %998 = vperm.xlu0 (!%p263_p2), %9352, %v953_v10   ;;  %v955_v12 = vld [vmem:[%s10958_s3 + $0x10] sm:$0xff] (!%p263_p2)  ;;  %v954_v13 = vld [vmem:[%s10958_s3 + $0x8] sm:$0xff] (!%p263_p2)  ;;  %vm5496_vm4 = vsmask.f32 (!%p263_p2), 5376  ;;  %vm6165_vm5 = vcmask (!%p263_p2), 1044480  }
   0x9   : > { %1008 = vperm.xlu1 (!%p263_p2), %9353, %v955_v12   ;;  %v956_v14 = vld [vmem:[%s10958_s3 + $0x18] sm:$0xff] (!%p263_p2)  ;;  %v9363_v15 = vld [vmem:[%s10956_s1 + $0x48] sm:$0xff] (!%p263_p2)   ;;  %v957_v16 = vld [vmem:[%s10958_s3 + $0x20] sm:$0xff] (!%p263_p2) }
   0xa   : > { %v958_v17 = vld [vmem:[%s10958_s3 + $0x28] sm:$0xff] (!%p263_p2)  ;;  %v9364_v18 = vld [vmem:[%s10956_s1 + $0x50] sm:$0xff] (!%p263_p2)   ;;  %v960_v20 = vld [vmem:[%s10958_s3 + $0x38] sm:$0xff] (!%p263_p2) }
   0xb   : > { %705 = vmatpush1.bf16.msra.mxu0 (!%p263_p2), %v9355_v2  ;;  %v959_v19 = vld [vmem:[%s10958_s3 + $0x30] sm:$0xff] (!%p263_p2)  ;;  %v9365_v21 = vld [vmem:[%s10956_s1 + $0x58] sm:$0xff] (!%p263_p2)   ;;  %v961_v22 = vld [vmem:[%s10958_s3 + $0x40] sm:$0xff] (!%p263_p2) }
   0xc   : > { %706 = vmatprep.subr.bf16.mxu0 (!%p263_p2), %v9710_v1  ;;  %1003 = vperm.xlu0 (!%p263_p2), %9352, %v954_v13   ;;  %v962_v23 = vld [vmem:[%s10958_s3 + $0x48] sm:$0xff] (!%p263_p2)  ;;  %v9366_v24 = vld [vmem:[%s10956_s1 + $0x60] sm:$0xff] (!%p263_p2)   ;;  %v963_v25 = vld [vmem:[%s10958_s3 + $0x50] sm:$0xff] (!%p263_p2) }
   0xd   : > { %s10965_s28 = smov (!%p296_p3, %s7683_s28), 1  ;;  %1013 = vperm.xlu1 %9353, %v956_v14   ;;  %v964_v26 = vld [vmem:[%s10958_s3 + $0x58] sm:$0xff]  ;;  %v9367_v27 = vld [vmem:[%s10956_s1 + $0x68] sm:$0xff]   ;;  %v965_v28 = vld [vmem:[%s10958_s3 + $0x60] sm:$0xff] }
   0xe   : > { %s9341_s15 = smul.u32 344, %s10965_s28  ;;  %v966_v29 = vld [vmem:[%s10958_s3 + $0x68] sm:$0xff]  ;;  %v9368_v30 = vld [vmem:[%s10956_s1 + $0x70] sm:$0xff]   ;;  %v968_v32 = vld [vmem:[%s10958_s3 + $0x78] sm:$0xff] }
   0xf   : > { %707 = vmatpush1.bf16.msra.mxu0 %v9356_v3  ;;  %v967_v31 = vld [vmem:[%s10958_s3 + $0x70] sm:$0xff]  ;;  %v9369_v33 = vld [vmem:[%s10956_s1 + $0x78] sm:$0xff]   ;;  %v969_v34 = vld [vmem:[%s10958_s3 + $0x80] sm:$0xff]  ;;  %s9342_s30 = smul.u32 576, %s10965_s28 }
  0x10   : > { %708 = vmatprep.subr.bf16.mxu0 %v9710_v1  ;;  %s9791_s20 = scalar_lea.vmem %s10955_s0, %s9341_s15  ;;  %1018 = vperm.xlu0 %9352, %v957_v16   ;;  %v970_v36 = vld [vmem:[%s10958_s3 + $0x88] sm:$0xff]  ;;  %v971_v38 = vld [vmem:[%s10958_s3 + $0x90] sm:$0xff]  ;;  %v972_v39 = vld [vmem:[%s10958_s3 + $0x98] sm:$0xff] }
  0x11   : > { %v9372_v6 = vld [vmem:[%s9791_s20 + $0x4] ss:$8 sps:$4 sm:$0xff]   ;;  %1023 = vperm.xlu1 %9353, %v958_v17   ;;  %v9370_v35 = vld [vmem:[%s9791_s20] ss:$8 sps:$4 sm:$0xff]   ;;  %v9373_v37 = vld [vmem:[%s9791_s20 + $0x14] ss:$8 sps:$4 sm:$0xff]   ;;  %s10709_s10 = scalar_lea.vmem %s10963_s8, %s9342_s30 }
  0x12   : > { %734 = vmatprep.mubr.bf16.mxu0 %v9372_v6  ;;  %v973_v40 = vld [vmem:[%s10958_s3 + $0xa0] sm:$0xff]  ;;  %v9375_v41 = vld [vmem:[%s9791_s20 + $0x10] ss:$8 sps:$4 sm:$0xff]   ;;  %v974_v42 = vld [vmem:[%s10958_s3 + $0xa8] sm:$0xff] }
  0x13   : > { %709 = vmatpush1.bf16.msra.mxu0 %v9357_v4  ;;  %v9376_v43 = vld [vmem:[%s9791_s20 + $0x24] ss:$8 sps:$4 sm:$0xff]   ;;  %v975_v44 = vld [vmem:[%s10958_s3 + $0xb0] sm:$0xff]  ;;  %v976_v45 = vld [vmem:[%s10958_s3 + $0xb8] sm:$0xff] }
  0x14   : > { %710 = vmatprep.subr.bf16.mxu0 %v9710_v1  ;;  %1028 = vperm.xlu0 %9352, %v959_v19   ;;  %v977_v46 = vld [vmem:[%s10958_s3 + $0xc0] sm:$0xff]  ;;  %v978_v48 = vld [vmem:[%s10958_s3 + $0xc8] sm:$0xff]  ;;  %v9379_v49 = vld [vmem:[%s9791_s20 + $0x34] ss:$8 sps:$4 sm:$0xff]  }
  0x15   : > { %1033 = vperm.xlu1 %9353, %v960_v20   ;;  %v9378_v47 = vld [vmem:[%s9791_s20 + $0x20] ss:$8 sps:$4 sm:$0xff]   ;;  %v979_v50 = vld [vmem:[%s10958_s3 + $0xd0] sm:$0xff]  ;;  %v980_v51 = vld [vmem:[%s10958_s3 + $0xd8] sm:$0xff] }
  0x16   : > { %v981_v52 = vld [vmem:[%s10958_s3 + $0xe0] sm:$0xff]  ;;  %v9381_v53 = vld [vmem:[%s9791_s20 + $0x30] ss:$8 sps:$4 sm:$0xff]   ;;  %v982_v54 = vld [vmem:[%s10958_s3 + $0xe8] sm:$0xff] }
  0x17   : > { %711 = vmatpush1.bf16.msra.mxu0 %v9358_v5  ;;  %v9382_v55 = vld [vmem:[%s9791_s20 + $0x44] ss:$8 sps:$4 sm:$0xff]   ;;  %v983_v56 = vld [vmem:[%s10958_s3 + $0xf0] sm:$0xff]  ;;  %v984_v57 = vld [vmem:[%s10958_s3 + $0xf8] sm:$0xff] }
  0x18   : > { %712 = vmatprep.subr.bf16.mxu0 %v9710_v1  ;;  %1038 = vperm.xlu0 %9352, %v961_v22   ;;  %v985_v58 = vld [vmem:[%s10958_s3 + $0x100] sm:$0xff]  ;;  %v986_v60 = vld [vmem:[%s10958_s3 + $0x108] sm:$0xff]  ;;  %v9385_v61 = vld [vmem:[%s9791_s20 + $0x54] ss:$8 sps:$4 sm:$0xff]  }
  0x19   : > { %1043 = vperm.xlu1 %9353, %v962_v23   ;;  %v9384_v59 = vld [vmem:[%s9791_s20 + $0x40] ss:$8 sps:$4 sm:$0xff]   ;;  %v987_v62 = vld [vmem:[%s10958_s3 + $0x110] sm:$0xff]  ;;  %v988_v63 = vld [vmem:[%s10958_s3 + $0x118] sm:$0xff] }
  0x1a   : > { %v989_v0 = vld [vmem:[%s10958_s3 + $0x120] sm:$0xff]  ;;  %v9387_v2 = vld [vmem:[%s9791_s20 + $0x50] ss:$8 sps:$4 sm:$0xff]   ;;  %v990_v3 = vld [vmem:[%s10958_s3 + $0x128] sm:$0xff] }
  0x1b   : > { %713 = vmatpush1.bf16.msra.mxu0 %v9359_v7  ;;  %v9388_v4 = vld [vmem:[%s9791_s20 + $0x64] ss:$8 sps:$4 sm:$0xff]   ;;  %v991_v5 = vld [vmem:[%s10958_s3 + $0x130] sm:$0xff]  ;;  %v992_v6 = vld [vmem:[%s10958_s3 + $0x138] sm:$0xff] }
  0x1c   : > { %714 = vmatprep.subr.bf16.mxu0 %v9710_v1  ;;  %1048 = vperm.xlu0 %9352, %v963_v25   ;;  %v993_v7 = vld [vmem:[%s10958_s3 + $0x140] sm:$0xff]  ;;  %v994_v10 = vld [vmem:[%s10958_s3 + $0x148] sm:$0xff]  ;;  %v995_v12 = vld [vmem:[%s10958_s3 + $0x150] sm:$0x3f] }
  0x1d   : > { %1053 = vperm.xlu1 %9353, %v964_v26   ;;  %v9393_v13 = vld [vmem:[%s9791_s20 + $0x70] ss:$8 sps:$4 sm:$0xff]   ;;  %v9394_v14 = vld [vmem:[%s9791_s20 + $0x84] ss:$8 sps:$4 sm:$0xff]   ;;  %v9397_v16 = vld [vmem:[%s9791_s20 + $0x94] ss:$8 sps:$4 sm:$0xff]  }
  0x1e   : > { %v9399_v17 = vld [vmem:[%s9791_s20 + $0x90] ss:$8 sps:$4 sm:$0xff]   ;;  %v9402_v19 = vld [vmem:[%s9791_s20 + $0xa0] ss:$8 sps:$4 sm:$0xff]   ;;  %v9403_v20 = vld [vmem:[%s9791_s20 + $0xb4] ss:$8 sps:$4 sm:$0xff]  }
  0x1f   : > { %715 = vmatpush1.bf16.msra.mxu0 %v9360_v8  ;;  %v9435_v8 = vld [vmem:[%s10959_s4] sm:$0xff]   ;;  %v9405_v22 = vld [vmem:[%s9791_s20 + $0xb0] ss:$8 sps:$4 sm:$0xff]  }
  0x20   : > { %716 = vmatprep.subr.bf16.mxu0 %v9710_v1  ;;  %1058 = vperm.xlu0 %9352, %v965_v28   ;;  %v9406_v23 = vld [vmem:[%s9791_s20 + $0xc4] ss:$8 sps:$4 sm:$0xff]   ;;  %v9439_v26 = vld [vmem:[%s10959_s4 + $0x18] sm:$0xff]  }
  0x21   : > { %1063 = vperm.xlu1 %9353, %v966_v29   ;;  %v9438_v25 = vld [vmem:[%s10959_s4 + $0x80] sm:$0xff]   ;;  %v9440_v28 = vld [vmem:[%s10959_s4 + $0x88] sm:$0xff]   ;;  %v9409_v29 = vld [vmem:[%s9791_s20 + $0xd4] ss:$8 sps:$4 sm:$0xff]  }
  0x22   : > { %8689 = vmatprep.subr.bf16.mxu1 %v9438_v25 }
  0x23   : > { %717 = vmatpush1.bf16.msra.mxu0 %v9361_v9  ;;  %v9390_v9 = vld [vmem:[%s9791_s20 + $0x60] ss:$8 sps:$4 sm:$0xff]   ;;  %8690 = vmatpush3.bf16.msra.mxu1 %v9438_v25 }
  0x24   : > { %718 = vmatprep.subr.bf16.mxu0 %v9710_v1  ;;  %1068 = vperm.xlu0 %9352, %v967_v31   ;;  %v9442_v31 = vld [vmem:[%s10959_s4 + $0x90] sm:$0xff]  }
  0x25   : > { %1073 = vperm.xlu1 %9353, %v968_v32   ;;  %8691 = vmatprep.subr.bf16.mxu1 %v9440_v28  ;;  %v9443_v32 = vld [vmem:[%s10959_s4 + $0x28] sm:$0xff]  }
  0x27   : > { %719 = vmatpush1.bf16.msra.mxu0 %v9362_v11  ;;  %v9391_v11 = vld [vmem:[%s9791_s20 + $0x74] ss:$8 sps:$4 sm:$0xff]   ;;  %8692 = vmatpush3.bf16.msra.mxu1 %v9440_v28 }
  0x28   : > { %720 = vmatprep.subr.bf16.mxu0 %v9710_v1  ;;  %1078 = vperm.xlu0 %9352, %v969_v34   ;;  %v9444_v34 = vld [vmem:[%s10959_s4 + $0x98] sm:$0xff]  }
  0x29   : > { %1083 = vperm.xlu1 %9353, %v970_v36   ;;  %8693 = vmatprep.subr.bf16.mxu1 %v9442_v31  ;;  %v9445_v36 = vld [vmem:[%s10959_s4 + $0x30] sm:$0xff]  }
  0x2b   : > { %721 = vmatpush1.bf16.msra.mxu0 %v9363_v15  ;;  %v9396_v15 = vld [vmem:[%s9791_s20 + $0x80] ss:$8 sps:$4 sm:$0xff]   ;;  %8694 = vmatpush3.bf16.msra.mxu1 %v9442_v31 }
  0x2c   : > { %722 = vmatprep.subr.bf16.mxu0 %v9710_v1  ;;  %1088 = vperm.xlu0 %9352, %v971_v38   ;;  %v9448_v38 = vld [vmem:[%s10959_s4 + $0x38] sm:$0xff]  }
  0x2d   : > { %1093 = vperm.xlu1 %9353, %v972_v39   ;;  %8695 = vmatprep.subr.bf16.mxu1 %v9444_v34  ;;  %v9414_v39 = vld [vmem:[%s9791_s20 + $0xe0] ss:$8 sps:$4 sm:$0xff]  }
  0x2f   : > { %723 = vmatpush1.bf16.msra.mxu0 %v9364_v18  ;;  %v9400_v18 = vld [vmem:[%s9791_s20 + $0xa4] ss:$8 sps:$4 sm:$0xff]   ;;  %8696 = vmatpush3.bf16.msra.mxu1 %v9444_v34 }
  0x30   : > { %724 = vmatprep.subr.bf16.mxu0 %v9710_v1  ;;  %1098 = vperm.xlu0 %9352, %v973_v40   ;;  %v9449_v40 = vld [vmem:[%s10959_s4 + $0xa8] sm:$0xff]  }
  0x31   : > { %1103 = vperm.xlu1 %9353, %v974_v42   ;;  %v9451_v42 = vld [vmem:[%s10959_s4 + $0xb0] sm:$0xff]  }
  0x33   : > { %725 = vmatpush1.bf16.msra.mxu0 %v9365_v21  ;;  %v9436_v21 = vld [vmem:[%s10959_s4 + $0x8] sm:$0xff]  }
  0x34   : > { %726 = vmatprep.subr.bf16.mxu0 %v9710_v1  ;;  %1108 = vperm.xlu0 %9352, %v975_v44   ;;  %v9418_v44 = vld [vmem:[%s9791_s20 + $0x104] ss:$8 sps:$4 sm:$0xff]  }
  0x35   : > { %1113 = vperm.xlu1 %9353, %v976_v45   ;;  %v9454_v45 = vld [vmem:[%s10959_s4 + $0xb8] sm:$0xff]  }
  0x37   : > { %727 = vmatpush1.bf16.msra.mxu0 %v9366_v24  ;;  %v9437_v24 = vld [vmem:[%s10959_s4 + $0x10] sm:$0xff]  }
  0x38   : > { %728 = vmatprep.subr.bf16.mxu0 %v9710_v1  ;;  %1118 = vperm.xlu0 %9352, %v977_v46   ;;  %v9420_v46 = vld [vmem:[%s9791_s20 + $0x100] ss:$8 sps:$4 sm:$0xff]  }
  0x39   : > { %1123 = vperm.xlu1 %9353, %v978_v48   ;;  %v9423_v48 = vld [vmem:[%s9791_s20 + $0x110] ss:$8 sps:$4 sm:$0xff]  }
  0x3b   : > { %729 = vmatpush1.bf16.msra.mxu0 %v9367_v27  ;;  %v9408_v27 = vld [vmem:[%s9791_s20 + $0xc0] ss:$8 sps:$4 sm:$0xff]  }
  0x3c   : > { %730 = vmatprep.subr.bf16.mxu0 %v9710_v1  ;;  %1128 = vperm.xlu0 %9352, %v979_v50   ;;  %v9426_v50 = vld [vmem:[%s9791_s20 + $0x120] ss:$8 sps:$4 sm:$0xff]  }
  0x3d   : > { %1133 = vperm.xlu1 %9353, %v980_v51   ;;  %v9427_v51 = vld [vmem:[%s9791_s20 + $0x134] ss:$8 sps:$4 sm:$0xff]  }
  0x3f   : > { %731 = vmatpush1.bf16.msra.mxu0 %v9368_v30  ;;  %v9441_v30 = vld [vmem:[%s10959_s4 + $0x20] sm:$0xff]  }
  0x40   : > { %732 = vmatprep.subr.bf16.mxu0 %v9710_v1  ;;  %1138 = vperm.xlu0 %9352, %v981_v52   ;;  %v9429_v52 = vld [vmem:[%s9791_s20 + $0x130] ss:$8 sps:$4 sm:$0xff]  }
  0x41   : > { %1143 = vperm.xlu1 %9353, %v982_v54   ;;  %v349_v54 = vld [vmem:[%s9791_s20 + $0x150] sm:$0x77] }
  0x43   : > { %733 = vmatpush1.bf16.msra.mxu0 %v9369_v33  ;;  %v9411_v33 = vld [vmem:[%s9791_s20 + $0xd0] ss:$8 sps:$4 sm:$0xff]  }
  0x44   : > { %1148 = vperm.xlu0 %9352, %v983_v56   ;;  %8585 = vmatprep.subr.bf16.mxu0 %v9435_v8  ;;  %v7734_v56 = vcombine.high %v349_v54, %v349_v54 }
  0x45   : > { %1153 = vperm.xlu1 %9353, %v984_v57   ;;  %v7733_v57 = vcombine.low %v349_v54, %v349_v54 }
  0x46   : > { %735 = vmatmul.mubr.bf16.vlgmr.msra.gmra.mrb[0].mxu0 %v9370_v35  ;;  %v9412_v35 = vld [vmem:[%s9791_s20 + $0xe4] ss:$8 sps:$4 sm:$0xff]  }
  0x47   : > { %742 = vmatprep.mubr.bf16.mxu0 %v9373_v37  ;;  %8586 = vmatpush3.bf16.msra.mxu0 %v9435_v8  ;;  %v9447_v37 = vld [vmem:[%s10959_s4 + $0xa0] sm:$0xff]  }
  0x48   : > { %1158 = vperm.xlu0 %9352, %v985_v58   ;;  %8587 = vmatprep.subr.bf16.mxu0 %v9436_v21  ;;  %v10061_v58 = vld [vmem:[%s10959_s4 + $0xc0] sm:$0xff]  }
  0x49   : > { %1163 = vperm.xlu1 %9353, %v986_v60   ;;  %8697 = vmatprep.subr.bf16.mxu1 %v9447_v37 }
  0x4a   : > { %8698 = vmatpush3.bf16.msra.mxu1 %v9447_v37 }
  0x4b   : > { %8588 = vmatpush3.bf16.msra.mxu0 %v9436_v21  ;;  %8699 = vmatprep.subr.bf16.mxu1 %v9449_v40 }
  0x4c   : > { %1168 = vperm.xlu0 %9352, %v987_v62   ;;  %8589 = vmatprep.subr.bf16.mxu0 %v9437_v24 }
  0x4d   : > { %1173 = vperm.xlu1 %9353, %v988_v63  }
  0x4e   : > { %743 = vmatmul.mubr.bf16.gmra.mrb[4].mxu0 %v9375_v41  ;;  %v9415_v41 = vld [vmem:[%s9791_s20 + $0xf4] ss:$8 sps:$4 sm:$0xff]   ;;  %8700 = vmatpush3.bf16.msra.mxu1 %v9449_v40 }
  0x4f   : > { %750 = vmatprep.mubr.bf16.mxu0 %v9376_v43  ;;  %8590 = vmatpush3.bf16.msra.mxu0 %v9437_v24  ;;  %v9417_v43 = vld [vmem:[%s9791_s20 + $0xf0] ss:$8 sps:$4 sm:$0xff]  }
  0x50   : > { %1178 = vperm.xlu0 %9352, %v989_v0   ;;  %8591 = vmatprep.subr.bf16.mxu0 %v9439_v26 }
  0x51   : > { %1183 = vperm.xlu1 %9353, %v990_v3   ;;  %8701 = vmatprep.subr.bf16.mxu1 %v9451_v42 }
  0x52   : > { %8702 = vmatpush3.bf16.msra.mxu1 %v9451_v42  ;;  %v9486_v42 = vld [vmem:[%s10959_s4 + $0x48] sm:$0xff]  }
  0x53   : > { %8592 = vmatpush3.bf16.msra.mxu0 %v9439_v26  ;;  %8703 = vmatprep.subr.bf16.mxu1 %v9454_v45 }
  0x54   : > { %1188 = vperm.xlu0 %9352, %v991_v5   ;;  %8593 = vmatprep.subr.bf16.mxu0 %v9441_v30  ;;  %v9484_v5 = vld [vmem:[%s10959_s4 + $0x40] sm:$0xff]  }
  0x55   : > { %1193 = vperm.xlu1 %9353, %v992_v6  }
  0x56   : > { %751 = vmatmul.mubr.bf16.gmra.mrb[8].mxu0 %v9378_v47  ;;  %8704 = vmatpush3.bf16.msra.mxu1 %v9454_v45  ;;  %v9421_v47 = vld [vmem:[%s9791_s20 + $0x114] ss:$8 sps:$4 sm:$0xff]  }
  0x57   : > { %758 = vmatprep.mubr.bf16.mxu0 %v9379_v49  ;;  %8594 = vmatpush3.bf16.msra.mxu0 %v9441_v30  ;;  %v9424_v49 = vld [vmem:[%s9791_s20 + $0x124] ss:$8 sps:$4 sm:$0xff]  }
  0x58   : > { %1198 = vperm.xlu0 %9352, %v993_v7   ;;  %8595 = vmatprep.subr.bf16.mxu0 %v9443_v32 }
  0x59   : > { %1203 = vperm.xlu1 %9353, %v994_v10   ;;  %8741 = vmatprep.subr.bf16.mxu1 %v10061_v58 }
  0x5b   : > { %8596 = vmatpush3.bf16.msra.mxu0 %v9443_v32 }
  0x5c   : > { %1208 = vperm.xlu0 %9352, %v995_v12   ;;  %8597 = vmatprep.subr.bf16.mxu0 %v9445_v36 }
  0x5e   : > { %759 = vmatmul.mubr.bf16.gmra.mrb[12].mxu0 %v9381_v53  ;;  %v9430_v53 = vld [vmem:[%s9791_s20 + $0x144] ss:$8 sps:$4 sm:$0xff]  }
  0x5f   : > { %766 = vmatprep.mubr.bf16.mxu0 %v9382_v55  ;;  %8598 = vmatpush3.bf16.msra.mxu0 %v9445_v36  ;;  %v9432_v55 = vld [vmem:[%s9791_s20 + $0x140] ss:$8 sps:$4 sm:$0xff]  }
  0x60   : > { %8599 = vmatprep.subr.bf16.mxu0 %v9448_v38 }
  0x63   : > { %8600 = vmatpush3.bf16.msra.mxu0 %v9448_v38 }
  0x64   : > { %8637 = vmatprep.subr.bf16.mxu0 %v9484_v5 }
  0x66   : > { %767 = vmatmul.mubr.bf16.gmra.mrb[16].mxu0 %v9384_v59  ;;  %v10067_v59 = vld [vmem:[%s10957_s2] ss:$0 sm:$0xff] }
  0x67   : > { %774 = vmatprep.mubr.bf16.mxu0 %v9385_v61 }
  0x6e   : > { %775 = vmatmul.mubr.bf16.gmra.mrb[20].mxu0 %v9387_v2 }
  0x6f   : > { %782 = vmatprep.mubr.bf16.mxu0 %v9388_v4 }
  0x76   : > { %783 = vmatmul.mubr.bf16.gmra.mrb[24].mxu0 %v9390_v9 }
  0x77   : > { %790 = vmatprep.mubr.bf16.mxu0 %v9391_v11 }
  0x7e   : > { %791 = vmatmul.mubr.bf16.gmra.mrb[28].mxu0 %v9393_v13 }
  0x7f   : > { %798 = vmatprep.mubr.bf16.mxu0 %v9394_v14 }
  0x86   : > { %799 = vmatmul.mubr.bf16.gmra.mrb[32].mxu0 %v9396_v15 }
  0x87   : > { %806 = vmatprep.mubr.bf16.mxu0 %v9397_v16  ;;  %v999_v60 = vpop.permute.xlu0 %998 }
  0x88   : > { %v1009_v10 = vpop.permute.xlu1 %1008 }
  0x8b   : > { %v1004_v7 = vpop.permute.xlu0 %1003 }
  0x8e   : > { %807 = vmatmul.mubr.bf16.gmra.mrb[36].mxu0 %v9399_v17 }
  0x8f   : > { %814 = vmatprep.mubr.bf16.mxu0 %v9400_v18 }
  0x96   : > { %815 = vmatmul.mubr.bf16.gmra.mrb[40].mxu0 %v9402_v19 }
  0x97   : > { %822 = vmatprep.mubr.bf16.mxu0 %v9403_v20  ;;  %v1014_v20 = vpop.permute.xlu1 %1013 }
  0x9b   : > { %v1024_v34 = vpop.permute.xlu1 %1023 }
  0x9e   : > { %823 = vmatmul.mubr.bf16.gmra.mrb[44].mxu0 %v9405_v22 }
  0x9f   : > { %830 = vmatprep.mubr.bf16.mxu0 %v9406_v23 }
  0xa6   : > { %831 = vmatmul.mubr.bf16.gmra.mrb[48].mxu0 %v9408_v27 }
  0xa7   : > { %838 = vmatprep.mubr.bf16.mxu0 %v9409_v29 }
  0xae   : > { %839 = vmatmul.mubr.bf16.gmra.mrb[52].mxu0 %v9411_v33  ;;  %v1019_v33 = vpop.permute.xlu0 %1018 }
  0xaf   : > { %846 = vmatprep.mubr.bf16.mxu0 %v9412_v35 }
  0xb6   : > { %847 = vmatmul.mubr.bf16.gmra.mrb[56].mxu0 %v9414_v39 }
  0xb7   : > { %854 = vmatprep.mubr.bf16.mxu0 %v9415_v41 }
  0xbe   : > { %855 = vmatmul.mubr.bf16.gmra.mrb[60].mxu0 %v9417_v43 }
  0xbf   : > { %862 = vmatprep.mubr.bf16.mxu0 %v9418_v44 }
  0xc6   : > { %863 = vmatmul.mubr.bf16.gmra.mrb[64].mxu0 %v9420_v46 }
  0xc7   : > { %870 = vmatprep.mubr.bf16.mxu0 %v9421_v47 }
  0xce   : > { %871 = vmatmul.mubr.bf16.gmra.mrb[68].mxu0 %v9423_v48 }
  0xcf   : > { %878 = vmatprep.mubr.bf16.mxu0 %v9424_v49 }
  0xd6   : > { %879 = vmatmul.mubr.bf16.gmra.mrb[72].mxu0 %v9426_v50  ;;  %v9489_v50 = vld [vmem:[%s10959_s4 + $0x50] sm:$0xff]  }
  0xd7   : > { %886 = vmatprep.mubr.bf16.mxu0 %v9427_v51  ;;  %v1029_v51 = vpop.permute.xlu0 %1028 }
  0xde   : > { %887 = vmatmul.mubr.bf16.gmra.mrb[76].mxu0 %v9429_v52  ;;  %v1034_v52 = vpop.permute.xlu1 %1033 }
  0xdf   : > { %894 = vmatprep.mubr.bf16.mxu0 %v9430_v53 }
  0xe6   : > { %895 = vmatmul.mubr.bf16.gmra.mrb[80].mxu0 %v9432_v55 }
  0xe7   : > { %902 = vmatprep.mubr.bf16.mxu0 %v7734_v56 }
  0xee   : > { %903 = vmatmul.mubr.bf16.gmra.mrb[84].mxu0 %v7733_v57 }
 0x119   : > { %v736_v61 = vpop.f32.mrb[0].mxu0 }
 0x11a   : > { %v737_v62 = vadd.f32 %v10067_v59, %v736_v61  ;;  %v738_v63 = vpop.f32.mrb[1].mxu0 }
 0x11b   : > { %v739_v0 = vpop.f32.mrb[2].mxu0 }
 0x11c   : > { %v910_v2 = vmax.f32 %v737_v62, 0.0  ;;  %v740_v3 = vadd.f32 %v10067_v59, %v739_v0  ;;  %v741_v4 = vpop.f32.mrb[3].mxu0  ;;  %v9491_v0 = vld [vmem:[%s10959_s4 + $0x58] sm:$0xff]  }
 0x11e   : > { %v911_v6 = vmax.f32 %v740_v3, 0.0  ;;  %v1211_v8 = vmul.f32 %v999_v60, %v910_v2 }
 0x120   : > { %v1212_v9 = vmul.f32 %v1004_v7, %v911_v6 }
 0x121   : > { %v744_v11 = vpop.f32.mrb[4].mxu0 }
 0x122   : > { %v8229_v12 = vpack.c.bf16 %v1212_v9, %v1211_v8  ;;  %v745_v13 = vadd.f32 %v10067_v59, %v744_v11  ;;  %v746_v14 = vpop.f32.mrb[5].mxu0  ;;  %v1039_v9 = vpop.permute.xlu0 %1038 }
 0x123   : > { %v747_v15 = vpop.f32.mrb[6].mxu0 }
 0x124   : > { %8230 = vst [vmem:[#allocation2] sm:$0xff] %v8229_v12   ;;  %v912_v16 = vmax.f32 %v745_v13, 0.0  ;;  %v748_v17 = vadd.f32 %v10067_v59, %v747_v15  ;;  %v749_v18 = vpop.f32.mrb[7].mxu0  ;;  %v9494_v12 = vld [vmem:[%s10959_s4 + $0x60] sm:$0xff]   ;;  %v9476_v15 = vld [vmem:[%s10959_s4 + $0xc8] sm:$0xff]  }
 0x126   : > { %v913_v19 = vmax.f32 %v748_v17, 0.0  ;;  %v1213_v21 = vmul.f32 %v1009_v10, %v912_v16  ;;  %v1044_v10 = vpop.permute.xlu1 %1043 }
 0x128   : > { %v1214_v22 = vmul.f32 %v1014_v20, %v913_v19 }
 0x129   : > { %v752_v23 = vpop.f32.mrb[8].mxu0 }
 0x12a   : > { %v8234_v24 = vpack.c.bf16 %v1214_v22, %v1213_v21  ;;  %v753_v25 = vadd.f32 %v10067_v59, %v752_v23  ;;  %v754_v26 = vpop.f32.mrb[9].mxu0  ;;  %v9479_v21 = vld [vmem:[%s10959_s4 + $0xd0] sm:$0xff]   ;;  %v9496_v22 = vld [vmem:[%s10959_s4 + $0x68] sm:$0xff]  }
 0x12b   : > { %v755_v27 = vpop.f32.mrb[10].mxu0  ;;  %v9446_v28 = vld [vmem:[#allocation2] sm:$0xff]  }
 0x12c   : > { %8331 = vst [vmem:[#allocation2 + $0x8] sm:$0xff] %v8234_v24   ;;  %v914_v29 = vmax.f32 %v753_v25, 0.0  ;;  %v756_v30 = vadd.f32 %v10067_v59, %v755_v27  ;;  %v757_v31 = vpop.f32.mrb[11].mxu0  ;;  %8601 = vmatprep.mubr.bf16.mxu0 %v9446_v28  ;;  %v9452_v41 = vld [vmem:[#allocation2] sm:$0xfe]  }
 0x12d   : > { %v2686_v53 = vrot.slane %v9452_v41, 1  ;;  %v1054_v31 = vpop.permute.xlu1 %1053  ;;  %v9487_v41 = vld [vmem:[%s10959_s4 + $0xe0] sm:$0xff]  }
 0x12e   : > { %v915_v32 = vmax.f32 %v756_v30, 0.0  ;;  %v1215_v35 = vmul.f32 %v1019_v33, %v914_v29  ;;  %v1049_v30 = vpop.permute.xlu0 %1048 }
 0x130   : > { %v1216_v36 = vmul.f32 %v1024_v34, %v915_v32 }
 0x131   : > { %v760_v37 = vpop.f32.mrb[12].mxu0 }
 0x132   : > { %v8239_v38 = vpack.c.bf16 %v1216_v36, %v1215_v35  ;;  %v761_v39 = vadd.f32 %v10067_v59, %v760_v37  ;;  %v762_v40 = vpop.f32.mrb[13].mxu0  ;;  %v9482_v35 = vld [vmem:[%s10959_s4 + $0xd8] sm:$0xff]  }
 0x133   : > { %v763_v43 = vpop.f32.mrb[14].mxu0  ;;  %v9450_v44 = vld [vmem:[#allocation2 + $0x8] sm:$0xff]  }
 0x134   : > { %8332 = vst [vmem:[#allocation2 + $0x10] sm:$0xff] %v8239_v38   ;;  %v916_v45 = vmax.f32 %v761_v39, 0.0  ;;  %v764_v46 = vadd.f32 %v10067_v59, %v763_v43  ;;  %v765_v47 = vpop.f32.mrb[15].mxu0  ;;  %8602 = vmatmul.mubr.bf16.vlgmr.msra.gmra.mrb[88].mxu0 %v9450_v44  ;;  %v9453_v48 = vld [vmem:[#allocation2 + $0x8] sm:$0xff]  }
 0x135   : > { %8638 = vmatpush3.bf16.msra.mxu0 %v9484_v5  ;;  %v2687_v54 = vrot.slane %v9453_v48, 1 }
 0x136   : > { %v917_v49 = vmax.f32 %v764_v46, 0.0  ;;  %8639 = vmatprep.subr.bf16.mxu0 %v9486_v42  ;;  %v1217_v55 = vmul.f32 %v1029_v51, %v916_v45  ;;  %v1064_v51 = vpop.permute.xlu1 %1063 }
 0x137   : > { %v2688_v60 = vsel %vm2685_vm0, %v2686_v53, %v2687_v54 }
 0x138   : > { %v1218_v56 = vmul.f32 %v1034_v52, %v917_v49  ;;  %8705 = vmatprep.mubr.bf16.mxu1 %v2688_v60 }
 0x139   : > { %v768_v57 = vpop.f32.mrb[16].mxu0  ;;  %8640 = vmatpush3.bf16.msra.mxu0 %v9486_v42  ;;  %v9503_v42 = vld [vmem:[%s10959_s4 + $0x78] sm:$0xff]  }
 0x13a   : > { %v8244_v61 = vpack.c.bf16 %v1218_v56, %v1217_v55  ;;  %v769_v62 = vadd.f32 %v10067_v59, %v768_v57  ;;  %v770_v63 = vpop.f32.mrb[17].mxu0  ;;  %8641 = vmatprep.subr.bf16.mxu0 %v9489_v50  ;;  %v9492_v55 = vld [vmem:[%s10959_s4 + $0xe8] sm:$0xff]  }
 0x13b   : > { %v771_v2 = vpop.f32.mrb[18].mxu0  ;;  %v9455_v3 = vld [vmem:[#allocation2 + $0x10] sm:$0xff]  }
 0x13c   : > { %8333 = vst [vmem:[#allocation2 + $0x18] sm:$0xff] %v8244_v61   ;;  %v918_v4 = vmax.f32 %v769_v62, 0.0  ;;  %v772_v5 = vadd.f32 %v10067_v59, %v771_v2  ;;  %v773_v6 = vpop.f32.mrb[19].mxu0  ;;  %8605 = vmatprep.mubr.bf16.mxu0 %v9455_v3  ;;  %v9456_v7 = vld [vmem:[#allocation2 + $0x10] sm:$0xff]  }
 0x13d   : > { %8642 = vmatpush3.bf16.msra.mxu0 %v9489_v50  ;;  %v2689_v11 = vrot.slane %v9456_v7, 1  ;;  %v1059_v50 = vpop.permute.xlu0 %1058  ;;  %v9499_v63 = vld [vmem:[%s10959_s4 + $0xf0] sm:$0xff]  }
 0x13e   : > { %v919_v8 = vmax.f32 %v772_v5, 0.0  ;;  %8643 = vmatprep.subr.bf16.mxu0 %v9491_v0  ;;  %v1219_v13 = vmul.f32 %v1039_v9, %v918_v4  ;;  %v1074_v9 = vpop.permute.xlu1 %1073 }
 0x13f   : > { %v2690_v17 = vsel %vm2685_vm0, %v2687_v54, %v2689_v11 }
 0x140   : > { %v1220_v14 = vmul.f32 %v1044_v10, %v919_v8  ;;  %8706 = vmatmul.mubr.bf16.vlgmr.msra.gmra.mrb[0].mxu1 %v2690_v17 }
 0x141   : > { %v776_v16 = vpop.f32.mrb[20].mxu0  ;;  %8644 = vmatpush3.bf16.msra.mxu0 %v9491_v0  ;;  %8742 = vmatpush3.bf16.msra.mxu1 %v10061_v58  ;;  %v9498_v58 = vld [vmem:[%s10959_s4 + $0x70] sm:$0xff]   ;;  %v1069_v8 = vpop.permute.xlu0 %1068 }
 0x142   : > { %v8249_v18 = vpack.c.bf16 %v1220_v14, %v1219_v13  ;;  %v777_v19 = vadd.f32 %v10067_v59, %v776_v16  ;;  %v778_v20 = vpop.f32.mrb[21].mxu0  ;;  %8645 = vmatprep.subr.bf16.mxu0 %v9494_v12  ;;  %8743 = vmatprep.subr.bf16.mxu1 %v9476_v15  ;;  %v9506_v13 = vld [vmem:[%s10959_s4 + $0xf8] sm:$0xff]  }
 0x143   : > { %v779_v23 = vpop.f32.mrb[22].mxu0  ;;  %v9457_v24 = vld [vmem:[#allocation2 + $0x18] sm:$0xff]  }
 0x144   : > { %8334 = vst [vmem:[#allocation2 + $0x20] sm:$0xff] %v8249_v18   ;;  %v920_v25 = vmax.f32 %v777_v19, 0.0  ;;  %v780_v26 = vadd.f32 %v10067_v59, %v779_v23  ;;  %v781_v27 = vpop.f32.mrb[23].mxu0  ;;  %8606 = vmatmul.mubr.bf16.gmra.mrb[92].mxu0 %v9457_v24  ;;  %v9458_v28 = vld [vmem:[#allocation2 + $0x18] sm:$0xff]   ;;  %v10140_v19 = vld [vmem:[%s10959_s4 + $0x100] sm:$0xff]  }
 0x145   : > { %8646 = vmatpush3.bf16.msra.mxu0 %v9494_v12  ;;  %v2691_v32 = vrot.slane %v9458_v28, 1  ;;  %8744 = vmatpush3.bf16.msra.mxu1 %v9476_v15  ;;  %v1079_v27 = vpop.permute.xlu0 %1078  ;;  %v1084_v28 = vpop.permute.xlu1 %1083 }
 0x146   : > { %v921_v29 = vmax.f32 %v780_v26, 0.0  ;;  %8647 = vmatprep.subr.bf16.mxu0 %v9496_v22  ;;  %v1221_v33 = vmul.f32 %v1049_v30, %v920_v25  ;;  %8745 = vmatprep.subr.bf16.mxu1 %v9479_v21 }
 0x147   : > { %v2692_v37 = vsel %vm2685_vm0, %v2689_v11, %v2691_v32 }
 0x148   : > { %v1222_v34 = vmul.f32 %v1054_v31, %v921_v29  ;;  %8709 = vmatprep.mubr.bf16.mxu1 %v2692_v37 }
 0x149   : > { %v784_v36 = vpop.f32.mrb[24].mxu0  ;;  %8648 = vmatpush3.bf16.msra.mxu0 %v9496_v22  ;;  %8746 = vmatpush3.bf16.msra.mxu1 %v9479_v21 }
 0x14a   : > { %v8254_v38 = vpack.c.bf16 %v1222_v34, %v1221_v33  ;;  %v785_v39 = vadd.f32 %v10067_v59, %v784_v36  ;;  %v786_v40 = vpop.f32.mrb[25].mxu0  ;;  %8649 = vmatprep.subr.bf16.mxu0 %v9498_v58  ;;  %8747 = vmatprep.subr.bf16.mxu1 %v9482_v35 }
 0x14b   : > { %v787_v43 = vpop.f32.mrb[26].mxu0  ;;  %v9459_v44 = vld [vmem:[#allocation2 + $0x20] sm:$0xff]  }
 0x14c   : > { %8335 = vst [vmem:[#allocation2 + $0x28] sm:$0xff] %v8254_v38   ;;  %v922_v45 = vmax.f32 %v785_v39, 0.0  ;;  %v788_v46 = vadd.f32 %v10067_v59, %v787_v43  ;;  %v789_v47 = vpop.f32.mrb[27].mxu0  ;;  %8609 = vmatprep.mubr.bf16.mxu0 %v9459_v44  ;;  %v9460_v48 = vld [vmem:[#allocation2 + $0x20] sm:$0xff]   ;;  %v1089_v43 = vpop.permute.xlu0 %1088 }
 0x14d   : > { %8650 = vmatpush3.bf16.msra.mxu0 %v9498_v58  ;;  %v2693_v52 = vrot.slane %v9460_v48, 1  ;;  %8748 = vmatpush3.bf16.msra.mxu1 %v9482_v35  ;;  %v1094_v44 = vpop.permute.xlu1 %1093 }
 0x14e   : > { %v923_v49 = vmax.f32 %v788_v46, 0.0  ;;  %8651 = vmatprep.subr.bf16.mxu0 %v9503_v42  ;;  %v1223_v53 = vmul.f32 %v1059_v50, %v922_v45  ;;  %8749 = vmatprep.subr.bf16.mxu1 %v9487_v41 }
 0x14f   : > { %v2694_v57 = vsel %vm2685_vm0, %v2691_v32, %v2693_v52 }
 0x150   : > { %v1224_v54 = vmul.f32 %v1064_v51, %v923_v49  ;;  %8710 = vmatmul.mubr.bf16.gmra.mrb[4].mxu1 %v2694_v57 }
 0x151   : > { %v792_v56 = vpop.f32.mrb[28].mxu0  ;;  %8652 = vmatpush3.bf16.msra.mxu0 %v9503_v42  ;;  %8750 = vmatpush3.bf16.msra.mxu1 %v9487_v41 }
 0x152   : > { %v8259_v60 = vpack.c.bf16 %v1224_v54, %v1223_v53  ;;  %v793_v61 = vadd.f32 %v10067_v59, %v792_v56  ;;  %v794_v62 = vpop.f32.mrb[29].mxu0  ;;  %8751 = vmatprep.subr.bf16.mxu1 %v9492_v55 }
 0x153   : > { %v795_v0 = vpop.f32.mrb[30].mxu0  ;;  %v9461_v2 = vld [vmem:[#allocation2 + $0x28] sm:$0xff]   ;;  %v1099_v62 = vpop.permute.xlu0 %1098 }
 0x154   : > { %8336 = vst [vmem:[#allocation2 + $0x30] sm:$0xff] %v8259_v60   ;;  %v924_v3 = vmax.f32 %v793_v61, 0.0  ;;  %v796_v4 = vadd.f32 %v10067_v59, %v795_v0  ;;  %v797_v5 = vpop.f32.mrb[31].mxu0  ;;  %8610 = vmatmul.mubr.bf16.gmra.mrb[96].mxu0 %v9461_v2  ;;  %v9462_v6 = vld [vmem:[#allocation2 + $0x28] sm:$0xff]  }
 0x155   : > { %v2695_v10 = vrot.slane %v9462_v6, 1  ;;  %8752 = vmatpush3.bf16.msra.mxu1 %v9492_v55 }
 0x156   : > { %v925_v7 = vmax.f32 %v796_v4, 0.0  ;;  %v1225_v11 = vmul.f32 %v1069_v8, %v924_v3  ;;  %8753 = vmatprep.subr.bf16.mxu1 %v9499_v63 }
 0x157   : > { %v2696_v15 = vsel %vm2685_vm0, %v2693_v52, %v2695_v10 }
 0x158   : > { %v1226_v12 = vmul.f32 %v1074_v9, %v925_v7  ;;  %8713 = vmatprep.mubr.bf16.mxu1 %v2696_v15 }
 0x159   : > { %v800_v14 = vpop.f32.mrb[32].mxu0  ;;  %8754 = vmatpush3.bf16.msra.mxu1 %v9499_v63  ;;  %v1104_v63 = vpop.permute.xlu1 %1103 }
 0x15a   : > { %v8264_v16 = vpack.c.bf16 %v1226_v12, %v1225_v11  ;;  %v801_v17 = vadd.f32 %v10067_v59, %v800_v14  ;;  %v802_v18 = vpop.f32.mrb[33].mxu0  ;;  %8755 = vmatprep.subr.bf16.mxu1 %v9506_v13 }
 0x15b   : > { %v803_v20 = vpop.f32.mrb[34].mxu0  ;;  %v9463_v21 = vld [vmem:[#allocation2 + $0x30] sm:$0xff]  }
 0x15c   : > { %8337 = vst [vmem:[#allocation2 + $0x38] sm:$0xff] %v8264_v16   ;;  %v926_v22 = vmax.f32 %v801_v17, 0.0  ;;  %v804_v23 = vadd.f32 %v10067_v59, %v803_v20  ;;  %v805_v24 = vpop.f32.mrb[35].mxu0  ;;  %8613 = vmatprep.mubr.bf16.mxu0 %v9463_v21  ;;  %v9464_v25 = vld [vmem:[#allocation2 + $0x30] sm:$0xff]   ;;  %v1109_v16 = vpop.permute.xlu0 %1108 }
 0x15d   : > { %v2697_v29 = vrot.slane %v9464_v25, 1  ;;  %8756 = vmatpush3.bf16.msra.mxu1 %v9506_v13  ;;  %v1114_v17 = vpop.permute.xlu1 %1113 }
 0x15e   : > { %v927_v26 = vmax.f32 %v804_v23, 0.0  ;;  %v1227_v30 = vmul.f32 %v1079_v27, %v926_v22  ;;  %8793 = vmatprep.subr.bf16.mxu1 %v10140_v19 }
 0x15f   : > { %v2698_v58 = vsel %vm2685_vm0, %v2695_v10, %v2697_v29 }
 0x160   : > { %v1228_v31 = vmul.f32 %v1084_v28, %v927_v26  ;;  %8714 = vmatmul.mubr.bf16.gmra.mrb[8].mxu1 %v2698_v58 }
 0x161   : > { %v808_v32 = vpop.f32.mrb[36].mxu0 }
 0x162   : > { %v8269_v33 = vpack.c.bf16 %v1228_v31, %v1227_v30  ;;  %v809_v34 = vadd.f32 %v10067_v59, %v808_v32  ;;  %v810_v35 = vpop.f32.mrb[37].mxu0 }
 0x163   : > { %v811_v36 = vpop.f32.mrb[38].mxu0  ;;  %v9465_v37 = vld [vmem:[#allocation2 + $0x38] sm:$0xff]  }
 0x164   : > { %8338 = vst [vmem:[#allocation2 + $0x40] sm:$0xff] %v8269_v33   ;;  %v928_v38 = vmax.f32 %v809_v34, 0.0  ;;  %v812_v39 = vadd.f32 %v10067_v59, %v811_v36  ;;  %v813_v40 = vpop.f32.mrb[39].mxu0  ;;  %8614 = vmatmul.mubr.bf16.gmra.mrb[100].mxu0 %v9465_v37  ;;  %v9466_v41 = vld [vmem:[#allocation2 + $0x38] sm:$0xff]   ;;  %v1119_v33 = vpop.permute.xlu0 %1118 }
 0x165   : > { %v2699_v45 = vrot.slane %v9466_v41, 1  ;;  %v1124_v34 = vpop.permute.xlu1 %1123 }
 0x166   : > { %v929_v42 = vmax.f32 %v812_v39, 0.0  ;;  %v1229_v46 = vmul.f32 %v1089_v43, %v928_v38 }
 0x167   : > { %v2700_v49 = vsel %vm2685_vm0, %v2697_v29, %v2699_v45 }
 0x168   : > { %v1230_v47 = vmul.f32 %v1094_v44, %v929_v42  ;;  %8717 = vmatprep.mubr.bf16.mxu1 %v2700_v49 }
 0x169   : > { %v816_v48 = vpop.f32.mrb[40].mxu0 }
 0x16a   : > { %v8274_v50 = vpack.c.bf16 %v1230_v47, %v1229_v46  ;;  %v817_v51 = vadd.f32 %v10067_v59, %v816_v48  ;;  %v818_v52 = vpop.f32.mrb[41].mxu0 }
 0x16b   : > { %v819_v53 = vpop.f32.mrb[42].mxu0  ;;  %v9467_v54 = vld [vmem:[#allocation2 + $0x40] sm:$0xff]  }
 0x16c   : > { %8339 = vst [vmem:[#allocation2 + $0x48] sm:$0xff] %v8274_v50   ;;  %v930_v55 = vmax.f32 %v817_v51, 0.0  ;;  %v820_v56 = vadd.f32 %v10067_v59, %v819_v53  ;;  %v821_v57 = vpop.f32.mrb[43].mxu0  ;;  %8617 = vmatprep.mubr.bf16.mxu0 %v9467_v54  ;;  %v9468_v60 = vld [vmem:[#allocation2 + $0x40] sm:$0xff]   ;;  %v1129_v50 = vpop.permute.xlu0 %1128 }
 0x16d   : > { %v2701_v0 = vrot.slane %v9468_v60, 1  ;;  %v1134_v51 = vpop.permute.xlu1 %1133 }
 0x16e   : > { %v931_v61 = vmax.f32 %v820_v56, 0.0  ;;  %v1231_v2 = vmul.f32 %v1099_v62, %v930_v55 }
 0x16f   : > { %v2702_v5 = vsel %vm2685_vm0, %v2699_v45, %v2701_v0 }
 0x170   : > { %v1232_v3 = vmul.f32 %v1104_v63, %v931_v61  ;;  %8718 = vmatmul.mubr.bf16.gmra.mrb[12].mxu1 %v2702_v5 }
 0x171   : > { %v824_v4 = vpop.f32.mrb[44].mxu0 }
 0x172   : > { %v8279_v6 = vpack.c.bf16 %v1232_v3, %v1231_v2  ;;  %v825_v7 = vadd.f32 %v10067_v59, %v824_v4  ;;  %v826_v8 = vpop.f32.mrb[45].mxu0 }
 0x173   : > { %v827_v9 = vpop.f32.mrb[46].mxu0  ;;  %v9469_v10 = vld [vmem:[#allocation2 + $0x48] sm:$0xff]  }
 0x174   : > { %8340 = vst [vmem:[#allocation2 + $0x50] sm:$0xff] %v8279_v6   ;;  %v932_v11 = vmax.f32 %v825_v7, 0.0  ;;  %v828_v12 = vadd.f32 %v10067_v59, %v827_v9  ;;  %v829_v13 = vpop.f32.mrb[47].mxu0  ;;  %8618 = vmatmul.mubr.bf16.gmra.mrb[104].mxu0 %v9469_v10  ;;  %v9470_v14 = vld [vmem:[#allocation2 + $0x48] sm:$0xff]   ;;  %v1139_v6 = vpop.permute.xlu0 %1138 }
 0x175   : > { %v2703_v18 = vrot.slane %v9470_v14, 1  ;;  %v1144_v7 = vpop.permute.xlu1 %1143 }
 0x176   : > { %v933_v15 = vmax.f32 %v828_v12, 0.0  ;;  %v1233_v20 = vmul.f32 %v1109_v16, %v932_v11 }
 0x177   : > { %v2704_v23 = vsel %vm2685_vm0, %v2701_v0, %v2703_v18 }
 0x178   : > { %v1234_v21 = vmul.f32 %v1114_v17, %v933_v15  ;;  %8721 = vmatprep.mubr.bf16.mxu1 %v2704_v23 }
 0x179   : > { %v832_v22 = vpop.f32.mrb[48].mxu0 }
 0x17a   : > { %v8284_v24 = vpack.c.bf16 %v1234_v21, %v1233_v20  ;;  %v833_v25 = vadd.f32 %v10067_v59, %v832_v22  ;;  %v834_v26 = vpop.f32.mrb[49].mxu0 }
 0x17b   : > { %v835_v27 = vpop.f32.mrb[50].mxu0  ;;  %v9471_v28 = vld [vmem:[#allocation2 + $0x50] sm:$0xff]  }
 0x17c   : > { %8341 = vst [vmem:[#allocation2 + $0x58] sm:$0xff] %v8284_v24   ;;  %v934_v29 = vmax.f32 %v833_v25, 0.0  ;;  %v836_v30 = vadd.f32 %v10067_v59, %v835_v27  ;;  %v837_v31 = vpop.f32.mrb[51].mxu0  ;;  %8621 = vmatprep.mubr.bf16.mxu0 %v9471_v28  ;;  %v9473_v32 = vld [vmem:[#allocation2 + $0x50] sm:$0xff]   ;;  %v1149_v24 = vpop.permute.xlu0 %1148 }
 0x17d   : > { %v2705_v35 = vrot.slane %v9473_v32, 1  ;;  %v1154_v25 = vpop.permute.xlu1 %1153  ;;  %v10169_v32 = vld [vmem:[%s10957_s2] ss:$0 sm:$0xff] }
 0x17e   : > { %v935_v58 = vmax.f32 %v836_v30, 0.0  ;;  %v1235_v36 = vmul.f32 %v1119_v33, %v934_v29 }
 0x17f   : > { %v2706_v39 = vsel %vm2685_vm0, %v2703_v18, %v2705_v35 }
 0x180   : > { %v1236_v37 = vmul.f32 %v1124_v34, %v935_v58  ;;  %8722 = vmatmul.mubr.bf16.gmra.mrb[16].mxu1 %v2706_v39 }
 0x181   : > { %v840_v38 = vpop.f32.mrb[52].mxu0 }
 0x182   : > { %v8289_v40 = vpack.c.bf16 %v1236_v37, %v1235_v36  ;;  %v841_v41 = vadd.f32 %v10067_v59, %v840_v38  ;;  %v842_v42 = vpop.f32.mrb[53].mxu0 }
 0x183   : > { %v843_v43 = vpop.f32.mrb[54].mxu0  ;;  %v9474_v44 = vld [vmem:[#allocation2 + $0x58] sm:$0xff]  }
 0x184   : > { %8342 = vst [vmem:[#allocation2 + $0x60] sm:$0xff] %v8289_v40   ;;  %v936_v45 = vmax.f32 %v841_v41, 0.0  ;;  %v844_v46 = vadd.f32 %v10067_v59, %v843_v43  ;;  %v845_v47 = vpop.f32.mrb[55].mxu0  ;;  %8622 = vmatmul.mubr.bf16.gmra.mrb[108].mxu0 %v9474_v44  ;;  %v9475_v48 = vld [vmem:[#allocation2 + $0x58] sm:$0xff]   ;;  %v1159_v40 = vpop.permute.xlu0 %1158 }
 0x185   : > { %v2707_v52 = vrot.slane %v9475_v48, 1  ;;  %v1164_v41 = vpop.permute.xlu1 %1163 }
 0x186   : > { %v937_v49 = vmax.f32 %v844_v46, 0.0  ;;  %v1237_v53 = vmul.f32 %v1129_v50, %v936_v45 }
 0x187   : > { %v2708_v56 = vsel %vm2685_vm0, %v2705_v35, %v2707_v52 }
 0x188   : > { %v1238_v54 = vmul.f32 %v1134_v51, %v937_v49  ;;  %8725 = vmatprep.mubr.bf16.mxu1 %v2708_v56 }
 0x189   : > { %v848_v55 = vpop.f32.mrb[56].mxu0 }
 0x18a   : > { %v8294_v57 = vpack.c.bf16 %v1238_v54, %v1237_v53  ;;  %v849_v60 = vadd.f32 %v10067_v59, %v848_v55  ;;  %v850_v61 = vpop.f32.mrb[57].mxu0 }
 0x18b   : > { %v851_v62 = vpop.f32.mrb[58].mxu0  ;;  %v9477_v63 = vld [vmem:[#allocation2 + $0x60] sm:$0xff]   ;;  %v1174_v61 = vpop.permute.xlu1 %1173 }
 0x18c   : > { %8343 = vst [vmem:[#allocation2 + $0x68] sm:$0xff] %v8294_v57   ;;  %v938_v0 = vmax.f32 %v849_v60, 0.0  ;;  %v852_v2 = vadd.f32 %v10067_v59, %v851_v62  ;;  %v853_v3 = vpop.f32.mrb[59].mxu0  ;;  %8625 = vmatprep.mubr.bf16.mxu0 %v9477_v63  ;;  %v9478_v4 = vld [vmem:[#allocation2 + $0x60] sm:$0xff]   ;;  %v1169_v60 = vpop.permute.xlu0 %1168 }
 0x18d   : > { %v2709_v8 = vrot.slane %v9478_v4, 1  ;;  %v9500_v57 = vld [vmem:[#allocation2] sm:$0xff]   ;;  %v9501_v4 = vld [vmem:[#allocation2 + $0x8] sm:$0xff]  }
 0x18e   : > { %v939_v5 = vmax.f32 %v852_v2, 0.0  ;;  %v1239_v9 = vmul.f32 %v1139_v6, %v938_v0 }
 0x18f   : > { %v2710_v12 = vsel %vm2685_vm0, %v2707_v52, %v2709_v8 }
 0x190   : > { %v1240_v10 = vmul.f32 %v1144_v7, %v939_v5  ;;  %8726 = vmatmul.mubr.bf16.gmra.mrb[20].mxu1 %v2710_v12 }
 0x191   : > { %v856_v11 = vpop.f32.mrb[60].mxu0 }
 0x192   : > { %v8299_v13 = vpack.c.bf16 %v1240_v10, %v1239_v9  ;;  %v857_v14 = vadd.f32 %v10067_v59, %v856_v11  ;;  %v858_v15 = vpop.f32.mrb[61].mxu0 }
 0x193   : > { %v859_v16 = vpop.f32.mrb[62].mxu0  ;;  %v9480_v17 = vld [vmem:[#allocation2 + $0x68] sm:$0xff]   ;;  %v2047_v15 = vshll.u32 %v9501_v4, 16 }
 0x194   : > { %8344 = vst [vmem:[#allocation2 + $0x70] sm:$0xff] %v8299_v13   ;;  %v940_v18 = vmax.f32 %v857_v14, 0.0  ;;  %v860_v20 = vadd.f32 %v10067_v59, %v859_v16  ;;  %v861_v21 = vpop.f32.mrb[63].mxu0  ;;  %8626 = vmatmul.mubr.bf16.gmra.mrb[112].mxu0 %v9480_v17  ;;  %v9481_v22 = vld [vmem:[#allocation2 + $0x68] sm:$0xff]   ;;  %v9504_v17 = vld [vmem:[#allocation2 + $0x10] sm:$0xff]  }
 0x195   : > { %v2711_v26 = vrot.slane %v9481_v22, 1 }
 0x196   : > { %v941_v23 = vmax.f32 %v860_v20, 0.0  ;;  %v1241_v27 = vmul.f32 %v1149_v24, %v940_v18  ;;  %v1179_v18 = vpop.permute.xlu0 %1178  ;;  %v1184_v20 = vpop.permute.xlu1 %1183 }
 0x197   : > { %v2712_v30 = vsel %vm2685_vm0, %v2709_v8, %v2711_v26  ;;  %v2042_v8 = vshll.u32 %v9500_v57, 16 }
 0x198   : > { %v1242_v28 = vmul.f32 %v1154_v25, %v941_v23  ;;  %8729 = vmatprep.mubr.bf16.mxu1 %v2712_v30 }
 0x199   : > { %v864_v29 = vpop.f32.mrb[64].mxu0  ;;  %v2044_v22 = vrot.slane %v2042_v8, 1 }
 0x19a   : > { %v8304_v31 = vpack.c.bf16 %v1242_v28, %v1241_v27  ;;  %v865_v59 = vadd.f32 %v10169_v32, %v864_v29  ;;  %v866_v58 = vpop.f32.mrb[65].mxu0  ;;  %v2040_v27 = vshrl.u32 %v9500_v57, 16  ;;  %v2049_v28 = vrot.slane %v2047_v15, 1  ;;  %v10180_v29 = vld [vmem:[#allocation2 + $0x18] sm:$0xff]  }
 0x19b   : > { %v867_v33 = vpop.f32.mrb[66].mxu0  ;;  %v9483_v34 = vld [vmem:[#allocation2 + $0x70] sm:$0xff]   ;;  %v2055_v58 = vshll.u32 %v9504_v17, 16 }
 0x19c   : > { %8345 = vst [vmem:[#allocation2 + $0x78] sm:$0xff] %v8304_v31   ;;  %v942_v35 = vmax.f32 %v865_v59, 0.0  ;;  %v868_v36 = vadd.f32 %v10169_v32, %v867_v33  ;;  %v869_v37 = vpop.f32.mrb[67].mxu0  ;;  %8629 = vmatprep.mubr.bf16.mxu0 %v9483_v34  ;;  %v9485_v38 = vld [vmem:[#allocation2 + $0x70] sm:$0xff]  }
 0x19d   : > { %v2713_v42 = vrot.slane %v9485_v38, 1 }
 0x19e   : > { %v943_v39 = vmax.f32 %v868_v36, 0.0  ;;  %v1243_v43 = vmul.f32 %v1159_v40, %v942_v35  ;;  %v2045_v35 = vor.u32 %v2044_v22, %v2040_v27 }
 0x19f   : > { %v2714_v46 = vsel %vm2685_vm0, %v2711_v26, %v2713_v42 }
 0x1a0   : > { %v1244_v44 = vmul.f32 %v1164_v41, %v943_v39  ;;  %8730 = vmatmul.mubr.bf16.gmra.mrb[24].mxu1 %v2714_v46  ;;  %v10184_v39 = vld [vmem:[#allocation2 + $0x10] sm:$0xff]   ;;  %v2050_v40 = vsel %vm2038_vm1, %v2045_v35, %v2049_v28  ;;  %v1194_v46 = vpop.permute.xlu1 %1193 }
 0x1a1   : > { %v872_v45 = vpop.f32.mrb[68].mxu0 }
 0x1a2   : > { %v8309_v47 = vpack.c.bf16 %v1244_v44, %v1243_v43  ;;  %v873_v48 = vadd.f32 %v10169_v32, %v872_v45  ;;  %v874_v49 = vpop.f32.mrb[69].mxu0  ;;  %v9510_v44 = vld [vmem:[#allocation2 + $0x20] sm:$0xff]   ;;  %v1189_v45 = vpop.permute.xlu0 %1188 }
 0x1a3   : > { %v875_v50 = vpop.f32.mrb[70].mxu0  ;;  %v9488_v51 = vld [vmem:[#allocation2 + $0x78] sm:$0xff]   ;;  %v2057_v49 = vrot.slane %v2055_v58, 1  ;;  %v2075_v27 = vshrl.u32 %v9510_v44, 16 }
 0x1a4   : > { %8346 = vst [vmem:[#allocation2 + $0x80] sm:$0xff] %v8309_v47   ;;  %v944_v52 = vmax.f32 %v873_v48, 0.0  ;;  %v876_v53 = vadd.f32 %v10169_v32, %v875_v50  ;;  %v877_v54 = vpop.f32.mrb[71].mxu0  ;;  %8630 = vmatmul.mubr.bf16.gmra.mrb[116].mxu0 %v9488_v51  ;;  %v9490_v55 = vld [vmem:[#allocation2 + $0x78] sm:$0xff]   ;;  %v2051_v47 = vshrl.u32 %v9501_v4, 16 }
 0x1a5   : > { %v2715_v62 = vrot.slane %v9490_v55, 1 }
 0x1a6   : > { %v945_v56 = vmax.f32 %v876_v53, 0.0  ;;  %v1245_v63 = vmul.f32 %v1169_v60, %v944_v52  ;;  %v9508_v52 = vld [vmem:[#allocation2 + $0x8] sm:$0xfe]   ;;  %v2053_v53 = vor.u32 %v2051_v47, %v2049_v28  ;;  %v1199_v15 = vpop.permute.xlu0 %1198  ;;  %v9520_v47 = vld [vmem:[#allocation2 + $0x40] sm:$0xff]  }
 0x1a7   : > { %v2716_v3 = vsel %vm2685_vm0, %v2713_v42, %v2715_v62  ;;  %v2063_v42 = vshll.u32 %v10180_v29, 16  ;;  %v10189_v60 = vld [vmem:[#allocation2 + $0x28] sm:$0xff]  }
 0x1a8   : > { %v1246_v0 = vmul.f32 %v1174_v61, %v945_v56  ;;  %8733 = vmatprep.mubr.bf16.mxu1 %v2716_v3  ;;  %v2059_v56 = vshrl.u32 %v9504_v17, 16  ;;  %v2058_v8 = vsel %vm2038_vm1, %v2053_v53, %v2057_v49  ;;  %v9521_v53 = vld [vmem:[#allocation2 + $0x48] sm:$0xff]  }
 0x1a9   : > { %v880_v2 = vpop.f32.mrb[72].mxu0  ;;  %v2065_v57 = vrot.slane %v2063_v42, 1 }
 0x1aa   : > { %v8314_v5 = vpack.c.bf16 %v1246_v0, %v1245_v63  ;;  %v881_v6 = vadd.f32 %v10169_v32, %v880_v2  ;;  %v882_v7 = vpop.f32.mrb[73].mxu0  ;;  %v3222_v0 = vrot.slane %v10184_v39, 1  ;;  %v2071_v2 = vshll.u32 %v9510_v44, 16  ;;  %v1209_v39 = vpop.permute.xlu0 %1208  ;;  %v9519_v44 = vld [vmem:[#allocation2 + $0x30] sm:$0xff]  }
 0x1ab   : > { %v883_v9 = vpop.f32.mrb[74].mxu0  ;;  %v9493_v10 = vld [vmem:[#allocation2 + $0x80] sm:$0xff]   ;;  %v2061_v4 = vor.u32 %v2059_v56, %v2057_v49  ;;  %v2083_v49 = vshrl.u32 %v10189_v60, 16 }
 0x1ac   : > { %8347 = vst [vmem:[#allocation2 + $0x88] sm:$0xff] %v8314_v5   ;;  %v946_v11 = vmax.f32 %v881_v6, 0.0  ;;  %v884_v12 = vadd.f32 %v10169_v32, %v883_v9  ;;  %v885_v13 = vpop.f32.mrb[75].mxu0  ;;  %8633 = vmatprep.mubr.bf16.mxu0 %v9493_v10  ;;  %v9495_v14 = vld [vmem:[#allocation2 + $0x80] sm:$0xff]  }
 0x1ad   : > { %v2717_v21 = vrot.slane %v9495_v14, 1  ;;  %v2066_v10 = vsel %vm2038_vm1, %v2061_v4, %v2065_v57  ;;  %v3221_v14 = vrot.slane %v9508_v52, 1  ;;  %v9523_v4 = vld [vmem:[#allocation2 + $0x40] sm:$0xff]  }
 0x1ae   : > { %v947_v16 = vmax.f32 %v884_v12, 0.0  ;;  %v1247_v23 = vmul.f32 %v1179_v18, %v946_v11  ;;  %v2079_v12 = vshll.u32 %v10189_v60, 16  ;;  %v2073_v18 = vrot.slane %v2071_v2, 1 }
 0x1af   : > { %v2718_v26 = vsel %vm2685_vm0, %v2715_v62, %v2717_v21  ;;  %v2111_v2 = vshll.u32 %v9521_v53, 16 }
 0x1b0   : > { %v1248_v24 = vmul.f32 %v1184_v20, %v947_v16  ;;  %8734 = vmatmul.mubr.bf16.gmra.mrb[28].mxu1 %v2718_v26  ;;  %v1204_v16 = vpop.permute.xlu1 %1203  ;;  %v9513_v20 = vld [vmem:[#allocation2 + $0x18] sm:$0xff]   ;;  %v2081_v28 = vrot.slane %v2079_v12, 1 }
 0x1b1   : > { %v888_v25 = vpop.f32.mrb[76].mxu0 }
 0x1b2   : > { %v8319_v30 = vpack.c.bf16 %v1248_v24, %v1247_v23  ;;  %v889_v31 = vadd.f32 %v10169_v32, %v888_v25  ;;  %v890_v59 = vpop.f32.mrb[77].mxu0  ;;  %v3223_v23 = vsel %vm2685_vm0, %v3221_v14, %v3222_v0  ;;  %v2067_v24 = vshrl.u32 %v10180_v29, 16  ;;  %v9514_v25 = vld [vmem:[#allocation2 + $0x20] sm:$0xff]  }
 0x1b3   : > { %v891_v33 = vpop.f32.mrb[78].mxu0  ;;  %v9497_v34 = vld [vmem:[#allocation2 + $0x88] sm:$0xff]   ;;  %v2085_v56 = vor.u32 %v2083_v49, %v2081_v28  ;;  %v9534_v14 = vld [vmem:[%s10959_s4 + $0x120] sm:$0xff]   ;;  %v9536_v49 = vld [vmem:[#allocation2 + $0x78] sm:$0xff]  }
 0x1b4   : > { %8348 = vst [vmem:[#allocation2 + $0x90] sm:$0xff] %v8319_v30   ;;  %v948_v36 = vmax.f32 %v889_v31, 0.0  ;;  %v892_v37 = vadd.f32 %v10169_v32, %v891_v33  ;;  %v893_v38 = vpop.f32.mrb[79].mxu0  ;;  %8634 = vmatmul.mubr.bf16.gmra.mrb[120].mxu0 %v9497_v34  ;;  %v9502_v41 = vld [vmem:[#allocation2 + $0x88] sm:$0xff]   ;;  %v9516_v30 = vld [vmem:[#allocation2 + $0x38] sm:$0xff]   ;;  %v2069_v59 = vor.u32 %v2067_v24, %v2065_v57  ;;  %v2077_v33 = vor.u32 %v2075_v27, %v2073_v18 }
 0x1b5   : > { %8653 = vmatprep.mubr.bf16.mxu0 %v2050_v40  ;;  %v2719_v48 = vrot.slane %v9502_v41, 1  ;;  %v3224_v34 = vrot.slane %v9513_v20, 1  ;;  %v2095_v40 = vshll.u32 %v9516_v30, 16  ;;  %v9517_v41 = vld [vmem:[#allocation2 + $0x28] sm:$0xff]  }
 0x1b6   : > { %v949_v43 = vmax.f32 %v892_v37, 0.0  ;;  %v1249_v50 = vmul.f32 %v1189_v45, %v948_v36  ;;  %v2074_v36 = vsel %vm2038_vm1, %v2069_v59, %v2073_v18  ;;  %v3226_v37 = vrot.slane %v9514_v25, 1  ;;  %v9539_v18 = vld [vmem:[%s10959_s4 + $0x128] sm:$0xff]  }
 0x1b7   : > { %v2720_v55 = vsel %vm2685_vm0, %v2717_v21, %v2719_v48  ;;  %v9515_v21 = vld [vmem:[#allocation2 + $0x30] sm:$0xff]   ;;  %v2082_v29 = vsel %vm2038_vm1, %v2077_v33, %v2081_v28  ;;  %v3225_v45 = vsel %vm2685_vm0, %v3222_v0, %v3224_v34  ;;  %v3228_v52 = vrot.slane %v9517_v41, 1 }
 0x1b8   : > { %v1250_v51 = vmul.f32 %v1194_v46, %v949_v43  ;;  %8737 = vmatprep.mubr.bf16.mxu1 %v2720_v55  ;;  %v2087_v35 = vshll.u32 %v9515_v21, 16  ;;  %v9518_v43 = vld [vmem:[%s10959_s4 + $0x108] sm:$0xff]   ;;  %v9524_v55 = vld [vmem:[%s10959_s4 + $0x110] sm:$0xff]   ;;  %v2099_v0 = vshrl.u32 %v9516_v30, 16 }
 0x1b9   : > { %v896_v54 = vpop.f32.mrb[80].mxu0 }
 0x1ba   : > { %v8324_v61 = vpack.c.bf16 %v1250_v51, %v1249_v50  ;;  %v897_v62 = vadd.f32 %v10169_v32, %v896_v54  ;;  %v898_v63 = vpop.f32.mrb[81].mxu0  ;;  %v2089_v46 = vrot.slane %v2087_v35, 1  ;;  %v2091_v50 = vshrl.u32 %v9515_v21, 16  ;;  %v9522_v54 = vld [vmem:[#allocation2 + $0x38] sm:$0xff]  }
 0x1bb   : > { %v899_v3 = vpop.f32.mrb[82].mxu0  ;;  %v9507_v5 = vld [vmem:[#allocation2 + $0x90] ss:$0 sps:$4 sm:$0x11]   ;;  %v2097_v51 = vrot.slane %v2095_v40, 1  ;;  %v2115_v21 = vshrl.u32 %v9521_v53, 16 }
 0x1bc   : > { %8349 = vst [vmem:[#allocation2 + $0x98] sm:$0xff] %v8324_v61   ;;  %v950_v6 = vmax.f32 %v897_v62, 0.0  ;;  %v900_v7 = vadd.f32 %v10169_v32, %v899_v3  ;;  %v901_v9 = vpop.f32.mrb[83].mxu0  ;;  %8654 = vmatmul.mubr.bf16.vlgmr.msra.gmra.mrb[88].mxu0 %v2058_v8  ;;  %v2721_v11 = vrot.slane %v9507_v5, 1  ;;  %v2093_v57 = vor.u32 %v2091_v50, %v2089_v46  ;;  %v9525_v5 = vld [vmem:[#allocation2 + $0x50] sm:$0xff]   ;;  %v9548_v40 = vld [vmem:[%s10959_s4 + $0x138] sm:$0xff]  }
 0x1bd   : > { %8657 = vmatprep.mubr.bf16.mxu0 %v2066_v10  ;;  %v3230_v61 = vrot.slane %v9519_v44, 1  ;;  %v2103_v62 = vshll.u32 %v9520_v47, 16  ;;  %v2090_v63 = vsel %vm2038_vm1, %v2085_v56, %v2089_v46  ;;  %v3232_v3 = vrot.slane %v9522_v54, 1  ;;  %v9533_v46 = vld [vmem:[#allocation2 + $0x60] sm:$0xff]  }
 0x1be   : > { %v951_v13 = vmax.f32 %v900_v7, 0.0  ;;  %v2722_v17 = vsel %vm2685_vm0, %v2719_v48, %v2721_v11  ;;  %v1251_v32 = vmul.f32 %v1199_v15, %v950_v6  ;;  %v3227_v48 = vsel %vm2685_vm0, %v3224_v34, %v3226_v37  ;;  %v9526_v11 = vld [vmem:[#allocation2 + $0x58] sm:$0xff]  }
 0x1bf   : > { %8738 = vmatmul.mubr.bf16.gmra.mrb[32].mxu1 %v2722_v17  ;;  %v2098_v60 = vsel %vm2038_vm1, %v2093_v57, %v2097_v51  ;;  %v3229_v6 = vsel %vm2685_vm0, %v3226_v37, %v3228_v52  ;;  %v2105_v7 = vrot.slane %v2103_v62, 1  ;;  %v2107_v8 = vshrl.u32 %v9520_v47, 16 }
 0x1c0   : > { %v1252_v22 = vmul.f32 %v1204_v16, %v951_v13  ;;  %8757 = vmatprep.mubr.bf16.mxu1 %v3223_v23  ;;  %v3231_v9 = vsel %vm2685_vm0, %v3228_v52, %v3230_v61  ;;  %v2113_v10 = vrot.slane %v2111_v2, 1  ;;  %v2101_v12 = vor.u32 %v2099_v0, %v2097_v51  ;;  %v9528_v23 = vld [vmem:[#allocation2 + $0x50] sm:$0xff]   ;;  %v10242_v51 = vld [vmem:[%s10959_s4 + $0x140] sm:$0xff]  }
 0x1c1   : > { %v904_v26 = vpop.f32.mrb[84].mxu0  ;;  %v2119_v13 = vshll.u32 %v9525_v5, 16  ;;  %v2109_v15 = vor.u32 %v2107_v8, %v2105_v7  ;;  %v3234_v17 = vrot.slane %v9523_v4, 1  ;;  %v3233_v24 = vsel %vm2685_vm0, %v3230_v61, %v3232_v3 }
 0x1c2   : > { %v8329_v31 = vpack.c.bf16 %v1252_v22, %v1251_v32  ;;  %v906_v58 = vpop.f32.mrb[85].mxu0  ;;  %v2106_v16 = vsel %vm2038_vm1, %v2101_v12, %v2105_v7  ;;  %v2127_v32 = vshll.u32 %v9526_v11, 16  ;;  %v9527_v22 = vld [vmem:[#allocation2 + $0x48] sm:$0xff]   ;;  %v9530_v26 = vld [vmem:[#allocation2 + $0x60] sm:$0xff]   ;;  %v2123_v28 = vshrl.u32 %v9525_v5, 16 }
 0x1c3   : > { %v907_v38 = vpop.f32.mrb[86].mxu0  ;;  %v2114_v20 = vsel %vm2038_vm1, %v2109_v15, %v2113_v10  ;;  %v2121_v25 = vrot.slane %v2119_v13, 1  ;;  %v3235_v27 = vsel %vm2685_vm0, %v3232_v3, %v3234_v17  ;;  %v2117_v59 = vor.u32 %v2115_v21, %v2113_v10  ;;  %v9545_v58 = vld [vmem:[%s10959_s4 + $0x130] sm:$0xff]   ;;  %v9542_v15 = vld [vmem:[#allocation2 + $0x78] sm:$0xff]   ;;  %v9543_v21 = vld [vmem:[#allocation2 + $0x80] sm:$0xff]  }
 0x1c4   : > { %8350 = vst [vmem:[#allocation2 + $0xa0] sm:$0xff] %v8329_v31   ;;  %8658 = vmatmul.mubr.bf16.gmra.mrb[92].mxu0 %v2074_v36  ;;  %v908_v42 = vpop.f32.mrb[87].mxu0  ;;  %v2129_v30 = vrot.slane %v2127_v32, 1  ;;  %v9531_v31 = vld [vmem:[#allocation2 + $0x68] sm:$0xff]   ;;  %v3236_v34 = vrot.slane %v9527_v22, 1  ;;  %v2135_v35 = vshll.u32 %v9530_v26, 16 }
 0x1c5   : > { %8661 = vmatprep.mubr.bf16.mxu0 %v2082_v29  ;;  %v2125_v33 = vor.u32 %v2123_v28, %v2121_v25  ;;  %v2122_v36 = vsel %vm2038_vm1, %v2117_v59, %v2121_v25  ;;  %v3238_v37 = vrot.slane %v9528_v23, 1  ;;  %v2143_v39 = vshll.u32 %v9531_v31, 16  ;;  %v9532_v29 = vld [vmem:[#allocation2 + $0x58] sm:$0xff]   ;;  %v9538_v3 = vld [vmem:[#allocation2 + $0x70] sm:$0xff]  }
 0x1c6   : > { %v3237_v41 = vsel %vm2685_vm0, %v3234_v17, %v3236_v34  ;;  %v2137_v42 = vrot.slane %v2135_v35, 1  ;;  %v2139_v47 = vshrl.u32 %v9530_v26, 16  ;;  %v3240_v53 = vrot.slane %v9532_v29, 1  ;;  %v9544_v32 = vld [vmem:[#allocation2 + $0x90] ss:$0 sps:$4 sm:$0x11]  }
 0x1c7   : > { %8758 = vmatmul.mubr.bf16.vlgmr.msra.gmra.mrb[0].mxu1 %v3225_v45  ;;  %v2130_v38 = vsel %vm2038_vm1, %v2125_v33, %v2129_v30  ;;  %v3239_v44 = vsel %vm2685_vm0, %v3236_v34, %v3238_v37  ;;  %v2131_v45 = vshrl.u32 %v9526_v11, 16  ;;  %v3242_v56 = vrot.slane %v9533_v46, 1  ;;  %v9546_v33 = vld [vmem:[#allocation2 + $0x88] sm:$0xff]   ;;  %v9551_v34 = vld [vmem:[#allocation2 + $0x10] sm:$0xff]  }
 0x1c8   : > { %8794 = vmatpush3.bf16.msra.mxu1 %v10140_v19  ;;  %8761 = vmatprep.mubr.bf16.mxu1 %v3227_v48  ;;  %v9529_v19 = vld [vmem:[%s10959_s4 + $0x118] sm:$0xff]   ;;  %v2145_v48 = vrot.slane %v2143_v39, 1  ;;  %v2141_v52 = vor.u32 %v2139_v47, %v2137_v42  ;;  %v2159_v61 = vshll.u32 %v9536_v49, 16  ;;  %v3241_v62 = vsel %vm2685_vm0, %v3238_v37, %v3240_v53  ;;  %v9547_v37 = vld [vmem:[#allocation2 + $0x90] sm:$0xff]  }
 0x1c9   : > { %8795 = vmatprep.subr.bf16.mxu1 %v9518_v43  ;;  %v2133_v50 = vor.u32 %v2131_v45, %v2129_v30  ;;  %v3243_v0 = vsel %vm2685_vm0, %v3240_v53, %v3242_v56  ;;  %v2147_v2 = vshrl.u32 %v9531_v31, 16  ;;  %v3246_v12 = vrot.slane %v9538_v3, 1  ;;  %v9553_v47 = vld [vmem:[#allocation2 + $0x18] sm:$0xff]  }
 0x1ca   : > { %v2146_v57 = vsel %vm2038_vm1, %v2141_v52, %v2145_v48  ;;  %v2161_v5 = vrot.slane %v2159_v61, 1  ;;  %v2163_v17 = vshrl.u32 %v9536_v49, 16  ;;  %v3248_v26 = vrot.slane %v9542_v15, 1  ;;  %v9554_v49 = vld [vmem:[#allocation2 + $0x20] sm:$0xff]   ;;  %v9556_v15 = vld [vmem:[%s10959_s4 + $0x148] sm:$0xff]  }
 0x1cb   : > { %v2149_v7 = vor.u32 %v2147_v2, %v2145_v48  ;;  %v3250_v28 = vrot.slane %v9543_v21, 1  ;;  %v2183_v30 = vshll.u32 %v9544_v32, 16  ;;  %v3252_v29 = vrot.slane %v9546_v33, 1 }
 0x1cc   : > { %8662 = vmatmul.mubr.bf16.gmra.mrb[96].mxu0 %v2090_v63  ;;  %8796 = vmatpush3.bf16.msra.mxu1 %v9518_v43  ;;  %v9535_v43 = vld [vmem:[#allocation2 + $0x70] sm:$0xff]   ;;  %v3249_v59 = vsel %vm2685_vm0, %v3246_v12, %v3248_v26 }
 0x1cd   : > { %8665 = vmatprep.mubr.bf16.mxu0 %v2098_v60  ;;  %8797 = vmatprep.subr.bf16.mxu1 %v9524_v55  ;;  %v2151_v54 = vshll.u32 %v9535_v43, 16  ;;  %v9540_v60 = vld [vmem:[#allocation2 + $0x80] sm:$0xff]   ;;  %v2155_v4 = vshrl.u32 %v9535_v43, 16  ;;  %v3251_v35 = vsel %vm2685_vm0, %v3248_v26, %v3250_v28  ;;  %v3769_v43 = vshll.u32 %v9551_v34, 16 }
 0x1ce   : > { %v2167_v10 = vshll.u32 %v9540_v60, 16  ;;  %v2171_v22 = vshrl.u32 %v9540_v60, 16  ;;  %v3253_v48 = vsel %vm2685_vm0, %v3250_v28, %v3252_v29 }
 0x1cf   : > { %8762 = vmatmul.mubr.bf16.gmra.mrb[4].mxu1 %v3229_v6  ;;  %v2153_v63 = vrot.slane %v2151_v54, 1  ;;  %v9541_v6 = vld [vmem:[#allocation2 + $0x88] sm:$0xff]   ;;  %v3771_v53 = vrot.slane %v3769_v43, 2 }
 0x1d0   : > { %8765 = vmatprep.mubr.bf16.mxu1 %v3231_v9  ;;  %8798 = vmatpush3.bf16.msra.mxu1 %v9524_v55  ;;  %v2138_v55 = vsel %vm2038_vm1, %v2133_v50, %v2137_v42  ;;  %v3254_v42 = vrot.slane %v9547_v37, 1 }
 0x1d1   : > { %8799 = vmatprep.subr.bf16.mxu1 %v9529_v19  ;;  %v2157_v8 = vor.u32 %v2155_v4, %v2153_v63  ;;  %v2154_v11 = vsel %vm2038_vm1, %v2149_v7, %v2153_v63 }
 0x1d2   : > { %v3255_v50 = vsel %vm2685_vm0, %v3252_v29, %v3254_v42 }
 0x1d3   : > { %v2162_v13 = vsel %vm2038_vm1, %v2157_v8, %v2161_v5  ;;  %v9557_v8 = vld [vmem:[#allocation2 + $0x30] sm:$0xff]  }
 0x1d4   : > { %8666 = vmatmul.mubr.bf16.gmra.mrb[100].mxu0 %v2106_v16  ;;  %8800 = vmatpush3.bf16.msra.mxu1 %v9529_v19  ;;  %v9537_v19 = vld [vmem:[#allocation2 + $0x68] sm:$0xff]  }
 0x1d5   : > { %8669 = vmatprep.mubr.bf16.mxu0 %v2114_v20  ;;  %8801 = vmatprep.subr.bf16.mxu1 %v9534_v14  ;;  %v3244_v9 = vrot.slane %v9537_v19, 1  ;;  %v3787_v19 = vshll.u32 %v9554_v49, 16 }
 0x1d7   : > { %8766 = vmatmul.mubr.bf16.gmra.mrb[8].mxu1 %v3233_v24  ;;  %v3245_v16 = vsel %vm2685_vm0, %v3242_v56, %v3244_v9  ;;  %v3247_v20 = vsel %vm2685_vm0, %v3244_v9, %v3246_v12  ;;  %v2165_v24 = vor.u32 %v2163_v17, %v2161_v5  ;;  %v3775_v56 = vshrl.u32 %v9553_v47, 16  ;;  %v9555_v5 = vld [vmem:[#allocation2 + $0x28] sm:$0xff]  }
 0x1d8   : > { %8769 = vmatprep.mubr.bf16.mxu1 %v3235_v27  ;;  %8802 = vmatpush3.bf16.msra.mxu1 %v9534_v14  ;;  %v2175_v14 = vshll.u32 %v9541_v6, 16  ;;  %v3789_v7 = vrot.slane %v3787_v19, 2 }
 0x1d9   : > { %8803 = vmatprep.subr.bf16.mxu1 %v9539_v18 }
 0x1da   : > { %v2177_v23 = vrot.slane %v2175_v14, 1  ;;  %v3805_v14 = vshll.u32 %v9557_v8, 16 }
 0x1dc   : > { %8670 = vmatmul.mubr.bf16.gmra.mrb[104].mxu0 %v2122_v36  ;;  %8804 = vmatpush3.bf16.msra.mxu1 %v9539_v18  ;;  %v2169_v18 = vrot.slane %v2167_v10, 1  ;;  %v2185_v36 = vrot.slane %v2183_v30, 1  ;;  %v3793_v10 = vshrl.u32 %v9555_v5, 16 }
 0x1dd   : > { %8673 = vmatprep.mubr.bf16.mxu0 %v2130_v38  ;;  %8805 = vmatprep.subr.bf16.mxu1 %v9545_v58  ;;  %v9550_v38 = vld [vmem:[#allocation2 + $0x8] sm:$0xfe]  }
 0x1de   : > { %v2173_v25 = vor.u32 %v2171_v22, %v2169_v18  ;;  %v2170_v27 = vsel %vm2038_vm1, %v2165_v24, %v2169_v18  ;;  %v3758_v45 = vshrl.u32 %v9550_v38, 16  ;;  %v3761_v46 = vshll.u32 %v9550_v38, 16  ;;  %v9560_v24 = vld [vmem:[%s10959_s4 + $0x150] sm:$0xff]  }
 0x1df   : > { %8770 = vmatmul.mubr.bf16.gmra.mrb[12].mxu1 %v3237_v41  ;;  %v3795_v17 = vrot.slane %v3793_v10, 1  ;;  %v3807_v22 = vrot.slane %v3805_v14, 2  ;;  %v9562_v38 = vld [vmem:[#allocation2 + $0x50] sm:$0xff]  }
 0x1e0   : > { %8773 = vmatprep.mubr.bf16.mxu1 %v3239_v44  ;;  %8806 = vmatpush3.bf16.msra.mxu1 %v9545_v58  ;;  %v2178_v31 = vsel %vm2038_vm1, %v2173_v25, %v2177_v23  ;;  %v2179_v58 = vshrl.u32 %v9541_v6, 16  ;;  %v9549_v44 = vld [vmem:[#allocation2 + $0x98] ss:$0 sps:$4 sm:$0x11]   ;;  %v3760_v54 = vrot.slane %v3758_v45, 1  ;;  %v3838_v43 = vshrl.u32 %v9562_v38, 16 }
 0x1e1   : > { %8807 = vmatprep.subr.bf16.mxu1 %v9548_v40  ;;  %v3256_v61 = vrot.slane %v9549_v44, 1  ;;  %v3841_v44 = vshll.u32 %v9562_v38, 16  ;;  %v9569_v45 = vld [vmem:[%s10959_s4 + $0x168] sm:$0xff]  }
 0x1e2   : > { %v2181_v39 = vor.u32 %v2179_v58, %v2177_v23  ;;  %v9559_v23 = vld [vmem:[#allocation2 + $0x40] sm:$0xff]  }
 0x1e3   : > { %v3257_v3 = vsel %vm2685_vm0, %v3254_v42, %v3256_v61  ;;  %v3820_v30 = vshrl.u32 %v9559_v23, 16 }
 0x1e4   : > { %8674 = vmatmul.mubr.bf16.gmra.mrb[108].mxu0 %v2138_v55  ;;  %8808 = vmatpush3.bf16.msra.mxu1 %v9548_v40  ;;  %v3766_v40 = vshrl.u32 %v9551_v34, 16  ;;  %v2186_v41 = vsel %vm2038_vm1, %v2181_v39, %v2185_v36  ;;  %v3763_v55 = vrot.slane %v3761_v46, 2  ;;  %v9561_v34 = vld [vmem:[#allocation2 + $0x48] sm:$0xff]   ;;  %v9566_v39 = vld [vmem:[%s10959_s4 + $0x160] sm:$0xff]  }
 0x1e5   : > { %8677 = vmatprep.mubr.bf16.mxu0 %v2146_v57  ;;  %8845 = vmatprep.subr.bf16.mxu1 %v10242_v51  ;;  %v3778_v57 = vshll.u32 %v9553_v47, 16  ;;  %v3822_v36 = vrot.slane %v3820_v30, 1 }
 0x1e6   : > { %v3768_v52 = vrot.slane %v3766_v40, 1  ;;  %v3764_v60 = vor.u32 %v3763_v55, %v3760_v54  ;;  %v3829_v40 = vshrl.u32 %v9561_v34, 16  ;;  %v9565_v54 = vld [vmem:[#allocation2 + $0x60] sm:$0xff]   ;;  %v9572_v55 = vld [vmem:[%s10959_s4 + $0x170] sm:$0xff]  }
 0x1e7   : > { %8774 = vmatmul.mubr.bf16.gmra.mrb[16].mxu1 %v3241_v62  ;;  %v3784_v62 = vshrl.u32 %v9554_v49, 16  ;;  %v3780_v2 = vrot.slane %v3778_v57, 2  ;;  %v9564_v49 = vld [vmem:[#allocation2 + $0x58] sm:$0xff]   ;;  %v3859_v19 = vshll.u32 %v9565_v54, 16 }
 0x1e8   : > { %8777 = vmatprep.mubr.bf16.mxu1 %v3243_v0  ;;  %v3772_v63 = vor.u32 %v3771_v53, %v3768_v52  ;;  %v3777_v0 = vrot.slane %v3775_v56, 1  ;;  %v3831_v47 = vrot.slane %v3829_v40, 1  ;;  %v3840_v52 = vrot.slane %v3838_v43, 1 }
 0x1e9   : > { %v3786_v4 = vrot.slane %v3784_v62, 1  ;;  %v3843_v53 = vrot.slane %v3841_v44, 2  ;;  %v3847_v57 = vshrl.u32 %v9564_v49, 16  ;;  %v3850_v61 = vshll.u32 %v9564_v49, 16 }
 0x1ea   : > { %v3773_v6 = vsel %vm3756_vm2, %v3764_v60, %v3772_v63  ;;  %v3781_v9 = vor.u32 %v3780_v2, %v3777_v0  ;;  %v9575_v60 = vld [vmem:[%s10959_s4 + $0x178] sm:$0xff]  }
 0x1eb   : > { %v3790_v12 = vor.u32 %v3789_v7, %v3786_v4  ;;  %v3844_v62 = vor.u32 %v3843_v53, %v3840_v52  ;;  %v3849_v2 = vrot.slane %v3847_v57, 1  ;;  %v9567_v4 = vld [vmem:[#allocation2 + $0x68] sm:$0xff]   ;;  %v3861_v7 = vrot.slane %v3859_v19, 2 }
 0x1ec   : > { %8678 = vmatmul.mubr.bf16.gmra.mrb[112].mxu0 %v2154_v11  ;;  %v3796_v11 = vshll.u32 %v9555_v5, 16 }
 0x1ed   : > { %8681 = vmatprep.mubr.bf16.mxu0 %v2162_v13  ;;  %v3802_v13 = vshrl.u32 %v9557_v8, 16  ;;  %v3791_v21 = vsel %vm3756_vm2, %v3781_v9, %v3790_v12  ;;  %v9568_v8 = vld [vmem:[#allocation2 + $0x70] sm:$0xff]  }
 0x1ee   : > { %v3798_v18 = vrot.slane %v3796_v11, 2  ;;  %v3865_v11 = vshrl.u32 %v9567_v4, 16  ;;  %v3874_v14 = vshrl.u32 %v9568_v8, 16 }
 0x1ef   : > { %8778 = vmatmul.mubr.bf16.gmra.mrb[20].mxu1 %v3245_v16  ;;  %v3782_v16 = vsel %vm3756_vm2, %v3772_v63, %v3781_v9  ;;  %v3804_v32 = vrot.slane %v3802_v13, 1  ;;  %v3856_v63 = vshrl.u32 %v9565_v54, 16  ;;  %v10296_v9 = vld [vmem:[%s10959_s4 + $0x180] sm:$0xff]  }
 0x1f0   : > { %8781 = vmatprep.mubr.bf16.mxu1 %v3247_v20  ;;  %v9558_v20 = vld [vmem:[#allocation2 + $0x38] sm:$0xff]   ;;  %v3799_v25 = vor.u32 %v3798_v18, %v3795_v17  ;;  %v3867_v17 = vrot.slane %v3865_v11, 1 }
 0x1f1   : > { %v3811_v26 = vshrl.u32 %v9558_v20, 16  ;;  %v3808_v28 = vor.u32 %v3807_v22, %v3804_v32  ;;  %v3876_v32 = vrot.slane %v3874_v14, 1 }
 0x1f3   : > { %v3813_v58 = vrot.slane %v3811_v26, 1 }
 0x1f4   : > { %8682 = vmatmul.mubr.bf16.gmra.mrb[116].mxu0 %v2170_v27  ;;  %v3814_v27 = vshll.u32 %v9558_v20, 16  ;;  %v9570_v20 = vld [vmem:[#allocation2 + $0x78] sm:$0xff]  }
 0x1f5   : > { %8685 = vmatprep.mubr.bf16.mxu0 %v2178_v31  ;;  %v3823_v31 = vshll.u32 %v9559_v23, 16  ;;  %v9571_v23 = vld [vmem:[#allocation2 + $0x80] sm:$0xff]   ;;  %v3886_v26 = vshll.u32 %v9570_v20, 16 }
 0x1f6   : > { %v3816_v33 = vrot.slane %v3814_v27, 2  ;;  %v3895_v30 = vshll.u32 %v9571_v23, 16 }
 0x1f7   : > { %8782 = vmatmul.mubr.bf16.gmra.mrb[24].mxu1 %v3249_v59  ;;  %v9563_v59 = vld [vmem:[%s10959_s4 + $0x158] sm:$0xff]   ;;  %v3825_v37 = vrot.slane %v3823_v31, 2 }
 0x1f8   : > { %8785 = vmatprep.mubr.bf16.mxu1 %v3251_v35  ;;  %v3809_v35 = vsel %vm3756_vm2, %v3799_v25, %v3808_v28  ;;  %v3817_v29 = vor.u32 %v3816_v33, %v3813_v58  ;;  %v9573_v58 = vld [vmem:[#allocation2 + $0x88] sm:$0xff]  }
 0x1f9   : > { %v3826_v42 = vor.u32 %v3825_v37, %v3822_v36  ;;  %v9574_v36 = vld [vmem:[#allocation2 + $0x90] sm:$0xff]   ;;  %v3901_v38 = vshrl.u32 %v9573_v58, 16 }
 0x1fa   : > { %v3818_v46 = vsel %vm3756_vm2, %v3808_v28, %v3817_v29  ;;  %v3892_v28 = vshrl.u32 %v9571_v23, 16  ;;  %v3910_v40 = vshrl.u32 %v9574_v36, 16  ;;  %v9596_v23 = vld [vmem:[%s10959_s4 + $0x1a8] sm:$0xff]  }
 0x1fb   : > { %v3903_v43 = vrot.slane %v3901_v38, 1 }
 0x1fc   : > { %8686 = vmatmul.mubr.bf16.gmra.mrb[120].mxu0 %v2186_v41  ;;  %v3832_v41 = vshll.u32 %v9561_v34, 16  ;;  %v3894_v34 = vrot.slane %v3892_v28, 1  ;;  %v9599_v28 = vld [vmem:[%s10959_s4 + $0x1b0] sm:$0xff]  }
 0x1fd   : > { %6938 = vmatprep.mubr.bf16.mxu0 %v9710_v1 }
 0x1ff   : > { %8786 = vmatmul.mubr.bf16.gmra.mrb[28].mxu1 %v3253_v48  ;;  %v3834_v48 = vrot.slane %v3832_v41, 2  ;;  %v3913_v41 = vshll.u32 %v9574_v36, 16 }
 0x200   : > { %8789 = vmatprep.mubr.bf16.mxu1 %v3255_v50  ;;  %v3827_v50 = vsel %vm3756_vm2, %v3817_v29, %v3826_v42 }
 0x201   : > { %v3835_v56 = vor.u32 %v3834_v48, %v3831_v47  ;;  %v3912_v47 = vrot.slane %v3910_v40, 1  ;;  %v3915_v48 = vrot.slane %v3913_v41, 2  ;;  %v9595_v40 = vld [vmem:[#allocation2 + $0x70] sm:$0xff]  }
 0x203   : > { %v3836_v0 = vsel %vm3756_vm2, %v3826_v42, %v3835_v56  ;;  %v3845_v5 = vsel %vm3756_vm2, %v3835_v56, %v3844_v62  ;;  %v3916_v53 = vor.u32 %v3915_v48, %v3912_v47 }
 0x207   : > { %8790 = vmatmul.mubr.bf16.gmra.mrb[32].mxu1 %v3257_v3  ;;  %v3852_v3 = vrot.slane %v3850_v61, 2  ;;  %v9578_v61 = vld [vmem:[#allocation2 + $0x10] sm:$0xff]  }
 0x208   : > { %8809 = vmatprep.mubr.bf16.mxu1 %v3773_v6  ;;  %v3858_v6 = vrot.slane %v3856_v63, 1  ;;  %v4427_v19 = vrot.slane %v9578_v61, 2 }
 0x209   : > { %v3853_v10 = vor.u32 %v3852_v3, %v3849_v2  ;;  %v9580_v2 = vld [vmem:[#allocation2 + $0x18] sm:$0xff]  }
 0x20a   : > { %v3862_v13 = vor.u32 %v3861_v7, %v3858_v6  ;;  %v9583_v7 = vld [vmem:[%s10959_s4 + $0x188] sm:$0xff]  }
 0x20f   : > { %8810 = vmatmul.mubr.bf16.vlgmr.msra.gmra.mrb[0].mxu1 %v3782_v16  ;;  %v3854_v16 = vsel %vm3756_vm2, %v3844_v62, %v3853_v10  ;;  %v9577_v62 = vld [vmem:[#allocation2 + $0x8] sm:$0xfc]  }
 0x210   : > { %8846 = vmatpush3.bf16.msra.mxu1 %v10242_v51  ;;  %8813 = vmatprep.mubr.bf16.mxu1 %v3791_v21  ;;  %v3800_v51 = vsel %vm3756_vm2, %v3790_v12, %v3799_v25  ;;  %v3868_v12 = vshll.u32 %v9567_v4, 16  ;;  %v3863_v21 = vsel %vm3756_vm2, %v3853_v10, %v3862_v13  ;;  %v3883_v25 = vshrl.u32 %v9570_v20, 16  ;;  %v9581_v4 = vld [vmem:[#allocation2 + $0x20] sm:$0xff]   ;;  %v9582_v10 = vld [vmem:[#allocation2 + $0x28] sm:$0xff]  }
 0x211   : > { %8847 = vmatprep.subr.bf16.mxu1 %v9556_v15  ;;  %v4431_v6 = vrot.slane %v9581_v4, 2  ;;  %v4433_v14 = vrot.slane %v9582_v10, 2  ;;  %v9586_v20 = vld [vmem:[#allocation2 + $0x40] sm:$0xff]  }
 0x212   : > { %v3870_v18 = vrot.slane %v3868_v12, 2  ;;  %v9584_v12 = vld [vmem:[#allocation2 + $0x30] sm:$0xff]  }
 0x214   : > { %8848 = vmatpush3.bf16.msra.mxu1 %v9556_v15  ;;  %v3877_v15 = vshll.u32 %v9568_v8, 16 }
 0x215   : > { %8849 = vmatprep.subr.bf16.mxu1 %v9560_v24 }
 0x216   : > { %v3879_v22 = vrot.slane %v3877_v15, 2  ;;  %v4435_v15 = vrot.slane %v9584_v12, 2 }
 0x217   : > { %8814 = vmatmul.mubr.bf16.gmra.mrb[4].mxu1 %v3800_v51  ;;  %v3888_v51 = vrot.slane %v3886_v26, 2 }
 0x218   : > { %8817 = vmatprep.mubr.bf16.mxu1 %v3809_v35  ;;  %8850 = vmatpush3.bf16.msra.mxu1 %v9560_v24  ;;  %v3871_v24 = vor.u32 %v3870_v18, %v3867_v17  ;;  %v3880_v27 = vor.u32 %v3879_v22, %v3876_v32  ;;  %v3897_v35 = vrot.slane %v3895_v30, 2  ;;  %v4434_v17 = vsel %vm4425_vm3, %v4431_v6, %v4433_v14  ;;  %v9585_v18 = vld [vmem:[#allocation2 + $0x38] sm:$0xff]  }
 0x219   : > { %8851 = vmatprep.subr.bf16.mxu1 %v9563_v59  ;;  %v4437_v32 = vrot.slane %v9585_v18, 2  ;;  %v4439_v22 = vrot.slane %v9586_v20, 2 }
 0x21a   : > { %v3872_v31 = vsel %vm3756_vm2, %v3862_v13, %v3871_v24  ;;  %v3881_v33 = vsel %vm3756_vm2, %v3871_v24, %v3880_v27  ;;  %v3898_v29 = vor.u32 %v3897_v35, %v3894_v34  ;;  %v9587_v13 = vld [vmem:[%s10959_s4 + $0x190] sm:$0xff]   ;;  %v9592_v34 = vld [vmem:[#allocation2 + $0x60] sm:$0xff]  }
 0x21b   : > { %v4438_v24 = vsel %vm4425_vm3, %v4435_v15, %v4437_v32  ;;  %v4440_v26 = vsel %vm4425_vm3, %v4437_v32, %v4439_v22  ;;  %v9606_v35 = vld [vmem:[%s10959_s4 + $0x1c0] sm:$0xff]   ;;  %v9611_v32 = vld [vmem:[#allocation2 + $0x38] sm:$0xff]  }
 0x21c   : > { %8852 = vmatpush3.bf16.msra.mxu1 %v9563_v59  ;;  %v3885_v59 = vrot.slane %v3883_v25, 1  ;;  %v9588_v25 = vld [vmem:[#allocation2 + $0x48] sm:$0xff]  }
 0x21d   : > { %8853 = vmatprep.subr.bf16.mxu1 %v9566_v39  ;;  %v4441_v30 = vrot.slane %v9588_v25, 2 }
 0x21e   : > { %v3889_v37 = vor.u32 %v3888_v51, %v3885_v59  ;;  %v9602_v59 = vld [vmem:[%s10959_s4 + $0x1b8] sm:$0xff]  }
 0x21f   : > { %8818 = vmatmul.mubr.bf16.gmra.mrb[8].mxu1 %v3818_v46  ;;  %v4442_v51 = vsel %vm4425_vm3, %v4439_v22, %v4441_v30 }
 0x220   : > { %8821 = vmatprep.mubr.bf16.mxu1 %v3827_v50  ;;  %8854 = vmatpush3.bf16.msra.mxu1 %v9566_v39  ;;  %v3904_v39 = vshll.u32 %v9573_v58, 16  ;;  %v3890_v42 = vsel %vm3756_vm2, %v3880_v27, %v3889_v37  ;;  %v3899_v46 = vsel %vm3756_vm2, %v3889_v37, %v3898_v29  ;;  %v9589_v27 = vld [vmem:[#allocation2 + $0x50] sm:$0xff]   ;;  %v9591_v58 = vld [vmem:[#allocation2 + $0x58] sm:$0xff]   ;;  %v4447_v37 = vrot.slane %v9592_v34, 2 }
 0x221   : > { %8855 = vmatprep.subr.bf16.mxu1 %v9569_v45  ;;  %v4445_v36 = vrot.slane %v9591_v58, 2  ;;  %v9613_v58 = vld [vmem:[#allocation2 + $0x48] sm:$0xff]  }
 0x222   : > { %v3906_v44 = vrot.slane %v3904_v39, 2  ;;  %v9594_v39 = vld [vmem:[#allocation2 + $0x68] sm:$0xff]  }
 0x223   : > { %v4449_v41 = vrot.slane %v9594_v39, 2  ;;  %v9623_v39 = vld [vmem:[%s10959_s4 + $0x1e8] sm:$0xff]  }
 0x224   : > { %8856 = vmatpush3.bf16.msra.mxu1 %v9569_v45  ;;  %v9576_v45 = vld [vmem:[#allocation2 + $0x98] ss:$0 sps:$4 sm:$0x33]   ;;  %v3907_v49 = vor.u32 %v3906_v44, %v3903_v43 }
 0x225   : > { %8857 = vmatprep.subr.bf16.mxu1 %v9572_v55  ;;  %v3919_v50 = vshrl.u32 %v9576_v45, 16  ;;  %v3922_v52 = vshll.u32 %v9576_v45, 16  ;;  %v4450_v43 = vsel %vm4425_vm3, %v4447_v37, %v4449_v41  ;;  %v9597_v44 = vld [vmem:[#allocation2 + $0x78] sm:$0xff]  }
 0x226   : > { %v3908_v54 = vsel %vm3756_vm2, %v3898_v29, %v3907_v49  ;;  %v3917_v57 = vsel %vm3756_vm2, %v3907_v49, %v3916_v53  ;;  %v4448_v29 = vsel %vm4425_vm3, %v4445_v36, %v4447_v37  ;;  %v4453_v47 = vrot.slane %v9597_v44, 2 }
 0x227   : > { %8822 = vmatmul.mubr.bf16.gmra.mrb[12].mxu1 %v3836_v0  ;;  %v3924_v56 = vrot.slane %v3922_v52, 2 }
 0x228   : > { %8825 = vmatprep.mubr.bf16.mxu1 %v3845_v5  ;;  %8858 = vmatpush3.bf16.msra.mxu1 %v9572_v55  ;;  %v3921_v55 = vrot.slane %v3919_v50, 1  ;;  %v4429_v5 = vrot.slane %v9580_v2, 2  ;;  %v9600_v50 = vld [vmem:[#allocation2 + $0x88] sm:$0xff]  }
 0x229   : > { %8859 = vmatprep.subr.bf16.mxu1 %v9575_v60 }
 0x22a   : > { %v3925_v63 = vor.u32 %v3924_v56, %v3921_v55  ;;  %v4430_v8 = vsel %vm4425_vm3, %v4427_v19, %v4429_v5  ;;  %v4432_v11 = vsel %vm4425_vm3, %v4429_v5, %v4431_v6 }
 0x22c   : > { %8860 = vmatpush3.bf16.msra.mxu1 %v9575_v60  ;;  %v4426_v60 = vrot.slane %v9577_v62, 2  ;;  %v3926_v0 = vsel %vm3756_vm2, %v3916_v53, %v3925_v63  ;;  %v9601_v53 = vld [vmem:[#allocation2 + $0x90] sm:$0xff]   ;;  %v9605_v63 = vld [vmem:[#allocation2 + $0x18] sm:$0xff]  }
 0x22d   : > { %8897 = vmatprep.subr.bf16.mxu1 %v10296_v9  ;;  %v4459_v55 = vrot.slane %v9601_v53, 2  ;;  %v4962_v4 = vrot.slane %v9605_v63, 2  ;;  %v9618_v53 = vld [vmem:[#allocation2 + $0x60] sm:$0xff]  }
 0x22e   : > { %v4428_v3 = vsel %vm4425_vm3, %v4426_v60, %v4427_v19  ;;  %v10430_v63 = vld [vmem:[%s10959_s4 + $0x200] sm:$0xff]  }
 0x22f   : > { %8826 = vmatmul.mubr.bf16.gmra.mrb[16].mxu1 %v3854_v16  ;;  %v9590_v16 = vld [vmem:[%s10959_s4 + $0x198] sm:$0xff]  }
 0x230   : > { %8829 = vmatprep.mubr.bf16.mxu1 %v3863_v21  ;;  %v9593_v21 = vld [vmem:[%s10959_s4 + $0x1a0] sm:$0xff]  }
 0x237   : > { %8830 = vmatmul.mubr.bf16.gmra.mrb[20].mxu1 %v3872_v31  ;;  %v4443_v31 = vrot.slane %v9589_v27, 2  ;;  %v4970_v27 = vrot.slane %v9611_v32, 2  ;;  %v9624_v32 = vld [vmem:[#allocation2 + $0x80] sm:$0xff]  }
 0x238   : > { %8833 = vmatprep.mubr.bf16.mxu1 %v3881_v33 }
 0x239   : > { %v4444_v33 = vsel %vm4425_vm3, %v4441_v30, %v4443_v31  ;;  %v4446_v38 = vsel %vm4425_vm3, %v4443_v31, %v4445_v36  ;;  %v9612_v31 = vld [vmem:[#allocation2 + $0x40] sm:$0xff]  }
 0x23a   : > { %v4972_v37 = vrot.slane %v9612_v31, 2 }
 0x23f   : > { %8834 = vmatmul.mubr.bf16.gmra.mrb[24].mxu1 %v3890_v42  ;;  %v4451_v42 = vrot.slane %v9595_v40, 2  ;;  %v9615_v40 = vld [vmem:[#allocation2 + $0x50] sm:$0xff]  }
 0x240   : > { %8837 = vmatprep.mubr.bf16.mxu1 %v3899_v46  ;;  %v9598_v46 = vld [vmem:[#allocation2 + $0x80] sm:$0xff]  }
 0x241   : > { %v4452_v45 = vsel %vm4425_vm3, %v4449_v41, %v4451_v42  ;;  %v4455_v48 = vrot.slane %v9598_v46, 2  ;;  %v4454_v49 = vsel %vm4425_vm3, %v4451_v42, %v4453_v47  ;;  %v9626_v46 = vld [vmem:[%s10959_s4 + $0x1f0] sm:$0xff]  }
 0x243   : > { %v4456_v52 = vsel %vm4425_vm3, %v4453_v47, %v4455_v48 }
 0x247   : > { %8838 = vmatmul.mubr.bf16.gmra.mrb[28].mxu1 %v3908_v54  ;;  %v4457_v54 = vrot.slane %v9600_v50, 2  ;;  %v9629_v50 = vld [vmem:[%s10959_s4 + $0x1f8] sm:$0xff]  }
 0x248   : > { %8841 = vmatprep.mubr.bf16.mxu1 %v3917_v57  ;;  %v9603_v57 = vld [vmem:[#allocation2 + $0x98] ss:$0 sps:$4 sm:$0x33]  }
 0x249   : > { %v4458_v56 = vsel %vm4425_vm3, %v4455_v48, %v4457_v54  ;;  %v4460_v62 = vsel %vm4425_vm3, %v4457_v54, %v4459_v55  ;;  %v4976_v48 = vrot.slane %v9615_v40, 2  ;;  %v9632_v40 = vld [vmem:[#allocation2 + $0x18] sm:$0xff]  }
 0x24f   : > { %8842 = vmatmul.mubr.bf16.gmra.mrb[32].mxu1 %v3926_v0  ;;  %v9604_v0 = vld [vmem:[#allocation2 + $0x10] sm:$0xfc]  }
 0x250   : > { %8861 = vmatprep.mubr.bf16.mxu1 %v4428_v3  ;;  %v4461_v3 = vrot.slane %v9603_v57, 2  ;;  %v4961_v5 = vrot.slane %v9604_v0, 2 }
 0x252   : > { %v4462_v6 = vsel %vm4425_vm3, %v4459_v55, %v4461_v3  ;;  %v4963_v10 = vsel %vm4425_vm3, %v4961_v5, %v4962_v4  ;;  %v4980_v3 = vrot.slane %v9618_v53, 2  ;;  %v5509_v53 = vshll.u32 %v9632_v40, 16 }
 0x257   : > { %8862 = vmatmul.mubr.bf16.vlgmr.msra.gmra.mrb[0].mxu1 %v4430_v8 }
 0x258   : > { %8898 = vmatpush3.bf16.msra.mxu1 %v10296_v9  ;;  %8865 = vmatprep.mubr.bf16.mxu1 %v4432_v11  ;;  %v4436_v9 = vsel %vm4425_vm3, %v4433_v14, %v4435_v15  ;;  %v9608_v11 = vld [vmem:[#allocation2 + $0x28] sm:$0xff]  }
 0x259   : > { %8899 = vmatprep.subr.bf16.mxu1 %v9583_v7 }
 0x25c   : > { %8900 = vmatpush3.bf16.msra.mxu1 %v9583_v7  ;;  %v9607_v7 = vld [vmem:[#allocation2 + $0x20] sm:$0xff]  }
 0x25d   : > { %8901 = vmatprep.subr.bf16.mxu1 %v9587_v13  ;;  %v4964_v15 = vrot.slane %v9607_v7, 2 }
 0x25f   : > { %8866 = vmatmul.mubr.bf16.gmra.mrb[4].mxu1 %v4434_v17  ;;  %v9610_v17 = vld [vmem:[%s10959_s4 + $0x1c8] sm:$0xff]   ;;  %v4965_v18 = vsel %vm4425_vm3, %v4962_v4, %v4964_v15 }
 0x260   : > { %8869 = vmatprep.mubr.bf16.mxu1 %v4436_v9  ;;  %8902 = vmatpush3.bf16.msra.mxu1 %v9587_v13  ;;  %v9609_v9 = vld [vmem:[#allocation2 + $0x30] sm:$0xff]  }
 0x261   : > { %8903 = vmatprep.subr.bf16.mxu1 %v9590_v16 }
 0x264   : > { %8904 = vmatpush3.bf16.msra.mxu1 %v9590_v16  ;;  %v4966_v16 = vrot.slane %v9608_v11, 2  ;;  %v9622_v11 = vld [vmem:[#allocation2 + $0x78] sm:$0xff]  }
 0x265   : > { %8905 = vmatprep.subr.bf16.mxu1 %v9593_v21 }
 0x267   : > { %8870 = vmatmul.mubr.bf16.gmra.mrb[8].mxu1 %v4438_v24  ;;  %v9614_v24 = vld [vmem:[%s10959_s4 + $0x1d0] sm:$0xff]  }
 0x268   : > { %8873 = vmatprep.mubr.bf16.mxu1 %v4440_v26  ;;  %8906 = vmatpush3.bf16.msra.mxu1 %v9593_v21  ;;  %v4967_v21 = vsel %vm4425_vm3, %v4964_v15, %v4966_v16  ;;  %v4968_v26 = vrot.slane %v9609_v9, 2  ;;  %v4986_v9 = vrot.slane %v9622_v11, 2  ;;  %v5511_v11 = vrot.slane %v5509_v53, 3 }
 0x269   : > { %8907 = vmatprep.subr.bf16.mxu1 %v9596_v23 }
 0x26a   : > { %v4969_v30 = vsel %vm4425_vm3, %v4966_v16, %v4968_v26 }
 0x26c   : > { %8908 = vmatpush3.bf16.msra.mxu1 %v9596_v23 }
 0x26d   : > { %8909 = vmatprep.subr.bf16.mxu1 %v9599_v28 }
 0x26f   : > { %8874 = vmatmul.mubr.bf16.gmra.mrb[12].mxu1 %v4442_v51  ;;  %v4971_v51 = vsel %vm4425_vm3, %v4968_v26, %v4970_v27 }
 0x270   : > { %8877 = vmatprep.mubr.bf16.mxu1 %v4444_v33  ;;  %8910 = vmatpush3.bf16.msra.mxu1 %v9599_v28  ;;  %v9617_v28 = vld [vmem:[%s10959_s4 + $0x1d8] sm:$0xff]  }
 0x271   : > { %8911 = vmatprep.subr.bf16.mxu1 %v9602_v59 }
 0x274   : > { %8912 = vmatpush3.bf16.msra.mxu1 %v9602_v59 }
 0x275   : > { %8949 = vmatprep.subr.bf16.mxu1 %v9606_v35 }
 0x277   : > { %8878 = vmatmul.mubr.bf16.gmra.mrb[16].mxu1 %v4446_v38  ;;  %v4974_v38 = vrot.slane %v9613_v58, 2 }
 0x278   : > { %8881 = vmatprep.mubr.bf16.mxu1 %v4448_v29  ;;  %v4973_v29 = vsel %vm4425_vm3, %v4970_v27, %v4972_v37  ;;  %v9625_v27 = vld [vmem:[#allocation2 + $0x88] sm:$0xff]  }
 0x279   : > { %v4975_v42 = vsel %vm4425_vm3, %v4972_v37, %v4974_v38  ;;  %v4990_v58 = vrot.slane %v9625_v27, 2  ;;  %v9627_v37 = vld [vmem:[#allocation2 + $0x90] sm:$0xff]  }
 0x27f   : > { %8882 = vmatmul.mubr.bf16.gmra.mrb[20].mxu1 %v4450_v43  ;;  %v9616_v43 = vld [vmem:[#allocation2 + $0x58] sm:$0xff]  }
 0x280   : > { %8885 = vmatprep.mubr.bf16.mxu1 %v4452_v45 }
 0x287   : > { %8886 = vmatmul.mubr.bf16.gmra.mrb[24].mxu1 %v4454_v49  ;;  %v4978_v49 = vrot.slane %v9616_v43, 2 }
 0x288   : > { %8889 = vmatprep.mubr.bf16.mxu1 %v4456_v52  ;;  %v4977_v52 = vsel %vm4425_vm3, %v4974_v38, %v4976_v48 }
 0x289   : > { %v4979_v55 = vsel %vm4425_vm3, %v4976_v48, %v4978_v49  ;;  %v4981_v5 = vsel %vm4425_vm3, %v4978_v49, %v4980_v3  ;;  %v4992_v49 = vrot.slane %v9627_v37, 2 }
 0x28f   : > { %v10349_v61 = vpop.f32.mrb[88].mxu0  ;;  %8890 = vmatmul.mubr.bf16.gmra.mrb[28].mxu1 %v4458_v56  ;;  %v9619_v56 = vld [vmem:[#allocation2 + $0x68] sm:$0xff]  }
 0x290   : > { %v10352_v19 = vpop.f32.mrb[89].mxu0  ;;  %8893 = vmatprep.mubr.bf16.mxu1 %v4460_v62  ;;  %v4982_v4 = vrot.slane %v9619_v56, 2 }
 0x291   : > { %v10354_v60 = vpop.f32.mrb[90].mxu0 }
 0x292   : > { %v10356_v2 = vpop.f32.mrb[91].mxu0 }
 0x297   : > { %v10359_v8 = vpop.f32.mrb[92].mxu0  ;;  %8894 = vmatmul.mubr.bf16.gmra.mrb[32].mxu1 %v4462_v6  ;;  %v9621_v6 = vld [vmem:[#allocation2 + $0x70] sm:$0xff]  }
 0x298   : > { %v10362_v12 = vpop.f32.mrb[93].mxu0  ;;  %8913 = vmatprep.mubr.bf16.mxu1 %v4963_v10  ;;  %v4983_v10 = vsel %vm4425_vm3, %v4980_v3, %v4982_v4  ;;  %v4993_v3 = vsel %vm4425_vm3, %v4990_v58, %v4992_v49 }
 0x299   : > { %v10364_v13 = vpop.f32.mrb[94].mxu0 }
 0x29a   : > { %v10366_v14 = vpop.f32.mrb[95].mxu0 }
 0x29f   : > { %v10372_v20 = vpop.f32.mrb[96].mxu0  ;;  %8914 = vmatmul.mubr.bf16.vlgmr.msra.gmra.mrb[0].mxu1 %v4965_v18  ;;  %v4984_v18 = vrot.slane %v9621_v6, 2 }
 0x2a0   : > { %8950 = vmatpush3.bf16.msra.mxu1 %v9606_v35  ;;  %v10375_v22 = vpop.f32.mrb[97].mxu0  ;;  %8917 = vmatprep.mubr.bf16.mxu1 %v4967_v21  ;;  %v9620_v35 = vld [vmem:[%s10959_s4 + $0x1e0] sm:$0xff]  }
 0x2a1   : > { %v10377_v23 = vpop.f32.mrb[98].mxu0  ;;  %8951 = vmatprep.subr.bf16.mxu1 %v9610_v17  ;;  %v4985_v21 = vsel %vm4425_vm3, %v4982_v4, %v4984_v18  ;;  %v4987_v26 = vsel %vm4425_vm3, %v4984_v18, %v4986_v9  ;;  %v9630_v4 = vld [vmem:[#allocation2 + $0xa0] ss:$0 sps:$4 sm:$0x33]   ;;  %v9635_v18 = vld [vmem:[#allocation2 + $0x28] sm:$0xff]  }
 0x2a2   : > { %v10382_v25 = vpop.f32.mrb[99].mxu0  ;;  %v5527_v37 = vshll.u32 %v9635_v18, 16 }
 0x2a4   : > { %8952 = vmatpush3.bf16.msra.mxu1 %v9610_v17  ;;  %v5529_v53 = vrot.slane %v5527_v37, 3  ;;  %v9641_v37 = vld [vmem:[%s10959_s4 + $0x210] sm:$0xff]  }
 0x2a5   : > { %8953 = vmatprep.subr.bf16.mxu1 %v9614_v24 }
 0x2a7   : > { %v10388_v59 = vpop.f32.mrb[100].mxu0  ;;  %8918 = vmatmul.mubr.bf16.gmra.mrb[4].mxu1 %v4969_v30 }
 0x2a8   : > { %v10391_v33 = vpop.f32.mrb[101].mxu0  ;;  %8921 = vmatprep.mubr.bf16.mxu1 %v4971_v51  ;;  %8954 = vmatpush3.bf16.msra.mxu1 %v9614_v24  ;;  %v4988_v51 = vrot.slane %v9624_v32, 2  ;;  %v4996_v32 = vrot.slane %v9630_v4, 2 }
 0x2a9   : > { %v10393_v34 = vpop.f32.mrb[102].mxu0  ;;  %8955 = vmatprep.subr.bf16.mxu1 %v9617_v28 }
 0x2aa   : > { %v10398_v36 = vpop.f32.mrb[103].mxu0 }
 0x2ac   : > { %8956 = vmatpush3.bf16.msra.mxu1 %v9617_v28 }
 0x2ad   : > { %8957 = vmatprep.subr.bf16.mxu1 %v9620_v35 }
 0x2af   : > { %v10404_v41 = vpop.f32.mrb[104].mxu0  ;;  %8922 = vmatmul.mubr.bf16.gmra.mrb[8].mxu1 %v4973_v29  ;;  %v9628_v29 = vld [vmem:[#allocation2 + $0x98] sm:$0xff]  }
 0x2b0   : > { %v10407_v44 = vpop.f32.mrb[105].mxu0  ;;  %8925 = vmatprep.mubr.bf16.mxu1 %v4975_v42  ;;  %8958 = vmatpush3.bf16.msra.mxu1 %v9620_v35  ;;  %v4989_v35 = vsel %vm4425_vm3, %v4986_v9, %v4988_v51 }
 0x2b1   : > { %v10409_v45 = vpop.f32.mrb[106].mxu0  ;;  %8959 = vmatprep.subr.bf16.mxu1 %v9623_v39 }
 0x2b2   : > { %v10414_v47 = vpop.f32.mrb[107].mxu0 }
 0x2b4   : > { %8960 = vmatpush3.bf16.msra.mxu1 %v9623_v39  ;;  %v4991_v39 = vsel %vm4425_vm3, %v4988_v51, %v4990_v58 }
 0x2b5   : > { %8961 = vmatprep.subr.bf16.mxu1 %v9626_v46 }
 0x2b7   : > { %v10420_v54 = vpop.f32.mrb[108].mxu0  ;;  %8926 = vmatmul.mubr.bf16.gmra.mrb[12].mxu1 %v4977_v52  ;;  %v5506_v52 = vshrl.u32 %v9632_v40, 16 }
 0x2b8   : > { %v10423_v57 = vpop.f32.mrb[109].mxu0  ;;  %8929 = vmatprep.mubr.bf16.mxu1 %v4979_v55  ;;  %8962 = vmatpush3.bf16.msra.mxu1 %v9626_v46  ;;  %v9631_v46 = vld [vmem:[#allocation2 + $0x10] sm:$0xfc]  }
 0x2b9   : > { %v10425_v62 = vpop.f32.mrb[110].mxu0  ;;  %8963 = vmatprep.subr.bf16.mxu1 %v9629_v50  ;;  %v5498_v55 = vshrl.u32 %v9631_v46, 16  ;;  %v5501_v56 = vshll.u32 %v9631_v46, 16  ;;  %v9636_v46 = vld [vmem:[#allocation2 + $0x30] sm:$0xff]  }
 0x2ba   : > { %v10432_v0 = vpop.f32.mrb[111].mxu0  ;;  %v5536_v4 = vshll.u32 %v9636_v46, 16 }
 0x2bb   : > { %v5500_v9 = vrot.slane %v5498_v55, 2  ;;  %v9638_v55 = vld [vmem:[#allocation2 + $0x38] sm:$0xff]  }
 0x2bc   : > { %8964 = vmatpush3.bf16.msra.mxu1 %v9629_v50  ;;  %v4994_v50 = vrot.slane %v9628_v29, 2 }
 0x2bd   : > { %9001 = vmatprep.subr.bf16.mxu1 %v10430_v63 }
 0x2be   : > { %v4995_v6 = vsel %vm4425_vm3, %v4992_v49, %v4994_v50  ;;  %v4997_v58 = vsel %vm4425_vm3, %v4994_v50, %v4996_v32  ;;  %v9637_v50 = vld [vmem:[%s10959_s4 + $0x208] sm:$0xff]  }
 0x2bf   : > { %v10436_v7 = vpop.f32.mrb[112].mxu0  ;;  %8930 = vmatmul.mubr.bf16.gmra.mrb[16].mxu1 %v4981_v5  ;;  %v9634_v5 = vld [vmem:[#allocation2 + $0x20] sm:$0xff]  }
 0x2c0   : > { %v10439_v15 = vpop.f32.mrb[113].mxu0  ;;  %8933 = vmatprep.mubr.bf16.mxu1 %v4983_v10  ;;  %v5508_v10 = vrot.slane %v5506_v52, 2  ;;  %v5518_v27 = vshll.u32 %v9634_v5, 16 }
 0x2c1   : > { %v10441_v16 = vpop.f32.mrb[114].mxu0 }
 0x2c2   : > { %v10443_v17 = vpop.f32.mrb[115].mxu0  ;;  %v5512_v51 = vor.u32 %v5511_v11, %v5508_v10  ;;  %v5520_v40 = vrot.slane %v5518_v27, 3  ;;  %v5545_v10 = vshll.u32 %v9638_v55, 16 }
 0x2c4   : > { %v5547_v27 = vrot.slane %v5545_v10, 3  ;;  %v9677_v10 = vld [vmem:[%s10961_s6] ss:$8 sps:$4 sm:$0xff]  }
 0x2c7   : > { %v10446_v24 = vpop.f32.mrb[116].mxu0  ;;  %8934 = vmatmul.mubr.bf16.gmra.mrb[20].mxu1 %v4985_v21  ;;  %v5503_v21 = vrot.slane %v5501_v56, 3 }
 0x2c8   : > { %v10449_v28 = vpop.f32.mrb[117].mxu0  ;;  %8937 = vmatprep.mubr.bf16.mxu1 %v4987_v26  ;;  %v5515_v26 = vshrl.u32 %v9634_v5, 16 }
 0x2c9   : > { %v10451_v30 = vpop.f32.mrb[118].mxu0 }
 0x2ca   : > { %v10453_v31 = vpop.f32.mrb[119].mxu0  ;;  %v5517_v29 = vrot.slane %v5515_v26, 2 }
 0x2cc   : > { %v5521_v56 = vor.u32 %v5520_v40, %v5517_v29 }
 0x2ce   : > { %v5522_v11 = vsel %vm5496_vm4, %v5512_v51, %v5521_v56 }
 0x2cf   : > { %v10456_v38 = vpop.f32.mrb[120].mxu0  ;;  %8938 = vmatmul.mubr.bf16.gmra.mrb[24].mxu1 %v4989_v35  ;;  %v5524_v35 = vshrl.u32 %v9635_v18, 16 }
 0x2d0   : > { %v10459_v42 = vpop.f32.mrb[121].mxu0  ;;  %8941 = vmatprep.mubr.bf16.mxu1 %v4991_v39  ;;  %v5504_v39 = vor.u32 %v5503_v21, %v5500_v9  ;;  %v5538_v9 = vrot.slane %v5536_v4, 3  ;;  %v9639_v21 = vld [vmem:[#allocation2 + $0x40] sm:$0xff]  }
 0x2d1   : > { %v10461_v43 = vpop.f32.mrb[122].mxu0  ;;  %v5526_v52 = vrot.slane %v5524_v35, 2  ;;  %v9640_v35 = vld [vmem:[#allocation2 + $0x48] sm:$0xff]  }
 0x2d2   : > { %v10463_v48 = vpop.f32.mrb[123].mxu0  ;;  %v5513_v49 = vsel %vm5496_vm4, %v5504_v39, %v5512_v51  ;;  %v5554_v51 = vshll.u32 %v9639_v21, 16  ;;  %v5560_v40 = vshrl.u32 %v9640_v35, 16 }
 0x2d3   : > { %v5530_v5 = vor.u32 %v5529_v53, %v5526_v52 }
 0x2d4   : > { %v5556_v53 = vrot.slane %v5554_v51, 3  ;;  %v5562_v4 = vrot.slane %v5560_v40, 2 }
 0x2d5   : > { %v5531_v32 = vsel %vm5496_vm4, %v5521_v56, %v5530_v5  ;;  %v9643_v56 = vld [vmem:[#allocation2 + $0x58] sm:$0xff]  }
 0x2d7   : > { %8942 = vmatmul.mubr.bf16.gmra.mrb[28].mxu1 %v4993_v3  ;;  %v5533_v3 = vshrl.u32 %v9636_v46, 16  ;;  %v5563_v46 = vshll.u32 %v9640_v35, 16  ;;  %v5581_v35 = vshll.u32 %v9643_v56, 16 }
 0x2d8   : > { %8945 = vmatprep.mubr.bf16.mxu1 %v4995_v6  ;;  %v5542_v6 = vshrl.u32 %v9638_v55, 16  ;;  %v9642_v55 = vld [vmem:[#allocation2 + $0x50] sm:$0xff]  }
 0x2d9   : > { %v5535_v18 = vrot.slane %v5533_v3, 2 }
 0x2da   : > { %v5544_v26 = vrot.slane %v5542_v6, 2  ;;  %v5565_v6 = vrot.slane %v5563_v46, 3  ;;  %v9645_v46 = vld [vmem:[#allocation2 + $0x60] sm:$0xff]  }
 0x2db   : > { %v5539_v39 = vor.u32 %v5538_v9, %v5535_v18  ;;  %v5569_v9 = vshrl.u32 %v9642_v55, 16 }
 0x2dc   : > { %v5548_v29 = vor.u32 %v5547_v27, %v5544_v26  ;;  %v5566_v26 = vor.u32 %v5565_v6, %v5562_v4  ;;  %v5578_v27 = vshrl.u32 %v9643_v56, 16  ;;  %v9688_v56 = vld [vmem:[%s10961_s6 + $0x34] ss:$8 sps:$4 sm:$0xff]   ;;  %v5587_v4 = vshrl.u32 %v9645_v46, 16 }
 0x2dd   : > { %v5571_v51 = vrot.slane %v5569_v9, 2  ;;  %v5590_v6 = vshll.u32 %v9645_v46, 16  ;;  %v9656_v9 = vld [vmem:[%s10959_s4 + $0x238] sm:$0xff]  }
 0x2de   : > { %v5549_v3 = vsel %vm5496_vm4, %v5539_v39, %v5548_v29  ;;  %v9694_v46 = vld [vmem:[%s10961_s6 + $0x54] ss:$8 sps:$4 sm:$0xff]  }
 0x2df   : > { %8946 = vmatmul.mubr.bf16.gmra.mrb[32].mxu1 %v4997_v58  ;;  %v5551_v58 = vshrl.u32 %v9639_v21, 16  ;;  %v5572_v21 = vshll.u32 %v9642_v55, 16  ;;  %v9646_v55 = vld [vmem:[#allocation2 + $0x68] sm:$0xff]  }
 0x2e0   : > { %8965 = vmatprep.mubr.bf16.mxu1 %v5513_v49  ;;  %v9644_v49 = vld [vmem:[%s10959_s4 + $0x218] sm:$0xff]  }
 0x2e1   : > { %v5553_v52 = vrot.slane %v5551_v58, 2  ;;  %v5574_v40 = vrot.slane %v5572_v21, 3 }
 0x2e3   : > { %v5557_v18 = vor.u32 %v5556_v53, %v5553_v52  ;;  %v5580_v53 = vrot.slane %v5578_v27, 2  ;;  %v5592_v27 = vrot.slane %v5590_v6, 3 }
 0x2e5   : > { %v5558_v58 = vsel %vm5496_vm4, %v5548_v29, %v5557_v18  ;;  %v5567_v52 = vsel %vm5496_vm4, %v5557_v18, %v5566_v26  ;;  %v9653_v29 = vld [vmem:[%s10959_s4 + $0x230] sm:$0xff]   ;;  %v5599_v18 = vshll.u32 %v9646_v55, 16 }
 0x2e7   : > { %8966 = vmatmul.mubr.bf16.vlgmr.msra.gmra.mrb[0].mxu1 %v5522_v11  ;;  %v9647_v11 = vld [vmem:[%s10959_s4 + $0x220] sm:$0xff]  }
 0x2e8   : > { %9002 = vmatpush3.bf16.msra.mxu1 %v10430_v63  ;;  %8969 = vmatprep.mubr.bf16.mxu1 %v5531_v32  ;;  %v5540_v63 = vsel %vm5496_vm4, %v5530_v5, %v5539_v39  ;;  %v9682_v5 = vld [vmem:[%s10961_s6 + $0x14] ss:$8 sps:$4 sm:$0xff]   ;;  %v9680_v32 = vld [vmem:[%s10961_s6 + $0x10] ss:$8 sps:$4 sm:$0xff]   ;;  %v9650_v39 = vld [vmem:[%s10959_s4 + $0x228] sm:$0xff]  }
 0x2e9   : > { %9003 = vmatprep.subr.bf16.mxu1 %v9637_v50 }
 0x2ec   : > { %9004 = vmatpush3.bf16.msra.mxu1 %v9637_v50  ;;  %v9679_v50 = vld [vmem:[%s10961_s6 + $0x4] ss:$8 sps:$4 sm:$0xff]  }
 0x2ed   : > { %9005 = vmatprep.subr.bf16.mxu1 %v9641_v37  ;;  %6906 = vmatprep.subr.bf16.mxu0 %v9679_v50 }
 0x2ee   : > { %6907 = vmatpush1.bf16.msra.mxu0 %v9677_v10  ;;  %v9686_v10 = vld [vmem:[%s10961_s6 + $0x30] ss:$8 sps:$4 sm:$0xff]  }
 0x2ef   : > { %8970 = vmatmul.mubr.bf16.gmra.mrb[4].mxu1 %v5540_v63  ;;  %6908 = vmatprep.subr.bf16.mxu0 %v9682_v5  ;;  %v9683_v63 = vld [vmem:[%s10961_s6 + $0x20] ss:$8 sps:$4 sm:$0xff]   ;;  %v5596_v5 = vshrl.u32 %v9646_v55, 16 }
 0x2f0   : > { %8973 = vmatprep.mubr.bf16.mxu1 %v5549_v3  ;;  %9006 = vmatpush3.bf16.msra.mxu1 %v9641_v37  ;;  %v9685_v37 = vld [vmem:[%s10961_s6 + $0x24] ss:$8 sps:$4 sm:$0xff]   ;;  %v5575_v3 = vor.u32 %v5574_v40, %v5571_v51  ;;  %v9649_v40 = vld [vmem:[#allocation2 + $0x78] sm:$0xff]  }
 0x2f1   : > { %9007 = vmatprep.subr.bf16.mxu1 %v9644_v49  ;;  %v5598_v51 = vrot.slane %v5596_v5, 2  ;;  %v5614_v55 = vshrl.u32 %v9649_v40, 16  ;;  %v9695_v5 = vld [vmem:[%s10961_s6 + $0x60] ss:$8 sps:$4 sm:$0xff]  }
 0x2f2   : > { %6909 = vmatpush1.bf16.msra.mxu0 %v9680_v32  ;;  %v5576_v21 = vsel %vm5496_vm4, %v5566_v26, %v5575_v3  ;;  %v5589_v32 = vrot.slane %v5587_v4, 2 }
 0x2f3   : > { %6910 = vmatprep.subr.bf16.mxu0 %v9685_v37  ;;  %v9689_v37 = vld [vmem:[%s10961_s6 + $0x40] ss:$8 sps:$4 sm:$0xff]  }
 0x2f4   : > { %9008 = vmatpush3.bf16.msra.mxu1 %v9644_v49  ;;  %v5583_v49 = vrot.slane %v5581_v35, 3  ;;  %v9648_v35 = vld [vmem:[#allocation2 + $0x70] sm:$0xff]   ;;  %v5593_v26 = vor.u32 %v5592_v27, %v5589_v32  ;;  %v9652_v32 = vld [vmem:[#allocation2 + $0x88] sm:$0xff]  }
 0x2f5   : > { %9009 = vmatprep.subr.bf16.mxu1 %v9647_v11 }
 0x2f6   : > { %6911 = vmatpush1.bf16.msra.mxu0 %v9683_v63  ;;  %v5584_v50 = vor.u32 %v5583_v49, %v5580_v53  ;;  %v5605_v63 = vshrl.u32 %v9648_v35, 16  ;;  %v9692_v53 = vld [vmem:[%s10961_s6 + $0x50] ss:$8 sps:$4 sm:$0xff]  }
 0x2f7   : > { %8974 = vmatmul.mubr.bf16.gmra.mrb[8].mxu1 %v5558_v58  ;;  %6912 = vmatprep.subr.bf16.mxu0 %v9688_v56  ;;  %v5617_v56 = vshll.u32 %v9649_v40, 16 }
 0x2f8   : > { %8977 = vmatprep.mubr.bf16.mxu1 %v5567_v52  ;;  %9010 = vmatpush3.bf16.msra.mxu1 %v9647_v11  ;;  %v9691_v11 = vld [vmem:[%s10961_s6 + $0x44] ss:$8 sps:$4 sm:$0xff]   ;;  %v5585_v58 = vsel %vm5496_vm4, %v5575_v3, %v5584_v50  ;;  %v5608_v52 = vshll.u32 %v9648_v35, 16  ;;  %v5607_v4 = vrot.slane %v5605_v63, 2 }
 0x2f9   : > { %9011 = vmatprep.subr.bf16.mxu1 %v9650_v39  ;;  %v9697_v3 = vld [vmem:[%s10961_s6 + $0x64] ss:$8 sps:$4 sm:$0xff]  }
 0x2fa   : > { %6913 = vmatpush1.bf16.msra.mxu0 %v9686_v10  ;;  %v5610_v6 = vrot.slane %v5608_v52, 3  ;;  %v9651_v10 = vld [vmem:[#allocation2 + $0x80] sm:$0xff]  }
 0x2fb   : > { %6914 = vmatprep.subr.bf16.mxu0 %v9691_v11  ;;  %v5616_v11 = vrot.slane %v5614_v55, 2  ;;  %v5626_v35 = vshll.u32 %v9651_v10, 16 }
 0x2fc   : > { %9012 = vmatpush3.bf16.msra.mxu1 %v9650_v39  ;;  %v5601_v39 = vrot.slane %v5599_v18, 3  ;;  %v5611_v27 = vor.u32 %v5610_v6, %v5607_v4 }
 0x2fd   : > { %9013 = vmatprep.subr.bf16.mxu1 %v9653_v29  ;;  %v5628_v40 = vrot.slane %v5626_v35, 3 }
 0x2fe   : > { %6915 = vmatpush1.bf16.msra.mxu0 %v9689_v37  ;;  %v5602_v49 = vor.u32 %v5601_v39, %v5598_v51  ;;  %v5632_v37 = vshrl.u32 %v9652_v32, 16 }
 0x2ff   : > { %8978 = vmatmul.mubr.bf16.gmra.mrb[12].mxu1 %v5576_v21  ;;  %6916 = vmatprep.subr.bf16.mxu0 %v9694_v46  ;;  %v5619_v21 = vrot.slane %v5617_v56, 3  ;;  %v9654_v46 = vld [vmem:[#allocation2 + $0x90] sm:$0xff]  }
 0x300   : > { %8981 = vmatprep.mubr.bf16.mxu1 %v5585_v58  ;;  %9014 = vmatpush3.bf16.msra.mxu1 %v9653_v29  ;;  %v5594_v29 = vsel %vm5496_vm4, %v5584_v50, %v5593_v26  ;;  %v5603_v18 = vsel %vm5496_vm4, %v5593_v26, %v5602_v49  ;;  %v5635_v58 = vshll.u32 %v9652_v32, 16  ;;  %v5612_v51 = vsel %vm5496_vm4, %v5602_v49, %v5611_v27 }
 0x301   : > { %9015 = vmatprep.subr.bf16.mxu1 %v9656_v9  ;;  %v5620_v50 = vor.u32 %v5619_v21, %v5616_v11  ;;  %v5634_v63 = vrot.slane %v5632_v37, 2  ;;  %v5641_v56 = vshrl.u32 %v9654_v46, 16 }
 0x302   : > { %6917 = vmatpush1.bf16.msra.mxu0 %v9692_v53  ;;  %v5637_v52 = vrot.slane %v5635_v58, 3  ;;  %v9655_v53 = vld [vmem:[#allocation2 + $0x98] sm:$0xff]  }
 0x303   : > { %6918 = vmatprep.subr.bf16.mxu0 %v9697_v3  ;;  %v5621_v26 = vsel %vm5496_vm4, %v5611_v27, %v5620_v50  ;;  %v5644_v3 = vshll.u32 %v9654_v46, 16  ;;  %v5650_v4 = vshrl.u32 %v9655_v53, 16  ;;  %v5653_v6 = vshll.u32 %v9655_v53, 16  ;;  %v9658_v46 = vld [vmem:[#allocation2 + $0x10] sm:$0xf8]  }
 0x304   : > { %9016 = vmatpush3.bf16.msra.mxu1 %v9656_v9  ;;  %v5623_v9 = vshrl.u32 %v9651_v10, 16 }
 0x305   : > { %v5646_v49 = vrot.slane %v5644_v3, 3  ;;  %v5652_v21 = vrot.slane %v5650_v4, 2  ;;  %v5655_v32 = vrot.slane %v5653_v6, 3  ;;  %v9661_v3 = vld [vmem:[#allocation2 + $0x28] sm:$0xff]  }
 0x306   : > { %6919 = vmatpush1.bf16.msra.mxu0 %v9695_v5  ;;  %v5625_v39 = vrot.slane %v5623_v9, 2  ;;  %v5643_v5 = vrot.slane %v5641_v56, 2  ;;  %v6171_v4 = vrot.slane %v9661_v3, 3 }
 0x307   : > { %8982 = vmatmul.mubr.bf16.gmra.mrb[16].mxu1 %v5594_v29  ;;  %v5638_v29 = vor.u32 %v5637_v52, %v5634_v63  ;;  %v5656_v37 = vor.u32 %v5655_v32, %v5652_v21  ;;  %v6166_v52 = vrot.slane %v9658_v46, 3  ;;  %v9664_v32 = vld [vmem:[#allocation2 + $0x40] sm:$0xff]  }
 0x308   : > { %8985 = vmatprep.mubr.bf16.mxu1 %v5603_v18  ;;  %v5629_v55 = vor.u32 %v5628_v40, %v5625_v39  ;;  %v9657_v18 = vld [vmem:[#allocation2 + $0xa0] ss:$0 sps:$4 sm:$0x77]   ;;  %v5647_v27 = vor.u32 %v5646_v49, %v5643_v5  ;;  %v9659_v40 = vld [vmem:[#allocation2 + $0x18] sm:$0xff]  }
 0x309   : > { %v5659_v9 = vshrl.u32 %v9657_v18, 16  ;;  %v5662_v35 = vshll.u32 %v9657_v18, 16  ;;  %v6167_v63 = vrot.slane %v9659_v40, 3  ;;  %v9663_v49 = vld [vmem:[#allocation2 + $0x38] sm:$0xff]  }
 0x30a   : > { %v5630_v10 = vsel %vm5496_vm4, %v5620_v50, %v5629_v55  ;;  %v5639_v11 = vsel %vm5496_vm4, %v5629_v55, %v5638_v29  ;;  %v5648_v58 = vsel %vm5496_vm4, %v5638_v29, %v5647_v27  ;;  %v5657_v50 = vsel %vm5496_vm4, %v5647_v27, %v5656_v37  ;;  %v9660_v55 = vld [vmem:[#allocation2 + $0x20] sm:$0xff]  }
 0x30b   : > { %v5664_v39 = vrot.slane %v5662_v35, 3  ;;  %v6168_v56 = vsel %vm6165_vm5, %v6166_v52, %v6167_v63  ;;  %v6169_v29 = vrot.slane %v9660_v55, 3  ;;  %v6177_v35 = vrot.slane %v9664_v32, 3 }
 0x30d   : > { %v6170_v6 = vsel %vm6165_vm5, %v6167_v63, %v6169_v29  ;;  %v6172_v5 = vsel %vm6165_vm5, %v6169_v29, %v6171_v4  ;;  %v9668_v63 = vld [vmem:[#allocation2 + $0x60] sm:$0xff]   ;;  %v9670_v29 = vld [vmem:[#allocation2 + $0x70] sm:$0xff]  }
 0x30e   : > { %v6185_v55 = vrot.slane %v9668_v63, 3 }
 0x30f   : > { %8986 = vmatmul.mubr.bf16.gmra.mrb[20].mxu1 %v5612_v51  ;;  %v5661_v51 = vrot.slane %v5659_v9, 2  ;;  %v9665_v9 = vld [vmem:[#allocation2 + $0x48] sm:$0xff]  }
 0x310   : > { %8989 = vmatprep.mubr.bf16.mxu1 %v5621_v26 }
 0x311   : > { %v5665_v26 = vor.u32 %v5664_v39, %v5661_v51  ;;  %v9666_v51 = vld [vmem:[#allocation2 + $0x50] sm:$0xff]  }
 0x312   : > { %v6181_v40 = vrot.slane %v9666_v51, 3 }
 0x313   : > { %v5666_v53 = vsel %vm5496_vm4, %v5656_v37, %v5665_v26  ;;  %v6179_v37 = vrot.slane %v9665_v9, 3 }
 0x315   : > { %v6180_v39 = vsel %vm6165_vm5, %v6177_v35, %v6179_v37  ;;  %v6182_v26 = vsel %vm6165_vm5, %v6179_v37, %v6181_v40 }
 0x317   : > { %8990 = vmatmul.mubr.bf16.gmra.mrb[24].mxu1 %v5630_v10  ;;  %v9662_v10 = vld [vmem:[#allocation2 + $0x30] sm:$0xff]  }
 0x318   : > { %8993 = vmatprep.mubr.bf16.mxu1 %v5639_v11  ;;  %v6173_v18 = vrot.slane %v9662_v10, 3  ;;  %v6175_v11 = vrot.slane %v9663_v49, 3  ;;  %v6189_v10 = vrot.slane %v9670_v29, 3 }
 0x31a   : > { %v6174_v21 = vsel %vm6165_vm5, %v6171_v4, %v6173_v18  ;;  %v6176_v27 = vsel %vm6165_vm5, %v6173_v18, %v6175_v11  ;;  %v9672_v18 = vld [vmem:[#allocation2 + $0x80] sm:$0xff]  }
 0x31b   : > { %v6193_v32 = vrot.slane %v9672_v18, 3 }
 0x31f   : > { %8994 = vmatmul.mubr.bf16.gmra.mrb[28].mxu1 %v5648_v58  ;;  %v6178_v58 = vsel %vm6165_vm5, %v6175_v11, %v6177_v35  ;;  %v9674_v35 = vld [vmem:[#allocation2 + $0x90] sm:$0xff]  }
 0x320   : > { %8997 = vmatprep.mubr.bf16.mxu1 %v5657_v50  ;;  %v9667_v50 = vld [vmem:[#allocation2 + $0x58] sm:$0xff]   ;;  %v6197_v51 = vrot.slane %v9674_v35, 3 }
 0x321   : > { %v6183_v46 = vrot.slane %v9667_v50, 3 }
 0x323   : > { %v6184_v52 = vsel %vm6165_vm5, %v6181_v40, %v6183_v46  ;;  %v6186_v3 = vsel %vm6165_vm5, %v6183_v46, %v6185_v55  ;;  %v9676_v40 = vld [vmem:[#allocation2 + $0xa0] ss:$0 sps:$4 sm:$0x77]  }
 0x327   : > { %8998 = vmatmul.mubr.bf16.gmra.mrb[32].mxu1 %v5666_v53  ;;  %v9669_v53 = vld [vmem:[#allocation2 + $0x68] sm:$0xff]  }
 0x328   : > { %9017 = vmatprep.mubr.bf16.mxu1 %v6168_v56  ;;  %v6187_v56 = vrot.slane %v9669_v53, 3  ;;  %v9700_v53 = vld [vmem:[%s10961_s6 + $0x74] ss:$8 sps:$4 sm:$0xff]  }
 0x329   : > { %6920 = vmatprep.subr.bf16.mxu0 %v9700_v53 }
 0x32a   : > { %v6188_v4 = vsel %vm6165_vm5, %v6185_v55, %v6187_v56  ;;  %v6190_v49 = vsel %vm6165_vm5, %v6187_v56, %v6189_v10  ;;  %v10577_v56 = vld [vmem:[%s10960_s5] ss:$0 sm:$0xff] }
 0x32f   : > { %9018 = vmatmul.mubr.bf16.vlgmr.msra.gmra.mrb[0].mxu1 %v6170_v6  ;;  %v9671_v6 = vld [vmem:[#allocation2 + $0x78] sm:$0xff]  }
 0x330   : > { %9021 = vmatprep.mubr.bf16.mxu1 %v6172_v5  ;;  %v6191_v5 = vrot.slane %v9671_v6, 3 }
 0x332   : > { %v6192_v11 = vsel %vm6165_vm5, %v6189_v10, %v6191_v5  ;;  %v6194_v9 = vsel %vm6165_vm5, %v6191_v5, %v6193_v32 }
 0x337   : > { %9022 = vmatmul.mubr.bf16.gmra.mrb[4].mxu1 %v6174_v21  ;;  %v9673_v21 = vld [vmem:[#allocation2 + $0x88] sm:$0xff]  }
 0x338   : > { %9025 = vmatprep.mubr.bf16.mxu1 %v6176_v27  ;;  %v6195_v27 = vrot.slane %v9673_v21, 3 }
 0x33a   : > { %v6196_v37 = vsel %vm6165_vm5, %v6193_v32, %v6195_v27  ;;  %v6198_v50 = vsel %vm6165_vm5, %v6195_v27, %v6197_v51 }
 0x33f   : > { %9026 = vmatmul.mubr.bf16.gmra.mrb[8].mxu1 %v6178_v58  ;;  %v9675_v58 = vld [vmem:[#allocation2 + $0x98] sm:$0xff]  }
 0x340   : > { %9029 = vmatprep.mubr.bf16.mxu1 %v6180_v39  ;;  %v6199_v39 = vrot.slane %v9675_v58, 3 }
 0x342   : > { %v6200_v46 = vsel %vm6165_vm5, %v6197_v51, %v6199_v39 }
 0x347   : > { %9030 = vmatmul.mubr.bf16.gmra.mrb[12].mxu1 %v6182_v26  ;;  %v6201_v26 = vrot.slane %v9676_v40, 3 }
 0x348   : > { %9033 = vmatprep.mubr.bf16.mxu1 %v6184_v52  ;;  %v9698_v52 = vld [vmem:[%s10961_s6 + $0x70] ss:$8 sps:$4 sm:$0xff]  }
 0x349   : > { %v6202_v63 = vsel %vm6165_vm5, %v6199_v39, %v6201_v26  ;;  %6921 = vmatpush1.bf16.msra.mxu0 %v9698_v52 }
 0x34f   : > { %9034 = vmatmul.mubr.bf16.gmra.mrb[16].mxu1 %v6186_v3 }
 0x350   : > { %9037 = vmatprep.mubr.bf16.mxu1 %v6188_v4 }
 0x357   : > { %9038 = vmatmul.mubr.bf16.gmra.mrb[20].mxu1 %v6190_v49 }
 0x358   : > { %9041 = vmatprep.mubr.bf16.mxu1 %v6192_v11 }
 0x35f   : > { %9042 = vmatmul.mubr.bf16.gmra.mrb[24].mxu1 %v6194_v9 }
 0x360   : > { %9045 = vmatprep.mubr.bf16.mxu1 %v6196_v37 }
 0x367   : > { %9046 = vmatmul.mubr.bf16.gmra.mrb[28].mxu1 %v6198_v50 }
 0x368   : > { %9049 = vmatprep.mubr.bf16.mxu1 %v6200_v46 }
 0x36f   : > { %9050 = vmatmul.mubr.bf16.gmra.mrb[32].mxu1 %v6202_v63 }
 0x402   : > { %v9019_v55 = vpop.f32.mrb[0].mxu1 }
 0x403   : > { %v9053_v3 = vadd.f32 %v9019_v55, %v10349_v61  ;;  %v6303_v29 = vpop.f32.mrb[1].mxu1 }
 0x404   : > { %v9054_v4 = vadd.f32 %v6303_v29, %v10352_v19  ;;  %v9020_v6 = vpop.f32.mrb[2].mxu1 }
 0x405   : > { %v6599_v10 = vadd.f32 %v9053_v3, %v10577_v56  ;;  %v9055_v5 = vadd.f32 %v9020_v6, %v10354_v60  ;;  %v6306_v49 = vpop.f32.mrb[3].mxu1 }
 0x406   : > { %v6597_v18 = vadd.f32 %v9054_v4, %v10577_v56  ;;  %v9056_v11 = vadd.f32 %v6306_v49, %v10356_v2 }
 0x407   : > { %v6600_v21 = vadd.f32 %v9055_v5, %v10577_v56  ;;  %v6635_v27 = vmax.f32 %v6599_v10, 0.0 }
 0x408   : > { %v6598_v32 = vadd.f32 %v9056_v11, %v10577_v56  ;;  %v6633_v61 = vmax.f32 %v6597_v18, 0.0 }
 0x409   : > { %v6636_v9 = vmax.f32 %v6600_v21, 0.0 }
 0x40a   : > { %v6634_v35 = vmax.f32 %v6598_v32, 0.0  ;;  %v9023_v37 = vpop.f32.mrb[4].mxu1 }
 0x40b   : > { %v9057_v19 = vadd.f32 %v9023_v37, %v10359_v8  ;;  %v6319_v58 = vpop.f32.mrb[5].mxu1  ;;  %v6670_v51 = vpack.c.bf16 %v6636_v9, %v6635_v27 }
 0x40c   : > { %v6669_v39 = vpack.c.bf16 %v6634_v35, %v6633_v61  ;;  %v9058_v60 = vadd.f32 %v6319_v58, %v10362_v12  ;;  %v9024_v50 = vpop.f32.mrb[6].mxu1 }
 0x40d   : > { %v6603_v40 = vadd.f32 %v9057_v19, %v10577_v56  ;;  %v9059_v2 = vadd.f32 %v9024_v50, %v10364_v13  ;;  %v6322_v46 = vpop.f32.mrb[7].mxu1 }
 0x40e   : > { %v6601_v26 = vadd.f32 %v9058_v60, %v10577_v56  ;;  %v9060_v63 = vadd.f32 %v6322_v46, %v10366_v14  ;;  %6939 = vmatmul.mubr.bf16.vlgmr.msra.gmra.mrb[124].mxu0 %v6669_v39 }
 0x40f   : > { %v6604_v52 = vadd.f32 %v9059_v2, %v10577_v56  ;;  %6948 = vmatprep.mubr.bf16.mxu0 %v9710_v1  ;;  %v6639_v53 = vmax.f32 %v6603_v40, 0.0 }
 0x410   : > { %v6602_v8 = vadd.f32 %v9060_v63, %v10577_v56  ;;  %v6637_v12 = vmax.f32 %v6601_v26, 0.0 }
 0x411   : > { %v6640_v55 = vmax.f32 %v6604_v52, 0.0 }
 0x412   : > { %v6638_v3 = vmax.f32 %v6602_v8, 0.0  ;;  %v9027_v29 = vpop.f32.mrb[8].mxu1 }
 0x413   : > { %v9061_v4 = vadd.f32 %v9027_v29, %v10372_v20  ;;  %v6335_v13 = vpop.f32.mrb[9].mxu1  ;;  %v6672_v6 = vpack.c.bf16 %v6640_v55, %v6639_v53 }
 0x414   : > { %v9062_v10 = vadd.f32 %v6335_v13, %v10375_v22  ;;  %v9028_v5 = vpop.f32.mrb[10].mxu1  ;;  %v6671_v14 = vpack.c.bf16 %v6638_v3, %v6637_v12 }
 0x415   : > { %v6607_v49 = vadd.f32 %v9061_v4, %v10577_v56  ;;  %v9063_v18 = vadd.f32 %v9028_v5, %v10377_v23  ;;  %v6338_v11 = vpop.f32.mrb[11].mxu1 }
 0x416   : > { %v6605_v21 = vadd.f32 %v9062_v10, %v10577_v56  ;;  %v9064_v32 = vadd.f32 %v6338_v11, %v10382_v25  ;;  %6949 = vmatmul.mubr.bf16.gmra.mrb[128].mxu0 %v6670_v51 }
 0x417   : > { %v6608_v27 = vadd.f32 %v9063_v18, %v10577_v56  ;;  %6958 = vmatprep.mubr.bf16.mxu0 %v9710_v1  ;;  %v6643_v9 = vmax.f32 %v6607_v49, 0.0 }
 0x418   : > { %v6606_v20 = vadd.f32 %v9064_v32, %v10577_v56  ;;  %v6641_v61 = vmax.f32 %v6605_v21, 0.0 }
 0x419   : > { %v6644_v22 = vmax.f32 %v6608_v27, 0.0 }
 0x41a   : > { %v6642_v35 = vmax.f32 %v6606_v20, 0.0  ;;  %v9031_v37 = vpop.f32.mrb[12].mxu1 }
 0x41b   : > { %v9065_v19 = vadd.f32 %v9031_v37, %v10388_v59  ;;  %v6351_v23 = vpop.f32.mrb[13].mxu1  ;;  %v10606_v58 = vpack.c.bf16 %v6644_v22, %v6643_v9 }
 0x41c   : > { %v9066_v39 = vadd.f32 %v6351_v23, %v10391_v33  ;;  %v9032_v25 = vpop.f32.mrb[14].mxu1  ;;  %v6673_v51 = vpack.c.bf16 %v6642_v35, %v6641_v61 }
 0x41d   : > { %v6611_v60 = vadd.f32 %v9065_v19, %v10577_v56  ;;  %v9067_v50 = vadd.f32 %v9032_v25, %v10393_v34  ;;  %v6354_v40 = vpop.f32.mrb[15].mxu1 }
 0x41e   : > { %v6609_v2 = vadd.f32 %v9066_v39, %v10577_v56  ;;  %v9068_v46 = vadd.f32 %v6354_v40, %v10398_v36  ;;  %6959 = vmatmul.mubr.bf16.gmra.mrb[132].mxu0 %v6671_v14 }
 0x41f   : > { %v6612_v26 = vadd.f32 %v9067_v50, %v10577_v56  ;;  %6968 = vmatprep.mubr.bf16.mxu0 %v9710_v1  ;;  %v6647_v63 = vmax.f32 %v6611_v60, 0.0 }
 0x420   : > { %v6610_v59 = vadd.f32 %v9068_v46, %v10577_v56  ;;  %v6645_v52 = vmax.f32 %v6609_v2, 0.0 }
 0x421   : > { %v6648_v33 = vmax.f32 %v6612_v26, 0.0 }
 0x422   : > { %v6646_v8 = vmax.f32 %v6610_v59, 0.0  ;;  %v9035_v53 = vpop.f32.mrb[16].mxu1 }
 0x423   : > { %v9069_v55 = vadd.f32 %v9035_v53, %v10404_v41  ;;  %v6367_v34 = vpop.f32.mrb[17].mxu1  ;;  %v10617_v12 = vpack.c.bf16 %v6648_v33, %v6647_v63 }
 0x424   : > { %v9070_v3 = vadd.f32 %v6367_v34, %v10407_v44  ;;  %v9036_v36 = vpop.f32.mrb[18].mxu1  ;;  %v10620_v29 = vpack.c.bf16 %v6646_v8, %v6645_v52 }
 0x425   : > { %v6615_v4 = vadd.f32 %v9069_v55, %v10577_v56  ;;  %v9071_v13 = vadd.f32 %v9036_v36, %v10409_v45  ;;  %v6370_v10 = vpop.f32.mrb[19].mxu1 }
 0x426   : > { %v6613_v5 = vadd.f32 %v9070_v3, %v10577_v56  ;;  %v9072_v14 = vadd.f32 %v6370_v10, %v10414_v47  ;;  %6969 = vmatmul.mubr.bf16.gmra.mrb[136].mxu0 %v6672_v6 }
 0x427   : > { %v6616_v41 = vadd.f32 %v9071_v13, %v10577_v56  ;;  %6978 = vmatprep.mubr.bf16.mxu0 %v9710_v1  ;;  %v6651_v44 = vmax.f32 %v6615_v4, 0.0 }
 0x428   : > { %v6614_v49 = vadd.f32 %v9072_v14, %v10577_v56  ;;  %v6649_v11 = vmax.f32 %v6613_v5, 0.0 }
 0x429   : > { %v6652_v18 = vmax.f32 %v6616_v41, 0.0 }
 0x42a   : > { %v6650_v21 = vmax.f32 %v6614_v49, 0.0  ;;  %v9039_v32 = vpop.f32.mrb[20].mxu1 }
 0x42b   : > { %v9073_v27 = vadd.f32 %v9039_v32, %v10420_v54  ;;  %v6383_v45 = vpop.f32.mrb[21].mxu1  ;;  %v10630_v20 = vpack.c.bf16 %v6652_v18, %v6651_v44 }
 0x42c   : > { %v9074_v9 = vadd.f32 %v6383_v45, %v10423_v57  ;;  %v9040_v47 = vpop.f32.mrb[22].mxu1  ;;  %v10633_v6 = vpack.c.bf16 %v6650_v21, %v6649_v11 }
 0x42d   : > { %v6619_v22 = vadd.f32 %v9073_v27, %v10577_v56  ;;  %v9075_v61 = vadd.f32 %v9040_v47, %v10425_v62  ;;  %v6386_v35 = vpop.f32.mrb[23].mxu1 }
 0x42e   : > { %v6617_v37 = vadd.f32 %v9074_v9, %v10577_v56  ;;  %v9076_v19 = vadd.f32 %v6386_v35, %v10432_v0  ;;  %6979 = vmatmul.mubr.bf16.gmra.mrb[140].mxu0 %v6673_v51 }
 0x42f   : > { %v6620_v54 = vadd.f32 %v9075_v61, %v10577_v56  ;;  %6988 = vmatprep.mubr.bf16.mxu0 %v9710_v1  ;;  %v6655_v57 = vmax.f32 %v6619_v22, 0.0 }
 0x430   : > { %v6618_v23 = vadd.f32 %v9076_v19, %v10577_v56  ;;  %v6653_v25 = vmax.f32 %v6617_v37, 0.0 }
 0x431   : > { %v6656_v39 = vmax.f32 %v6620_v54, 0.0 }
 0x432   : > { %v6654_v60 = vmax.f32 %v6618_v23, 0.0  ;;  %v9043_v50 = vpop.f32.mrb[24].mxu1 }
 0x433   : > { %v9077_v40 = vadd.f32 %v9043_v50, %v10436_v7  ;;  %v6399_v62 = vpop.f32.mrb[25].mxu1  ;;  %v10643_v2 = vpack.c.bf16 %v6656_v39, %v6655_v57 }
 0x434   : > { %v9078_v46 = vadd.f32 %v6399_v62, %v10439_v15  ;;  %v9044_v0 = vpop.f32.mrb[26].mxu1  ;;  %v6679_v51 = vpack.c.bf16 %v6654_v60, %v6653_v25 }
 0x435   : > { %v6623_v26 = vadd.f32 %v9077_v40, %v10577_v56  ;;  %v9079_v59 = vadd.f32 %v9044_v0, %v10441_v16  ;;  %v6402_v63 = vpop.f32.mrb[27].mxu1 }
 0x436   : > { %v6621_v33 = vadd.f32 %v9078_v46, %v10577_v56  ;;  %v9080_v52 = vadd.f32 %v6402_v63, %v10443_v17  ;;  %6989 = vmatmul.mubr.bf16.gmra.mrb[144].mxu0 %v10606_v58 }
 0x437   : > { %v6624_v7 = vadd.f32 %v9079_v59, %v10577_v56  ;;  %6998 = vmatprep.mubr.bf16.mxu0 %v9710_v1  ;;  %v6659_v15 = vmax.f32 %v6623_v26, 0.0 }
 0x438   : > { %v6622_v8 = vadd.f32 %v9080_v52, %v10577_v56  ;;  %v6657_v55 = vmax.f32 %v6621_v33, 0.0  ;;  %v6706_v52 = vld [vmem:[%s9791_s20 + $0x28] sm:$0xff] }
 0x439   : > { %v6660_v53 = vmax.f32 %v6624_v7, 0.0 }
 0x43a   : > { %v6658_v34 = vmax.f32 %v6622_v8, 0.0  ;;  %v9047_v3 = vpop.f32.mrb[28].mxu1 }
 0x43b   : > { %v9081_v16 = vadd.f32 %v9047_v3, %v10446_v24  ;;  %v6415_v36 = vpop.f32.mrb[29].mxu1  ;;  %v6682_v4 = vpack.c.bf16 %v6660_v53, %v6659_v15  ;;  %v6707_v53 = vld [vmem:[%s9791_s20 + $0x30] sm:$0xff]  ;;  %v6746_v3 = vunpack.c.l.bf16 %v6706_v52 }
 0x43c   : > { %v9082_v13 = vadd.f32 %v6415_v36, %v10449_v28  ;;  %v9048_v17 = vpop.f32.mrb[30].mxu1  ;;  %v6681_v10 = vpack.c.bf16 %v6658_v34, %v6657_v55 }
 0x43d   : > { %v6627_v58 = vadd.f32 %v9081_v16, %v10577_v56  ;;  %v9083_v5 = vadd.f32 %v9048_v17, %v10451_v30  ;;  %v6418_v14 = vpop.f32.mrb[31].mxu1 }
 0x43e   : > { %v6625_v41 = vadd.f32 %v9082_v13, %v10577_v56  ;;  %v9084_v49 = vadd.f32 %v6418_v14, %v10453_v31  ;;  %6999 = vmatmul.mubr.bf16.gmra.mrb[148].mxu0 %v10620_v29  ;;  %v6747_v13 = vunpack.c.h.bf16 %v6706_v52  ;;  %v6711_v52 = vld [vmem:[%s9791_s20 + $0x50] sm:$0xff] }
 0x43f   : > { %v6628_v44 = vadd.f32 %v9083_v5, %v10577_v56  ;;  %7008 = vmatprep.mubr.bf16.mxu0 %v9710_v1  ;;  %v6663_v28 = vmax.f32 %v6627_v58, 0.0  ;;  %v6748_v5 = vunpack.c.l.bf16 %v6707_v53 }
 0x440   : > { %v6626_v24 = vadd.f32 %v9084_v49, %v10577_v56  ;;  %v6661_v11 = vmax.f32 %v6625_v41, 0.0 }
 0x441   : > { %v6664_v18 = vmax.f32 %v6628_v44, 0.0 }
 0x442   : > { %v6662_v21 = vmax.f32 %v6626_v24, 0.0  ;;  %v9051_v32 = vpop.f32.mrb[32].mxu1  ;;  %v6749_v24 = vunpack.c.h.bf16 %v6707_v53 }
 0x443   : > { %v9085_v30 = vadd.f32 %v9051_v32, %v10456_v38  ;;  %v6431_v27 = vpop.f32.mrb[33].mxu1  ;;  %v6684_v45 = vpack.c.bf16 %v6664_v18, %v6663_v28 }
 0x444   : > { %v9086_v9 = vadd.f32 %v6431_v27, %v10459_v42  ;;  %v9052_v31 = vpop.f32.mrb[34].mxu1  ;;  %v6683_v47 = vpack.c.bf16 %v6662_v21, %v6661_v11  ;;  %v7204_v11 = vrot.slane %v6746_v3, 3  ;;  %v6708_v27 = vld [vmem:[%s9791_s20 + $0x38] sm:$0xff] }
 0x445   : > { %v6631_v29 = vadd.f32 %v9085_v30, %v10577_v56  ;;  %v9087_v22 = vadd.f32 %v9052_v31, %v10461_v43  ;;  %v6434_v61 = vpop.f32.mrb[35].mxu1  ;;  %v6816_v43 = vlaneseq  ;;  %v7206_v30 = vrot.slane %v6747_v13, 3 }
 0x446   : > { %v6629_v35 = vadd.f32 %v9086_v9, %v10577_v56  ;;  %v9088_v37 = vadd.f32 %v6434_v61, %v10463_v48  ;;  %7009 = vmatmul.mubr.bf16.gmra.mrb[152].mxu0 %v10617_v12  ;;  %v6703_v48 = vld [vmem:[%s9791_s20 + $0x10] sm:$0xee]  ;;  %v7208_v31 = vrot.slane %v6748_v5, 3 }
 0x447   : > { %v6632_v19 = vadd.f32 %v9087_v22, %v10577_v56  ;;  %7018 = vmatprep.mubr.bf16.mxu0 %v9710_v1  ;;  %v6667_v42 = vmax.f32 %v6631_v29, 0.0  ;;  %v6817_v12 = vshrl.u32 %v6816_v43, 7  ;;  %v6741_v40 = vunpack.c.h.bf16 %v6703_v48  ;;  %v6709_v22 = vld [vmem:[%s9791_s20 + $0x40] sm:$0xff] }
 0x448   : > { %v6630_v38 = vadd.f32 %v9088_v37, %v10577_v56  ;;  %v6665_v23 = vmax.f32 %v6629_v35, 0.0  ;;  %v6704_v56 = vld [vmem:[%s9791_s20 + $0x18] sm:$0xff]  ;;  %v7210_v29 = vrot.slane %v6749_v24, 3  ;;  %v6752_v43 = vunpack.c.l.bf16 %v6709_v22 }
 0x449   : > { %v6668_v54 = vmax.f32 %v6632_v19, 0.0  ;;  %v6742_v60 = vunpack.c.l.bf16 %v6704_v56  ;;  %v6818_v50 = vsub.s32 0, %v6817_v12  ;;  %v6743_v62 = vunpack.c.h.bf16 %v6704_v56 }
 0x44a   : > { %v6666_v57 = vmax.f32 %v6630_v38, 0.0  ;;  %v6822_v46 = vsub.s32 1, %v6817_v12  ;;  %v7197_v63 = vrot.slane %v6741_v40, 3  ;;  %v6750_v19 = vunpack.c.l.bf16 %v6708_v27 }
 0x44b   : > { %v6686_v39 = vpack.c.bf16 %v6668_v54, %v6667_v42  ;;  %v7195_v26 = vrot.slane %v6742_v60, 3  ;;  %v7198_v33 = vrot.slane %v6743_v62, 3 }
 0x44c   : > { %v6685_v25 = vpack.c.bf16 %v6666_v57, %v6665_v23  ;;  %v6751_v23 = vunpack.c.h.bf16 %v6708_v27  ;;  %v7212_v40 = vrot.slane %v6750_v19, 3 }
 0x44e   : > { %7019 = vmatmul.mubr.bf16.gmra.mrb[156].mxu0 %v10633_v6  ;;  %v6740_v6 = vunpack.c.l.bf16 %v6703_v48  ;;  %v7213_v53 = vsel %vm6165_vm5, %v7208_v31, %v7212_v40 }
 0x44f   : > { %7028 = vmatprep.mubr.bf16.mxu0 %v9710_v1 }
 0x456   : > { %7029 = vmatmul.mubr.bf16.gmra.mrb[160].mxu0 %v10630_v20  ;;  %v6705_v20 = vld [vmem:[%s9791_s20 + $0x20] sm:$0xff] }
 0x457   : > { %7038 = vmatprep.mubr.bf16.mxu0 %v9710_v1  ;;  %v6745_v0 = vunpack.c.h.bf16 %v6705_v20 }
 0x459   : > { %v7202_v15 = vrot.slane %v6745_v0, 3 }
 0x45b   : > { %v7203_v44 = vsel %vm6165_vm5, %v7198_v33, %v7202_v15  ;;  %v7207_v54 = vsel %vm6165_vm5, %v7202_v15, %v7206_v30 }
 0x45e   : > { %7039 = vmatmul.mubr.bf16.gmra.mrb[164].mxu0 %v6679_v51  ;;  %v7194_v51 = vrot.slane %v6740_v6, 3  ;;  %v6753_v6 = vunpack.c.h.bf16 %v6709_v22 }
 0x45f   : > { %7048 = vmatprep.mubr.bf16.mxu0 %v9710_v1 }
 0x460   : > { %v7196_v34 = vsel %vm6165_vm5, %v7194_v51, %v7195_v26 }
 0x466   : > { %7049 = vmatmul.mubr.bf16.gmra.mrb[168].mxu0 %v10643_v2  ;;  %v6814_v2 = vld [vmem:[%s10962_s7] sm:$0x3] }
 0x467   : > { %7058 = vmatprep.mubr.bf16.mxu0 %v9710_v1  ;;  %v10692_v59 = vrot.slane %v6814_v2, %v6818_v50  ;;  %v10695_v7 = vrot.slane %v6814_v2, %v6822_v46  ;;  %v7214_v46 = vrot.slane %v6751_v23, 3 }
 0x46e   : > { %7059 = vmatmul.mubr.bf16.gmra.mrb[172].mxu0 %v6681_v10 }
 0x46f   : > { %7068 = vmatprep.mubr.bf16.mxu0 %v9710_v1 }
 0x476   : > { %7069 = vmatmul.mubr.bf16.gmra.mrb[176].mxu0 %v6682_v4  ;;  %v7199_v4 = vsel %vm6165_vm5, %v7197_v63, %v7198_v33  ;;  %v7218_v33 = vrot.slane %v6753_v6, 3 }
 0x477   : > { %7078 = vmatprep.mubr.bf16.mxu0 %v9710_v1 }
 0x47e   : > { %7079 = vmatmul.mubr.bf16.gmra.mrb[180].mxu0 %v6683_v47 }
 0x47f   : > { %7088 = vmatprep.mubr.bf16.mxu0 %v9710_v1 }
 0x486   : > { %7089 = vmatmul.mubr.bf16.gmra.mrb[184].mxu0 %v6684_v45 }
 0x487   : > { %7098 = vmatprep.mubr.bf16.mxu0 %v9710_v1 }
 0x48e   : > { %7099 = vmatmul.mubr.bf16.gmra.mrb[188].mxu0 %v6685_v25  ;;  %v7209_v25 = vsel %vm6165_vm5, %v7204_v11, %v7208_v31 }
 0x48f   : > { %7108 = vmatprep.mubr.bf16.mxu0 %v9710_v1  ;;  %v6744_v1 = vunpack.c.l.bf16 %v6705_v20  ;;  %v7211_v20 = vsel %vm6165_vm5, %v7206_v30, %v7210_v29 }
 0x491   : > { %v7200_v8 = vrot.slane %v6744_v1, 3  ;;  %v6710_v1 = vld [vmem:[%s9791_s20 + $0x48] sm:$0xff] }
 0x493   : > { %v7201_v58 = vsel %vm6165_vm5, %v7195_v26, %v7200_v8  ;;  %v7205_v37 = vsel %vm6165_vm5, %v7200_v8, %v7204_v11  ;;  %v7216_v26 = vrot.slane %v6752_v43, 3 }
 0x496   : > { %7109 = vmatmul.mubr.bf16.gmra.mrb[192].mxu0 %v6686_v39 }
 0x4e1   : > { %v6940_v55 = vpop.f32.mrb[124].mxu0 }
 0x4e2   : > { %v6941_v16 = vadd.f32 %v6940_v55, %v10692_v59  ;;  %v6942_v36 = vpop.f32.mrb[125].mxu0  ;;  %v6754_v55 = vunpack.c.l.bf16 %v6710_v1 }
 0x4e3   : > { %v6943_v17 = vadd.f32 %v6942_v36, %v10695_v7  ;;  %v6944_v10 = vpop.f32.mrb[126].mxu0  ;;  %v6755_v36 = vunpack.c.h.bf16 %v6710_v1 }
 0x4e4   : > { %v7412_v14 = vadd.f32 %v7196_v34, %v6941_v16  ;;  %v6945_v41 = vadd.f32 %v6944_v10, %v10692_v59  ;;  %v6946_v49 = vpop.f32.mrb[127].mxu0  ;;  %v7215_v16 = vsel %vm6165_vm5, %v7210_v29, %v7214_v46  ;;  %v6756_v10 = vunpack.c.l.bf16 %v6711_v52 }
 0x4e5   : > { %v7413_v28 = vadd.f32 %v7199_v4, %v6943_v17  ;;  %v6947_v18 = vadd.f32 %v6946_v49, %v10695_v7  ;;  %v7217_v17 = vsel %vm6165_vm5, %v7212_v40, %v7216_v26  ;;  %v6757_v49 = vunpack.c.h.bf16 %v6711_v52 }
 0x4e6   : > { %v7484_v21 = vmax.f32 %v7412_v14, 0.0  ;;  %v7414_v32 = vadd.f32 %v7201_v58, %v6945_v41  ;;  %v7219_v41 = vsel %vm6165_vm5, %v7214_v46, %v7218_v33 }
 0x4e7   : > { %v7485_v45 = vmax.f32 %v7413_v28, 0.0  ;;  %v7415_v9 = vadd.f32 %v7203_v44, %v6947_v18  ;;  %v7220_v28 = vrot.slane %v6754_v55, 3  ;;  %v7226_v31 = vrot.slane %v6757_v49, 3 }
 0x4e8   : > { %7556 = vst [vmem:[%s10709_s10] sm:$0xff] %v7484_v21  ;;  %v7486_v47 = vmax.f32 %v7414_v32, 0.0  ;;  %v7222_v21 = vrot.slane %v6755_v36, 3  ;;  %v6712_v32 = vld [vmem:[%s9791_s20 + $0x58] sm:$0xff] }
 0x4e9   : > { %7557 = vst [vmem:[%s10709_s10 + $0x8] sm:$0xff] %v7485_v45  ;;  %v7487_v61 = vmax.f32 %v7415_v9, 0.0  ;;  %v6950_v35 = vpop.f32.mrb[128].mxu0  ;;  %v7224_v45 = vrot.slane %v6756_v10, 3 }
 0x4ea   : > { %7558 = vst [vmem:[%s10709_s10 + $0x10] sm:$0xff] %v7486_v47  ;;  %v6951_v38 = vadd.f32 %v6950_v35, %v10692_v59  ;;  %v6952_v42 = vpop.f32.mrb[129].mxu0  ;;  %v6713_v47 = vld [vmem:[%s9791_s20 + $0x60] sm:$0xff]  ;;  %v6758_v35 = vunpack.c.l.bf16 %v6712_v32 }
 0x4eb   : > { %7559 = vst [vmem:[%s10709_s10 + $0x18] sm:$0xff] %v7487_v61  ;;  %v6953_v57 = vadd.f32 %v6952_v42, %v10695_v7  ;;  %v6954_v39 = vpop.f32.mrb[130].mxu0  ;;  %v7221_v61 = vsel %vm6165_vm5, %v7216_v26, %v7220_v28  ;;  %v6759_v42 = vunpack.c.h.bf16 %v6712_v32 }
 0x4ec   : > { %v7416_v48 = vadd.f32 %v7205_v37, %v6951_v38  ;;  %v6955_v56 = vadd.f32 %v6954_v39, %v10692_v59  ;;  %v6956_v12 = vpop.f32.mrb[131].mxu0  ;;  %v7223_v38 = vsel %vm6165_vm5, %v7218_v33, %v7222_v21  ;;  %v6760_v39 = vunpack.c.l.bf16 %v6713_v47 }
 0x4ed   : > { %v7417_v60 = vadd.f32 %v7207_v54, %v6953_v57  ;;  %v6957_v50 = vadd.f32 %v6956_v12, %v10695_v7  ;;  %v7225_v57 = vsel %vm6165_vm5, %v7220_v28, %v7224_v45  ;;  %v6761_v12 = vunpack.c.h.bf16 %v6713_v47 }
 0x4ee   : > { %v7488_v62 = vmax.f32 %v7416_v48, 0.0  ;;  %v7418_v2 = vadd.f32 %v7209_v25, %v6955_v56  ;;  %v7227_v56 = vsel %vm6165_vm5, %v7222_v21, %v7226_v31 }
 0x4ef   : > { %v7489_v0 = vmax.f32 %v7417_v60, 0.0  ;;  %v7419_v51 = vadd.f32 %v7211_v20, %v6957_v50  ;;  %v7228_v60 = vrot.slane %v6758_v35, 3  ;;  %v7234_v26 = vrot.slane %v6761_v12, 3 }
 0x4f0   : > { %7560 = vst [vmem:[%s10709_s10 + $0x20] sm:$0xff] %v7488_v62  ;;  %v7490_v63 = vmax.f32 %v7418_v2, 0.0  ;;  %v7230_v62 = vrot.slane %v6759_v42, 3  ;;  %v6714_v2 = vld [vmem:[%s9791_s20 + $0x68] sm:$0xff] }
 0x4f1   : > { %7561 = vst [vmem:[%s10709_s10 + $0x28] sm:$0xff] %v7489_v0  ;;  %v7491_v8 = vmax.f32 %v7419_v51, 0.0  ;;  %v6960_v15 = vpop.f32.mrb[132].mxu0  ;;  %v7232_v0 = vrot.slane %v6760_v39, 3 }
 0x4f2   : > { %7562 = vst [vmem:[%s10709_s10 + $0x30] sm:$0xff] %v7490_v63  ;;  %v6961_v34 = vadd.f32 %v6960_v15, %v10692_v59  ;;  %v6962_v3 = vpop.f32.mrb[133].mxu0  ;;  %v6715_v63 = vld [vmem:[%s9791_s20 + $0x70] sm:$0xff]  ;;  %v6762_v15 = vunpack.c.l.bf16 %v6714_v2 }
 0x4f3   : > { %7563 = vst [vmem:[%s10709_s10 + $0x38] sm:$0xff] %v7491_v8  ;;  %v6963_v4 = vadd.f32 %v6962_v3, %v10695_v7  ;;  %v6964_v13 = vpop.f32.mrb[134].mxu0  ;;  %v7229_v8 = vsel %vm6165_vm5, %v7224_v45, %v7228_v60  ;;  %v6763_v3 = vunpack.c.h.bf16 %v6714_v2 }
 0x4f4   : > { %v7420_v58 = vadd.f32 %v7213_v53, %v6961_v34  ;;  %v6965_v5 = vadd.f32 %v6964_v13, %v10692_v59  ;;  %v6966_v14 = vpop.f32.mrb[135].mxu0  ;;  %v7231_v34 = vsel %vm6165_vm5, %v7226_v31, %v7230_v62  ;;  %v6764_v13 = vunpack.c.l.bf16 %v6715_v63 }
 0x4f5   : > { %v7421_v44 = vadd.f32 %v7215_v16, %v6963_v4  ;;  %v6967_v24 = vadd.f32 %v6966_v14, %v10695_v7  ;;  %v7233_v4 = vsel %vm6165_vm5, %v7228_v60, %v7232_v0  ;;  %v6765_v14 = vunpack.c.h.bf16 %v6715_v63 }
 0x4f6   : > { %v7492_v18 = vmax.f32 %v7420_v58, 0.0  ;;  %v7422_v11 = vadd.f32 %v7217_v17, %v6965_v5  ;;  %v7235_v5 = vsel %vm6165_vm5, %v7230_v62, %v7234_v26 }
 0x4f7   : > { %v7493_v30 = vmax.f32 %v7421_v44, 0.0  ;;  %v7423_v27 = vadd.f32 %v7219_v41, %v6967_v24  ;;  %v7236_v44 = vrot.slane %v6762_v15, 3  ;;  %v7242_v45 = vrot.slane %v6765_v14, 3 }
 0x4f8   : > { %7564 = vst [vmem:[%s10709_s10 + $0x40] sm:$0xff] %v7492_v18  ;;  %v7494_v9 = vmax.f32 %v7422_v11, 0.0  ;;  %v7238_v18 = vrot.slane %v6763_v3, 3  ;;  %v6716_v11 = vld [vmem:[%s9791_s20 + $0x78] sm:$0xff] }
 0x4f9   : > { %7565 = vst [vmem:[%s10709_s10 + $0x48] sm:$0xff] %v7493_v30  ;;  %v7495_v29 = vmax.f32 %v7423_v27, 0.0  ;;  %v6970_v22 = vpop.f32.mrb[136].mxu0  ;;  %v7240_v30 = vrot.slane %v6764_v13, 3 }
 0x4fa   : > { %7566 = vst [vmem:[%s10709_s10 + $0x50] sm:$0xff] %v7494_v9  ;;  %v6971_v37 = vadd.f32 %v6970_v22, %v10692_v59  ;;  %v6972_v19 = vpop.f32.mrb[137].mxu0  ;;  %v6717_v9 = vld [vmem:[%s9791_s20 + $0x80] sm:$0xff]  ;;  %v6766_v22 = vunpack.c.l.bf16 %v6716_v11 }
 0x4fb   : > { %7567 = vst [vmem:[%s10709_s10 + $0x58] sm:$0xff] %v7495_v29  ;;  %v6973_v54 = vadd.f32 %v6972_v19, %v10695_v7  ;;  %v6974_v23 = vpop.f32.mrb[138].mxu0  ;;  %v7237_v29 = vsel %vm6165_vm5, %v7232_v0, %v7236_v44  ;;  %v6767_v19 = vunpack.c.h.bf16 %v6716_v11 }
 0x4fc   : > { %v7424_v25 = vadd.f32 %v7221_v61, %v6971_v37  ;;  %v6975_v43 = vadd.f32 %v6974_v23, %v10692_v59  ;;  %v6976_v48 = vpop.f32.mrb[139].mxu0  ;;  %v7239_v37 = vsel %vm6165_vm5, %v7234_v26, %v7238_v18  ;;  %v6768_v23 = vunpack.c.l.bf16 %v6717_v9 }
 0x4fd   : > { %v7425_v20 = vadd.f32 %v7223_v38, %v6973_v54  ;;  %v6977_v6 = vadd.f32 %v6976_v48, %v10695_v7  ;;  %v7241_v54 = vsel %vm6165_vm5, %v7236_v44, %v7240_v30  ;;  %v6769_v48 = vunpack.c.h.bf16 %v6717_v9 }
 0x4fe   : > { %v7496_v50 = vmax.f32 %v7424_v25, 0.0  ;;  %v7426_v40 = vadd.f32 %v7225_v57, %v6975_v43  ;;  %v7243_v43 = vsel %vm6165_vm5, %v7238_v18, %v7242_v45 }
 0x4ff   : > { %v7497_v46 = vmax.f32 %v7425_v20, 0.0  ;;  %v7427_v1 = vadd.f32 %v7227_v56, %v6977_v6  ;;  %v7244_v20 = vrot.slane %v6766_v22, 3  ;;  %v7250_v0 = vrot.slane %v6769_v48, 3 }
 0x500   : > { %7568 = vst [vmem:[%s10709_s10 + $0x60] sm:$0xff] %v7496_v50  ;;  %v7498_v51 = vmax.f32 %v7426_v40, 0.0  ;;  %v7246_v50 = vrot.slane %v6767_v19, 3  ;;  %v6718_v40 = vld [vmem:[%s9791_s20 + $0x88] sm:$0xff] }
 0x501   : > { %7569 = vst [vmem:[%s10709_s10 + $0x68] sm:$0xff] %v7497_v46  ;;  %v7499_v33 = vmax.f32 %v7427_v1, 0.0  ;;  %v6980_v52 = vpop.f32.mrb[140].mxu0  ;;  %v7248_v46 = vrot.slane %v6768_v23, 3 }
 0x502   : > { %7570 = vst [vmem:[%s10709_s10 + $0x70] sm:$0xff] %v7498_v51  ;;  %v6981_v53 = vadd.f32 %v6980_v52, %v10692_v59  ;;  %v6982_v55 = vpop.f32.mrb[141].mxu0  ;;  %v6719_v51 = vld [vmem:[%s9791_s20 + $0x90] sm:$0xff]  ;;  %v6770_v52 = vunpack.c.l.bf16 %v6718_v40 }
 0x503   : > { %7571 = vst [vmem:[%s10709_s10 + $0x78] sm:$0xff] %v7499_v33  ;;  %v6983_v16 = vadd.f32 %v6982_v55, %v10695_v7  ;;  %v6984_v36 = vpop.f32.mrb[142].mxu0  ;;  %v7245_v33 = vsel %vm6165_vm5, %v7240_v30, %v7244_v20  ;;  %v6771_v55 = vunpack.c.h.bf16 %v6718_v40 }
 0x504   : > { %v7428_v17 = vadd.f32 %v7229_v8, %v6981_v53  ;;  %v6985_v10 = vadd.f32 %v6984_v36, %v10692_v59  ;;  %v6986_v58 = vpop.f32.mrb[143].mxu0  ;;  %v7247_v53 = vsel %vm6165_vm5, %v7242_v45, %v7246_v50  ;;  %v6772_v36 = vunpack.c.l.bf16 %v6719_v51 }
 0x505   : > { %v7429_v41 = vadd.f32 %v7231_v34, %v6983_v16  ;;  %v6987_v49 = vadd.f32 %v6986_v58, %v10695_v7  ;;  %v7249_v16 = vsel %vm6165_vm5, %v7244_v20, %v7248_v46  ;;  %v6773_v58 = vunpack.c.h.bf16 %v6719_v51 }
 0x506   : > { %v7500_v24 = vmax.f32 %v7428_v17, 0.0  ;;  %v7430_v28 = vadd.f32 %v7233_v4, %v6985_v10  ;;  %v7251_v10 = vsel %vm6165_vm5, %v7246_v50, %v7250_v0 }
 0x507   : > { %v7501_v21 = vmax.f32 %v7429_v41, 0.0  ;;  %v7431_v32 = vadd.f32 %v7235_v5, %v6987_v49  ;;  %v7252_v41 = vrot.slane %v6770_v52, 3  ;;  %v7258_v30 = vrot.slane %v6773_v58, 3 }
 0x508   : > { %7572 = vst [vmem:[%s10709_s10 + $0x80] sm:$0xff] %v7500_v24  ;;  %v7502_v27 = vmax.f32 %v7430_v28, 0.0  ;;  %v7254_v24 = vrot.slane %v6771_v55, 3  ;;  %v6720_v28 = vld [vmem:[%s9791_s20 + $0x98] sm:$0xff] }
 0x509   : > { %7573 = vst [vmem:[%s10709_s10 + $0x88] sm:$0xff] %v7501_v21  ;;  %v7503_v31 = vmax.f32 %v7431_v32, 0.0  ;;  %v6990_v47 = vpop.f32.mrb[144].mxu0  ;;  %v7256_v21 = vrot.slane %v6772_v36, 3 }
 0x50a   : > { %7574 = vst [vmem:[%s10709_s10 + $0x90] sm:$0xff] %v7502_v27  ;;  %v6991_v61 = vadd.f32 %v6990_v47, %v10692_v59  ;;  %v6992_v35 = vpop.f32.mrb[145].mxu0  ;;  %v6721_v27 = vld [vmem:[%s9791_s20 + $0xa0] sm:$0xff]  ;;  %v6774_v47 = vunpack.c.l.bf16 %v6720_v28 }
 0x50b   : > { %7575 = vst [vmem:[%s10709_s10 + $0x98] sm:$0xff] %v7503_v31  ;;  %v6993_v38 = vadd.f32 %v6992_v35, %v10695_v7  ;;  %v6994_v42 = vpop.f32.mrb[146].mxu0  ;;  %v7253_v31 = vsel %vm6165_vm5, %v7248_v46, %v7252_v41  ;;  %v6775_v35 = vunpack.c.h.bf16 %v6720_v28 }
 0x50c   : > { %v7432_v57 = vadd.f32 %v7237_v29, %v6991_v61  ;;  %v6995_v39 = vadd.f32 %v6994_v42, %v10692_v59  ;;  %v6996_v25 = vpop.f32.mrb[147].mxu0  ;;  %v7255_v61 = vsel %vm6165_vm5, %v7250_v0, %v7254_v24  ;;  %v6776_v42 = vunpack.c.l.bf16 %v6721_v27 }
 0x50d   : > { %v7433_v56 = vadd.f32 %v7239_v37, %v6993_v38  ;;  %v6997_v12 = vadd.f32 %v6996_v25, %v10695_v7  ;;  %v7257_v38 = vsel %vm6165_vm5, %v7252_v41, %v7256_v21  ;;  %v6777_v25 = vunpack.c.h.bf16 %v6721_v27 }
 0x50e   : > { %v7504_v6 = vmax.f32 %v7432_v57, 0.0  ;;  %v7434_v60 = vadd.f32 %v7241_v54, %v6995_v39  ;;  %v7259_v39 = vsel %vm6165_vm5, %v7254_v24, %v7258_v30 }
 0x50f   : > { %v7505_v62 = vmax.f32 %v7433_v56, 0.0  ;;  %v7435_v2 = vadd.f32 %v7243_v43, %v6997_v12  ;;  %v7260_v56 = vrot.slane %v6774_v47, 3  ;;  %v7266_v46 = vrot.slane %v6777_v25, 3 }
 0x510   : > { %7576 = vst [vmem:[%s10709_s10 + $0xa0] sm:$0xff] %v7504_v6  ;;  %v7506_v1 = vmax.f32 %v7434_v60, 0.0  ;;  %v7262_v6 = vrot.slane %v6775_v35, 3  ;;  %v6722_v60 = vld [vmem:[%s9791_s20 + $0xa8] sm:$0xff] }
 0x511   : > { %7577 = vst [vmem:[%s10709_s10 + $0xa8] sm:$0xff] %v7505_v62  ;;  %v7507_v26 = vmax.f32 %v7435_v2, 0.0  ;;  %v7000_v63 = vpop.f32.mrb[148].mxu0  ;;  %v7264_v62 = vrot.slane %v6776_v42, 3 }
 0x512   : > { %7578 = vst [vmem:[%s10709_s10 + $0xb0] sm:$0xff] %v7506_v1  ;;  %v7001_v8 = vadd.f32 %v7000_v63, %v10692_v59  ;;  %v7002_v15 = vpop.f32.mrb[149].mxu0  ;;  %v6723_v1 = vld [vmem:[%s9791_s20 + $0xb0] sm:$0xff]  ;;  %v6778_v63 = vunpack.c.l.bf16 %v6722_v60 }
 0x513   : > { %7579 = vst [vmem:[%s10709_s10 + $0xb8] sm:$0xff] %v7507_v26  ;;  %v7003_v34 = vadd.f32 %v7002_v15, %v10695_v7  ;;  %v7004_v3 = vpop.f32.mrb[150].mxu0  ;;  %v7261_v26 = vsel %vm6165_vm5, %v7256_v21, %v7260_v56  ;;  %v6779_v15 = vunpack.c.h.bf16 %v6722_v60 }
 0x514   : > { %v7436_v4 = vadd.f32 %v7245_v33, %v7001_v8  ;;  %v7005_v13 = vadd.f32 %v7004_v3, %v10692_v59  ;;  %v7006_v17 = vpop.f32.mrb[151].mxu0  ;;  %v7263_v8 = vsel %vm6165_vm5, %v7258_v30, %v7262_v6  ;;  %v6780_v3 = vunpack.c.l.bf16 %v6723_v1 }
 0x515   : > { %v7437_v5 = vadd.f32 %v7247_v53, %v7003_v34  ;;  %v7007_v14 = vadd.f32 %v7006_v17, %v10695_v7  ;;  %v7265_v34 = vsel %vm6165_vm5, %v7260_v56, %v7264_v62  ;;  %v6781_v17 = vunpack.c.h.bf16 %v6723_v1 }
 0x516   : > { %v7508_v49 = vmax.f32 %v7436_v4, 0.0  ;;  %v7438_v44 = vadd.f32 %v7249_v16, %v7005_v13  ;;  %v7267_v13 = vsel %vm6165_vm5, %v7262_v6, %v7266_v46 }
 0x517   : > { %v7509_v18 = vmax.f32 %v7437_v5, 0.0  ;;  %v7439_v11 = vadd.f32 %v7251_v10, %v7007_v14  ;;  %v7268_v5 = vrot.slane %v6778_v63, 3  ;;  %v7274_v21 = vrot.slane %v6781_v17, 3 }
 0x518   : > { %7580 = vst [vmem:[%s10709_s10 + $0xc0] sm:$0xff] %v7508_v49  ;;  %v7510_v32 = vmax.f32 %v7438_v44, 0.0  ;;  %v7270_v49 = vrot.slane %v6779_v15, 3  ;;  %v6724_v44 = vld [vmem:[%s9791_s20 + $0xb8] sm:$0xff] }
 0x519   : > { %7581 = vst [vmem:[%s10709_s10 + $0xc8] sm:$0xff] %v7509_v18  ;;  %v7511_v45 = vmax.f32 %v7439_v11, 0.0  ;;  %v7010_v9 = vpop.f32.mrb[152].mxu0  ;;  %v7272_v18 = vrot.slane %v6780_v3, 3 }
 0x51a   : > { %7582 = vst [vmem:[%s10709_s10 + $0xd0] sm:$0xff] %v7510_v32  ;;  %v7011_v29 = vadd.f32 %v7010_v9, %v10692_v59  ;;  %v7012_v22 = vpop.f32.mrb[153].mxu0  ;;  %v6725_v32 = vld [vmem:[%s9791_s20 + $0xc0] sm:$0xff]  ;;  %v6782_v9 = vunpack.c.l.bf16 %v6724_v44 }
 0x51b   : > { %7583 = vst [vmem:[%s10709_s10 + $0xd8] sm:$0xff] %v7511_v45  ;;  %v7013_v37 = vadd.f32 %v7012_v22, %v10695_v7  ;;  %v7014_v19 = vpop.f32.mrb[154].mxu0  ;;  %v7269_v45 = vsel %vm6165_vm5, %v7264_v62, %v7268_v5  ;;  %v6783_v22 = vunpack.c.h.bf16 %v6724_v44 }
 0x51c   : > { %v7440_v54 = vadd.f32 %v7253_v31, %v7011_v29  ;;  %v7015_v23 = vadd.f32 %v7014_v19, %v10692_v59  ;;  %v7016_v57 = vpop.f32.mrb[155].mxu0  ;;  %v7271_v29 = vsel %vm6165_vm5, %v7266_v46, %v7270_v49  ;;  %v6784_v19 = vunpack.c.l.bf16 %v6725_v32 }
 0x51d   : > { %v7441_v43 = vadd.f32 %v7255_v61, %v7013_v37  ;;  %v7017_v48 = vadd.f32 %v7016_v57, %v10695_v7  ;;  %v7273_v37 = vsel %vm6165_vm5, %v7268_v5, %v7272_v18  ;;  %v6785_v57 = vunpack.c.h.bf16 %v6725_v32 }
 0x51e   : > { %v7512_v12 = vmax.f32 %v7440_v54, 0.0  ;;  %v7442_v20 = vadd.f32 %v7257_v38, %v7015_v23  ;;  %v7275_v23 = vsel %vm6165_vm5, %v7270_v49, %v7274_v21 }
 0x51f   : > { %v7513_v50 = vmax.f32 %v7441_v43, 0.0  ;;  %v7443_v40 = vadd.f32 %v7259_v39, %v7017_v48  ;;  %v7276_v43 = vrot.slane %v6782_v9, 3  ;;  %v7282_v62 = vrot.slane %v6785_v57, 3 }
 0x520   : > { %7584 = vst [vmem:[%s10709_s10 + $0xe0] sm:$0xff] %v7512_v12  ;;  %v7514_v2 = vmax.f32 %v7442_v20, 0.0  ;;  %v7278_v12 = vrot.slane %v6783_v22, 3  ;;  %v6726_v20 = vld [vmem:[%s9791_s20 + $0xc8] sm:$0xff] }
 0x521   : > { %7585 = vst [vmem:[%s10709_s10 + $0xe8] sm:$0xff] %v7513_v50  ;;  %v7515_v0 = vmax.f32 %v7443_v40, 0.0  ;;  %v7020_v51 = vpop.f32.mrb[156].mxu0  ;;  %v7280_v50 = vrot.slane %v6784_v19, 3 }
 0x522   : > { %7586 = vst [vmem:[%s10709_s10 + $0xf0] sm:$0xff] %v7514_v2  ;;  %v7021_v33 = vadd.f32 %v7020_v51, %v10692_v59  ;;  %v7022_v52 = vpop.f32.mrb[157].mxu0  ;;  %v6727_v2 = vld [vmem:[%s9791_s20 + $0xd0] sm:$0xff]  ;;  %v6786_v51 = vunpack.c.l.bf16 %v6726_v20 }
 0x523   : > { %7587 = vst [vmem:[%s10709_s10 + $0xf8] sm:$0xff] %v7515_v0  ;;  %v7023_v53 = vadd.f32 %v7022_v52, %v10695_v7  ;;  %v7024_v55 = vpop.f32.mrb[158].mxu0  ;;  %v7277_v0 = vsel %vm6165_vm5, %v7272_v18, %v7276_v43  ;;  %v6787_v52 = vunpack.c.h.bf16 %v6726_v20 }
 0x524   : > { %v7444_v16 = vadd.f32 %v7261_v26, %v7021_v33  ;;  %v7025_v36 = vadd.f32 %v7024_v55, %v10692_v59  ;;  %v7026_v4 = vpop.f32.mrb[159].mxu0  ;;  %v7279_v33 = vsel %vm6165_vm5, %v7274_v21, %v7278_v12  ;;  %v6788_v55 = vunpack.c.l.bf16 %v6727_v2 }
 0x525   : > { %v7445_v10 = vadd.f32 %v7263_v8, %v7023_v53  ;;  %v7027_v58 = vadd.f32 %v7026_v4, %v10695_v7  ;;  %v7281_v53 = vsel %vm6165_vm5, %v7276_v43, %v7280_v50  ;;  %v6789_v4 = vunpack.c.h.bf16 %v6727_v2 }
 0x526   : > { %v7516_v14 = vmax.f32 %v7444_v16, 0.0  ;;  %v7446_v41 = vadd.f32 %v7265_v34, %v7025_v36  ;;  %v7283_v36 = vsel %vm6165_vm5, %v7278_v12, %v7282_v62 }
 0x527   : > { %v7517_v24 = vmax.f32 %v7445_v10, 0.0  ;;  %v7447_v28 = vadd.f32 %v7267_v13, %v7027_v58  ;;  %v7284_v10 = vrot.slane %v6786_v51, 3  ;;  %v7290_v18 = vrot.slane %v6789_v4, 3 }
 0x528   : > { %7588 = vst [vmem:[%s10709_s10 + $0x100] sm:$0xff] %v7516_v14  ;;  %v7518_v11 = vmax.f32 %v7446_v41, 0.0  ;;  %v7286_v14 = vrot.slane %v6787_v52, 3  ;;  %v6728_v41 = vld [vmem:[%s9791_s20 + $0xd8] sm:$0xff] }
 0x529   : > { %7589 = vst [vmem:[%s10709_s10 + $0x108] sm:$0xff] %v7517_v24  ;;  %v7519_v30 = vmax.f32 %v7447_v28, 0.0  ;;  %v7030_v27 = vpop.f32.mrb[160].mxu0  ;;  %v7288_v24 = vrot.slane %v6788_v55, 3 }
 0x52a   : > { %7590 = vst [vmem:[%s10709_s10 + $0x110] sm:$0xff] %v7518_v11  ;;  %v7031_v31 = vadd.f32 %v7030_v27, %v10692_v59  ;;  %v7032_v47 = vpop.f32.mrb[161].mxu0  ;;  %v6729_v11 = vld [vmem:[%s9791_s20 + $0xe0] sm:$0xff]  ;;  %v6790_v27 = vunpack.c.l.bf16 %v6728_v41 }
 0x52b   : > { %7591 = vst [vmem:[%s10709_s10 + $0x118] sm:$0xff] %v7519_v30  ;;  %v7033_v61 = vadd.f32 %v7032_v47, %v10695_v7  ;;  %v7034_v35 = vpop.f32.mrb[162].mxu0  ;;  %v7285_v30 = vsel %vm6165_vm5, %v7280_v50, %v7284_v10  ;;  %v6791_v47 = vunpack.c.h.bf16 %v6728_v41 }
 0x52c   : > { %v7448_v38 = vadd.f32 %v7269_v45, %v7031_v31  ;;  %v7035_v42 = vadd.f32 %v7034_v35, %v10692_v59  ;;  %v7036_v54 = vpop.f32.mrb[163].mxu0  ;;  %v7287_v31 = vsel %vm6165_vm5, %v7282_v62, %v7286_v14  ;;  %v6792_v35 = vunpack.c.l.bf16 %v6729_v11 }
 0x52d   : > { %v7449_v39 = vadd.f32 %v7271_v29, %v7033_v61  ;;  %v7037_v25 = vadd.f32 %v7036_v54, %v10695_v7  ;;  %v7289_v61 = vsel %vm6165_vm5, %v7284_v10, %v7288_v24  ;;  %v6793_v54 = vunpack.c.h.bf16 %v6729_v11 }
 0x52e   : > { %v7520_v48 = vmax.f32 %v7448_v38, 0.0  ;;  %v7450_v56 = vadd.f32 %v7273_v37, %v7035_v42  ;;  %v7291_v42 = vsel %vm6165_vm5, %v7286_v14, %v7290_v18 }
 0x52f   : > { %v7521_v6 = vmax.f32 %v7449_v39, 0.0  ;;  %v7451_v60 = vadd.f32 %v7275_v23, %v7037_v25  ;;  %v7292_v39 = vrot.slane %v6790_v27, 3  ;;  %v7298_v50 = vrot.slane %v6793_v54, 3 }
 0x530   : > { %7592 = vst [vmem:[%s10709_s10 + $0x120] sm:$0xff] %v7520_v48  ;;  %v7522_v40 = vmax.f32 %v7450_v56, 0.0  ;;  %v7294_v48 = vrot.slane %v6791_v47, 3  ;;  %v6730_v56 = vld [vmem:[%s9791_s20 + $0xe8] sm:$0xff] }
 0x531   : > { %7593 = vst [vmem:[%s10709_s10 + $0x128] sm:$0xff] %v7521_v6  ;;  %v7523_v46 = vmax.f32 %v7451_v60, 0.0  ;;  %v7040_v1 = vpop.f32.mrb[164].mxu0  ;;  %v7296_v6 = vrot.slane %v6792_v35, 3 }
 0x532   : > { %7594 = vst [vmem:[%s10709_s10 + $0x130] sm:$0xff] %v7522_v40  ;;  %v7041_v26 = vadd.f32 %v7040_v1, %v10692_v59  ;;  %v7042_v63 = vpop.f32.mrb[165].mxu0  ;;  %v6731_v40 = vld [vmem:[%s9791_s20 + $0xf0] sm:$0xff]  ;;  %v6794_v1 = vunpack.c.l.bf16 %v6730_v56 }
 0x533   : > { %7595 = vst [vmem:[%s10709_s10 + $0x138] sm:$0xff] %v7523_v46  ;;  %v7043_v8 = vadd.f32 %v7042_v63, %v10695_v7  ;;  %v7044_v15 = vpop.f32.mrb[166].mxu0  ;;  %v7293_v46 = vsel %vm6165_vm5, %v7288_v24, %v7292_v39  ;;  %v6795_v63 = vunpack.c.h.bf16 %v6730_v56 }
 0x534   : > { %v7452_v34 = vadd.f32 %v7277_v0, %v7041_v26  ;;  %v7045_v3 = vadd.f32 %v7044_v15, %v10692_v59  ;;  %v7046_v16 = vpop.f32.mrb[167].mxu0  ;;  %v7295_v26 = vsel %vm6165_vm5, %v7290_v18, %v7294_v48  ;;  %v6796_v15 = vunpack.c.l.bf16 %v6731_v40 }
 0x535   : > { %v7453_v13 = vadd.f32 %v7279_v33, %v7043_v8  ;;  %v7047_v17 = vadd.f32 %v7046_v16, %v10695_v7  ;;  %v7297_v8 = vsel %vm6165_vm5, %v7292_v39, %v7296_v6  ;;  %v6797_v16 = vunpack.c.h.bf16 %v6731_v40 }
 0x536   : > { %v7524_v58 = vmax.f32 %v7452_v34, 0.0  ;;  %v7454_v5 = vadd.f32 %v7281_v53, %v7045_v3  ;;  %v7299_v3 = vsel %vm6165_vm5, %v7294_v48, %v7298_v50 }
 0x537   : > { %v7525_v49 = vmax.f32 %v7453_v13, 0.0  ;;  %v7455_v44 = vadd.f32 %v7283_v36, %v7047_v17  ;;  %v7300_v13 = vrot.slane %v6794_v1, 3  ;;  %v7306_v24 = vrot.slane %v6797_v16, 3 }
 0x538   : > { %7596 = vst [vmem:[%s10709_s10 + $0x140] sm:$0xff] %v7524_v58  ;;  %v7526_v28 = vmax.f32 %v7454_v5, 0.0  ;;  %v7302_v58 = vrot.slane %v6795_v63, 3  ;;  %v6732_v5 = vld [vmem:[%s9791_s20 + $0xf8] sm:$0xff] }
 0x539   : > { %7597 = vst [vmem:[%s10709_s10 + $0x148] sm:$0xff] %v7525_v49  ;;  %v7527_v21 = vmax.f32 %v7455_v44, 0.0  ;;  %v7050_v32 = vpop.f32.mrb[168].mxu0  ;;  %v7304_v49 = vrot.slane %v6796_v15, 3 }
 0x53a   : > { %7598 = vst [vmem:[%s10709_s10 + $0x150] sm:$0xff] %v7526_v28  ;;  %v7051_v45 = vadd.f32 %v7050_v32, %v10692_v59  ;;  %v7052_v9 = vpop.f32.mrb[169].mxu0  ;;  %v6733_v28 = vld [vmem:[%s9791_s20 + $0x100] sm:$0xff]  ;;  %v6798_v32 = vunpack.c.l.bf16 %v6732_v5 }
 0x53b   : > { %7599 = vst [vmem:[%s10709_s10 + $0x158] sm:$0xff] %v7527_v21  ;;  %v7053_v29 = vadd.f32 %v7052_v9, %v10695_v7  ;;  %v7054_v22 = vpop.f32.mrb[170].mxu0  ;;  %v7301_v21 = vsel %vm6165_vm5, %v7296_v6, %v7300_v13  ;;  %v6799_v9 = vunpack.c.h.bf16 %v6732_v5 }
 0x53c   : > { %v7456_v37 = vadd.f32 %v7285_v30, %v7051_v45  ;;  %v7055_v19 = vadd.f32 %v7054_v22, %v10692_v59  ;;  %v7056_v38 = vpop.f32.mrb[171].mxu0  ;;  %v7303_v45 = vsel %vm6165_vm5, %v7298_v50, %v7302_v58  ;;  %v6800_v22 = vunpack.c.l.bf16 %v6733_v28 }
 0x53d   : > { %v7457_v23 = vadd.f32 %v7287_v31, %v7053_v29  ;;  %v7057_v57 = vadd.f32 %v7056_v38, %v10695_v7  ;;  %v7305_v29 = vsel %vm6165_vm5, %v7300_v13, %v7304_v49  ;;  %v6801_v38 = vunpack.c.h.bf16 %v6733_v28 }
 0x53e   : > { %v7528_v25 = vmax.f32 %v7456_v37, 0.0  ;;  %v7458_v43 = vadd.f32 %v7289_v61, %v7055_v19  ;;  %v7307_v19 = vsel %vm6165_vm5, %v7302_v58, %v7306_v24 }
 0x53f   : > { %v7529_v12 = vmax.f32 %v7457_v23, 0.0  ;;  %v7459_v20 = vadd.f32 %v7291_v42, %v7057_v57  ;;  %v7308_v23 = vrot.slane %v6798_v32, 3  ;;  %v7314_v6 = vrot.slane %v6801_v38, 3 }
 0x540   : > { %7600 = vst [vmem:[%s10709_s10 + $0x160] sm:$0xff] %v7528_v25  ;;  %v7530_v60 = vmax.f32 %v7458_v43, 0.0  ;;  %v7310_v25 = vrot.slane %v6799_v9, 3  ;;  %v6734_v43 = vld [vmem:[%s9791_s20 + $0x108] sm:$0xff] }
 0x541   : > { %7601 = vst [vmem:[%s10709_s10 + $0x168] sm:$0xff] %v7529_v12  ;;  %v7531_v62 = vmax.f32 %v7459_v20, 0.0  ;;  %v7060_v2 = vpop.f32.mrb[172].mxu0  ;;  %v7312_v12 = vrot.slane %v6800_v22, 3 }
 0x542   : > { %7602 = vst [vmem:[%s10709_s10 + $0x170] sm:$0xff] %v7530_v60  ;;  %v7061_v0 = vadd.f32 %v7060_v2, %v10692_v59  ;;  %v7062_v51 = vpop.f32.mrb[173].mxu0  ;;  %v6735_v60 = vld [vmem:[%s9791_s20 + $0x110] sm:$0xff]  ;;  %v6802_v2 = vunpack.c.l.bf16 %v6734_v43 }
 0x543   : > { %7603 = vst [vmem:[%s10709_s10 + $0x178] sm:$0xff] %v7531_v62  ;;  %v7063_v33 = vadd.f32 %v7062_v51, %v10695_v7  ;;  %v7064_v52 = vpop.f32.mrb[174].mxu0  ;;  %v7309_v62 = vsel %vm6165_vm5, %v7304_v49, %v7308_v23  ;;  %v6803_v51 = vunpack.c.h.bf16 %v6734_v43 }
 0x544   : > { %v7460_v53 = vadd.f32 %v7293_v46, %v7061_v0  ;;  %v7065_v55 = vadd.f32 %v7064_v52, %v10692_v59  ;;  %v7066_v34 = vpop.f32.mrb[175].mxu0  ;;  %v7311_v0 = vsel %vm6165_vm5, %v7306_v24, %v7310_v25  ;;  %v6804_v52 = vunpack.c.l.bf16 %v6735_v60 }
 0x545   : > { %v7461_v36 = vadd.f32 %v7295_v26, %v7063_v33  ;;  %v7067_v4 = vadd.f32 %v7066_v34, %v10695_v7  ;;  %v7313_v33 = vsel %vm6165_vm5, %v7308_v23, %v7312_v12  ;;  %v6805_v34 = vunpack.c.h.bf16 %v6735_v60 }
 0x546   : > { %v7532_v17 = vmax.f32 %v7460_v53, 0.0  ;;  %v7462_v10 = vadd.f32 %v7297_v8, %v7065_v55  ;;  %v7315_v55 = vsel %vm6165_vm5, %v7310_v25, %v7314_v6 }
 0x547   : > { %v7533_v14 = vmax.f32 %v7461_v36, 0.0  ;;  %v7463_v41 = vadd.f32 %v7299_v3, %v7067_v4  ;;  %v7316_v36 = vrot.slane %v6802_v2, 3  ;;  %v7322_v49 = vrot.slane %v6805_v34, 3 }
 0x548   : > { %7604 = vst [vmem:[%s10709_s10 + $0x180] sm:$0xff] %v7532_v17  ;;  %v7534_v44 = vmax.f32 %v7462_v10, 0.0  ;;  %v7318_v17 = vrot.slane %v6803_v51, 3  ;;  %v6736_v10 = vld [vmem:[%s9791_s20 + $0x118] sm:$0xff] }
 0x549   : > { %7605 = vst [vmem:[%s10709_s10 + $0x188] sm:$0xff] %v7533_v14  ;;  %v7535_v18 = vmax.f32 %v7463_v41, 0.0  ;;  %v7070_v11 = vpop.f32.mrb[176].mxu0  ;;  %v7320_v14 = vrot.slane %v6804_v52, 3 }
 0x54a   : > { %7606 = vst [vmem:[%s10709_s10 + $0x190] sm:$0xff] %v7534_v44  ;;  %v7071_v30 = vadd.f32 %v7070_v11, %v10692_v59  ;;  %v7072_v27 = vpop.f32.mrb[177].mxu0  ;;  %v6737_v44 = vld [vmem:[%s9791_s20 + $0x120] sm:$0xff]  ;;  %v6806_v11 = vunpack.c.l.bf16 %v6736_v10 }
 0x54b   : > { %7607 = vst [vmem:[%s10709_s10 + $0x198] sm:$0xff] %v7535_v18  ;;  %v7073_v31 = vadd.f32 %v7072_v27, %v10695_v7  ;;  %v7074_v47 = vpop.f32.mrb[178].mxu0  ;;  %v7317_v18 = vsel %vm6165_vm5, %v7312_v12, %v7316_v36  ;;  %v6807_v27 = vunpack.c.h.bf16 %v6736_v10 }
 0x54c   : > { %v7464_v61 = vadd.f32 %v7301_v21, %v7071_v30  ;;  %v7075_v35 = vadd.f32 %v7074_v47, %v10692_v59  ;;  %v7076_v37 = vpop.f32.mrb[179].mxu0  ;;  %v7319_v30 = vsel %vm6165_vm5, %v7314_v6, %v7318_v17  ;;  %v6808_v47 = vunpack.c.l.bf16 %v6737_v44 }
 0x54d   : > { %v7465_v42 = vadd.f32 %v7303_v45, %v7073_v31  ;;  %v7077_v54 = vadd.f32 %v7076_v37, %v10695_v7  ;;  %v7321_v31 = vsel %vm6165_vm5, %v7316_v36, %v7320_v14  ;;  %v6809_v37 = vunpack.c.h.bf16 %v6737_v44 }
 0x54e   : > { %v7536_v57 = vmax.f32 %v7464_v61, 0.0  ;;  %v7466_v39 = vadd.f32 %v7305_v29, %v7075_v35  ;;  %v7323_v35 = vsel %vm6165_vm5, %v7318_v17, %v7322_v49 }
 0x54f   : > { %v7537_v48 = vmax.f32 %v7465_v42, 0.0  ;;  %v7467_v56 = vadd.f32 %v7307_v19, %v7077_v54  ;;  %v7324_v42 = vrot.slane %v6806_v11, 3  ;;  %v7330_v12 = vrot.slane %v6809_v37, 3 }
 0x550   : > { %7608 = vst [vmem:[%s10709_s10 + $0x1a0] sm:$0xff] %v7536_v57  ;;  %v7538_v20 = vmax.f32 %v7466_v39, 0.0  ;;  %v7326_v57 = vrot.slane %v6807_v27, 3  ;;  %v6738_v39 = vld [vmem:[%s9791_s20 + $0x128] sm:$0xff] }
 0x551   : > { %7609 = vst [vmem:[%s10709_s10 + $0x1a8] sm:$0xff] %v7537_v48  ;;  %v7539_v50 = vmax.f32 %v7467_v56, 0.0  ;;  %v7080_v40 = vpop.f32.mrb[180].mxu0  ;;  %v7328_v48 = vrot.slane %v6808_v47, 3 }
 0x552   : > { %7610 = vst [vmem:[%s10709_s10 + $0x1b0] sm:$0xff] %v7538_v20  ;;  %v7081_v46 = vadd.f32 %v7080_v40, %v10692_v59  ;;  %v7082_v1 = vpop.f32.mrb[181].mxu0  ;;  %v6739_v20 = vld [vmem:[%s9791_s20 + $0x130] sm:$0x33]  ;;  %v6810_v40 = vunpack.c.l.bf16 %v6738_v39 }
 0x553   : > { %7611 = vst [vmem:[%s10709_s10 + $0x1b8] sm:$0xff] %v7539_v50  ;;  %v7083_v26 = vadd.f32 %v7082_v1, %v10695_v7  ;;  %v7084_v63 = vpop.f32.mrb[182].mxu0  ;;  %v7325_v50 = vsel %vm6165_vm5, %v7320_v14, %v7324_v42  ;;  %v6811_v1 = vunpack.c.h.bf16 %v6738_v39 }
 0x554   : > { %v7468_v8 = vadd.f32 %v7309_v62, %v7081_v46  ;;  %v7085_v15 = vadd.f32 %v7084_v63, %v10692_v59  ;;  %v7086_v53 = vpop.f32.mrb[183].mxu0  ;;  %v7327_v46 = vsel %vm6165_vm5, %v7322_v49, %v7326_v57  ;;  %v6812_v63 = vunpack.c.l.bf16 %v6739_v20 }
 0x555   : > { %v7469_v3 = vadd.f32 %v7311_v0, %v7083_v26  ;;  %v7087_v16 = vadd.f32 %v7086_v53, %v10695_v7  ;;  %v7329_v26 = vsel %vm6165_vm5, %v7324_v42, %v7328_v48  ;;  %v6813_v53 = vunpack.c.h.bf16 %v6739_v20 }
 0x556   : > { %v7540_v4 = vmax.f32 %v7468_v8, 0.0  ;;  %v7470_v13 = vadd.f32 %v7313_v33, %v7085_v15  ;;  %v7331_v15 = vsel %vm6165_vm5, %v7326_v57, %v7330_v12  ;;  %v7336_v10 = vrot.slane %v6812_v63, 3 }
 0x557   : > { %v7541_v58 = vmax.f32 %v7469_v3, 0.0  ;;  %v7471_v5 = vadd.f32 %v7315_v55, %v7087_v16  ;;  %v7332_v3 = vrot.slane %v6810_v40, 3 }
 0x558   : > { %7612 = vst [vmem:[%s10709_s10 + $0x1c0] sm:$0xff] %v7540_v4  ;;  %v7542_v41 = vmax.f32 %v7470_v13, 0.0  ;;  %v7334_v4 = vrot.slane %v6811_v1, 3 }
 0x559   : > { %7613 = vst [vmem:[%s10709_s10 + $0x1c8] sm:$0xff] %v7541_v58  ;;  %v7543_v24 = vmax.f32 %v7471_v5, 0.0  ;;  %v7090_v28 = vpop.f32.mrb[184].mxu0  ;;  %v7338_v5 = vrot.slane %v6813_v53, 3  ;;  %v7333_v49 = vsel %vm6165_vm5, %v7328_v48, %v7332_v3 }
 0x55a   : > { %7614 = vst [vmem:[%s10709_s10 + $0x1d0] sm:$0xff] %v7542_v41  ;;  %v7091_v21 = vadd.f32 %v7090_v28, %v10692_v59  ;;  %v7092_v32 = vpop.f32.mrb[185].mxu0  ;;  %v7335_v28 = vsel %vm6165_vm5, %v7330_v12, %v7334_v4 }
 0x55b   : > { %7615 = vst [vmem:[%s10709_s10 + $0x1d8] sm:$0xff] %v7543_v24  ;;  %v7093_v45 = vadd.f32 %v7092_v32, %v10695_v7  ;;  %v7094_v9 = vpop.f32.mrb[186].mxu0 }
 0x55c   : > { %v7472_v29 = vadd.f32 %v7317_v18, %v7091_v21  ;;  %v7095_v22 = vadd.f32 %v7094_v9, %v10692_v59  ;;  %v7096_v61 = vpop.f32.mrb[187].mxu0  ;;  %v7337_v21 = vsel %vm6165_vm5, %v7332_v3, %v7336_v10 }
 0x55d   : > { %v7473_v19 = vadd.f32 %v7319_v30, %v7093_v45  ;;  %v7097_v38 = vadd.f32 %v7096_v61, %v10695_v7  ;;  %v7339_v45 = vsel %vm6165_vm5, %v7334_v4, %v7338_v5 }
 0x55e   : > { %v7544_v54 = vmax.f32 %v7472_v29, 0.0  ;;  %v7474_v23 = vadd.f32 %v7321_v31, %v7095_v22 }
 0x55f   : > { %v7545_v25 = vmax.f32 %v7473_v19, 0.0  ;;  %v7475_v43 = vadd.f32 %v7323_v35, %v7097_v38 }
 0x560   : > { %7616 = vst [vmem:[%s10709_s10 + $0x1e0] sm:$0xff] %v7544_v54  ;;  %v7546_v56 = vmax.f32 %v7474_v23, 0.0 }
 0x561   : > { %7617 = vst [vmem:[%s10709_s10 + $0x1e8] sm:$0xff] %v7545_v25  ;;  %v7547_v6 = vmax.f32 %v7475_v43, 0.0  ;;  %v7100_v60 = vpop.f32.mrb[188].mxu0 }
 0x562   : > { %7618 = vst [vmem:[%s10709_s10 + $0x1f0] sm:$0xff] %v7546_v56  ;;  %v7101_v62 = vadd.f32 %v7100_v60, %v10692_v59  ;;  %v7102_v2 = vpop.f32.mrb[189].mxu0 }
 0x563   : > { %7619 = vst [vmem:[%s10709_s10 + $0x1f8] sm:$0xff] %v7547_v6  ;;  %v7103_v0 = vadd.f32 %v7102_v2, %v10695_v7  ;;  %v7104_v51 = vpop.f32.mrb[190].mxu0 }
 0x564   : > { %v7476_v33 = vadd.f32 %v7325_v50, %v7101_v62  ;;  %v7105_v52 = vadd.f32 %v7104_v51, %v10692_v59  ;;  %v7106_v8 = vpop.f32.mrb[191].mxu0 }
 0x565   : > { %v7477_v55 = vadd.f32 %v7327_v46, %v7103_v0  ;;  %v7107_v34 = vadd.f32 %v7106_v8, %v10695_v7 }
 0x566   : > { %v7548_v16 = vmax.f32 %v7476_v33, 0.0  ;;  %v7478_v36 = vadd.f32 %v7329_v26, %v7105_v52 }
 0x567   : > { %v7549_v13 = vmax.f32 %v7477_v55, 0.0  ;;  %v7479_v17 = vadd.f32 %v7331_v15, %v7107_v34 }
 0x568   : > { %7620 = vst [vmem:[%s10709_s10 + $0x200] sm:$0xff] %v7548_v16  ;;  %v7550_v58 = vmax.f32 %v7478_v36, 0.0 }
 0x569   : > { %7621 = vst [vmem:[%s10709_s10 + $0x208] sm:$0xff] %v7549_v13  ;;  %v7551_v14 = vmax.f32 %v7479_v17, 0.0  ;;  %v7110_v41 = vpop.f32.mrb[192].mxu0 }
 0x56a   : > { %7622 = vst [vmem:[%s10709_s10 + $0x210] sm:$0xff] %v7550_v58  ;;  %v7111_v44 = vadd.f32 %v7110_v41, %v10692_v59  ;;  %v7112_v24 = vpop.f32.mrb[193].mxu0 }
 0x56b   : > { %7623 = vst [vmem:[%s10709_s10 + $0x218] sm:$0xff] %v7551_v14  ;;  %v7113_v18 = vadd.f32 %v7112_v24, %v10695_v7  ;;  %v7114_v11 = vpop.f32.mrb[194].mxu0 }
 0x56c   : > { %v7480_v32 = vadd.f32 %v7333_v49, %v7111_v44  ;;  %v7115_v30 = vadd.f32 %v7114_v11, %v10692_v59  ;;  %v7116_v27 = vpop.f32.mrb[195].mxu0 }
 0x56d   : > { %v7481_v9 = vadd.f32 %v7335_v28, %v7113_v18  ;;  %v7117_v31 = vadd.f32 %v7116_v27, %v10695_v7 }
 0x56e   : > { %v7552_v47 = vmax.f32 %v7480_v32, 0.0  ;;  %v7482_v29 = vadd.f32 %v7337_v21, %v7115_v30 }
 0x56f   : > { %v7553_v22 = vmax.f32 %v7481_v9, 0.0  ;;  %v7483_v61 = vadd.f32 %v7339_v45, %v7117_v31 }
 0x570   : > { %7624 = vst [vmem:[%s10709_s10 + $0x220] sm:$0xff] %v7552_v47  ;;  %v7554_v35 = vmax.f32 %v7482_v29, 0.0 }
 0x571   : > { %7625 = vst [vmem:[%s10709_s10 + $0x228] sm:$0xff] %v7553_v22  ;;  %v7555_v37 = vmax.f32 %v7483_v61, 0.0 }
 0x572   : > { %7626 = vst [vmem:[%s10709_s10 + $0x230] sm:$0xff] %v7554_v35 }
 0x573   : > { %7627 = vst [vmem:[%s10709_s10 + $0x238] sm:$0xff] %v7555_v37 }
 0x574 PF: > { %s18_s27 = sadd.s32 1, %s9708_s27  }
 0x575   : > { %p15_p4 = scmp.ge.s32.totalorder %s18_s27, 4  }
 0x577   :  { %17 = sbr.rel (!%p15_p4) target bundleno = 1 (0x1), region = 90 }

</bundles_post_ra>
